<compile_context>
chip_gen: v5e
topology: v5e:2x2
jax: 0.10.0
libtpu: 0.0.40
codegen_flags: <defaults>
</compile_context>

<pallas_src>
import functools

import jax
import jax.numpy as jnp
from jax.experimental import pallas as pl
from jax.experimental.pallas import tpu as pltpu

EPS = 1e-6


# ----------------------------------------------------------------------------
# Pallas kernel: fused transformer stack (blocks + final LN [+ linear])
# ----------------------------------------------------------------------------
def _layernorm(x, g, b):
    # x: (M, D), g/b broadcastable (1, D). Matches nn.LayerNorm(eps=1e-6).
    mu = jnp.mean(x, axis=-1, keepdims=True)
    var = jnp.mean((x - mu) ** 2, axis=-1, keepdims=True)
    return (x - mu) * jax.lax.rsqrt(var + EPS) * g + b


def stack_kernel(x_ref,
                 ln1_g_ref, ln1_b_ref, wqkv_ref, bqkv_ref, wproj_ref, bproj_ref,
                 ln2_g_ref, ln2_b_ref, w1_ref, b1_ref, w2_ref, b2_ref,
                 fg_ref, fb_ref, *rest,
                 num_heads, batch, seq, final_linear):
    """One grid step == one transformer block; activation resident in VMEM."""
    if final_linear:
        wdec_ref, bdec_ref, o_ref, act_ref = rest
    else:
        o_ref, act_ref = rest

    layer = pl.program_id(0)
    last = pl.num_programs(0) - 1

    # Load the input into the resident activation buffer once.
    @pl.when(layer == 0)
    def _():
        act_ref[...] = x_ref[...]

    x = act_ref[...]                              # (M, D) f32, M = B*L
    M, D = x.shape
    dh = D // num_heads
    scale = dh ** -0.5                            # qk_scale=None -> head_dim**-0.5
    bf16 = jnp.bfloat16

    # --- attention branch ---------------------------------------------------
    h_bf = _layernorm(x, ln1_g_ref[0], ln1_b_ref[0]).astype(bf16)   # cast once
    qkv = jnp.dot(h_bf, wqkv_ref[0],
                  preferred_element_type=jnp.float32) + bqkv_ref[0]  # (M, 3D) f32
    # Per-batch view: (B, L, 3D). Leading-dim split only (no lane relayout),
    # then a single f32->bf16 cast reused by all head slices below.
    qkv3 = qkv.reshape(batch, seq, 3 * D).astype(bf16)

    wproj = wproj_ref[0]                          # (D, D) bf16
    attn = None
    for hd in range(num_heads):
        lo = hd * dh
        qh = qkv3[:, :, lo:lo + dh]                       # (B, L, dh) bf16
        kh = qkv3[:, :, D + lo:D + lo + dh]
        vh = qkv3[:, :, 2 * D + lo:2 * D + lo + dh]
        # Batched over B only: batches stay independent with no mask, and the
        # quadratic score tensor is (B, L, L) per head instead of (B*L, B*L).
        s = jnp.einsum('bqd,bkd->bqk', qh, kh,
                       preferred_element_type=jnp.float32) * scale   # (B, L, L)
        s = s - jnp.max(s, axis=-1, keepdims=True)
        p = jnp.exp(s)
        p = p / jnp.sum(p, axis=-1, keepdims=True)        # exact softmax (parity)
        oh = jnp.einsum('bqk,bkd->bqd', p.astype(bf16), vh,
                        preferred_element_type=jnp.float32)          # (B, L, dh)
        # Fused "concat + output projection": per-head partial matmul against
        # the matching row block of wproj, accumulated in f32.
        contrib = jnp.dot(oh.reshape(M, dh).astype(bf16), wproj[lo:lo + dh, :],
                          preferred_element_type=jnp.float32)        # (M, D)
        attn = contrib if attn is None else attn + contrib
    x = x + attn + bproj_ref[0]                  # residual (drop_path = identity)

    # --- MLP branch -----------------------------------------------------------
    h2_bf = _layernorm(x, ln2_g_ref[0], ln2_b_ref[0]).astype(bf16)   # cast once
    m = jnp.dot(h2_bf, w1_ref[0], preferred_element_type=jnp.float32) + b1_ref[0]
    # TODO(synk): PyTorch nn.GELU default is exact erf; tanh approximation used here.
    m = jax.nn.gelu(m, approximate=True)
    m = jnp.dot(m.astype(bf16), w2_ref[0],
                preferred_element_type=jnp.float32) + b2_ref[0]
    x = x + m
    act_ref[...] = x

    # --- epilogue: final LayerNorm (+ optional decoder_embed linear) ---------
    @pl.when(layer == last)
    def _():
        hf = _layernorm(x, fg_ref[...], fb_ref[...])
        if final_linear:
            o_ref[...] = jnp.dot(hf.astype(bf16), wdec_ref[...],
                                 preferred_element_type=jnp.float32) + bdec_ref[...]
        else:
            o_ref[...] = hf


# ----------------------------------------------------------------------------
# pallas_call wrapper: one call per stack
# ----------------------------------------------------------------------------
def _stacked(blocks, name, dtype=None):
    arr = jnp.stack([blk[name] for blk in blocks], axis=0)
    return arr.astype(dtype) if dtype is not None else arr


def _stack_cost(depth, M, L, D, H, num_heads, Dout, final_linear):
    per_layer = (2 * M * D * 3 * D      # qkv projection
                 + 4 * M * L * D        # per-batch scores + p@v
                 + 2 * M * D * D        # output projection (fused per-head)
                 + 4 * M * D * H)       # mlp fc1 + fc2
    flops = depth * per_layer + (2 * M * D * Dout if final_linear else 0)
    transcendentals = depth * (num_heads * M * L + M * H)
    w_bytes = depth * 2 * (3 * D * D + D * D + 2 * D * H)   # bf16 weights
    a_bytes = 4 * M * (D + Dout)
    return pl.CostEstimate(flops=int(flops), transcendentals=int(transcendentals),
                           bytes_accessed=int(w_bytes + a_bytes))


def stack_forward(x, blocks, norm_g, norm_b, num_heads, dec_w=None, dec_b=None):
    """Fused run of `blocks` + final LayerNorm (+ optional linear), one pallas_call."""
    B, L, D = x.shape
    M = B * L
    depth = len(blocks)
    H = blocks[0]["w1"].shape[1]
    final_linear = dec_w is not None
    Dout = dec_w.shape[1] if final_linear else D
    bf16 = jnp.bfloat16

    layer_ops = [
        (_stacked(blocks, "ln1_g"), (1, 1, D)),
        (_stacked(blocks, "ln1_b"), (1, 1, D)),
        (_stacked(blocks, "wqkv", bf16), (1, D, 3 * D)),
        (_stacked(blocks, "bqkv"), (1, 1, 3 * D)),
        (_stacked(blocks, "wproj", bf16), (1, D, D)),
        (_stacked(blocks, "bproj"), (1, 1, D)),
        (_stacked(blocks, "ln2_g"), (1, 1, D)),
        (_stacked(blocks, "ln2_b"), (1, 1, D)),
        (_stacked(blocks, "w1", bf16), (1, D, H)),
        (_stacked(blocks, "b1"), (1, 1, H)),
        (_stacked(blocks, "w2", bf16), (1, H, D)),
        (_stacked(blocks, "b2"), (1, 1, D)),
    ]
    const_ops = [(norm_g, (1, D)), (norm_b, (1, D))]
    if final_linear:
        const_ops += [(dec_w.astype(bf16), (D, Dout)), (dec_b, (1, Dout))]

    in_specs = [pl.BlockSpec((M, D), lambda l: (0, 0))]                       # x (resident)
    in_specs += [pl.BlockSpec(shape, lambda l: (l, 0, 0)) for _, shape in layer_ops]
    in_specs += [pl.BlockSpec(shape, lambda l: (0, 0)) for _, shape in const_ops]
    operands = [x.reshape(M, D)] + [a for a, _ in layer_ops] + [a for a, _ in const_ops]

    out = pl.pallas_call(
        functools.partial(stack_kernel, num_heads=num_heads, batch=B, seq=L,
                          final_linear=final_linear),
        out_shape=jax.ShapeDtypeStruct((M, Dout), jnp.float32),
        grid=(depth,),
        in_specs=in_specs,
        out_specs=pl.BlockSpec((M, Dout), lambda l: (0, 0)),
        scratch_shapes=[pltpu.VMEM((M, D), jnp.float32)],
        compiler_params=pltpu.CompilerParams(
            dimension_semantics=("arbitrary",),
            # Explicit VMEM budget: ~2 MB of double-buffered bf16 weights +
            # resident activation + per-head (B,L,L) scores — safe on all gens.
            vmem_limit_bytes=32 * 1024 * 1024),
        cost_estimate=_stack_cost(depth, M, L, D, H, num_heads, Dout, final_linear),
    )(*operands)
    return out.reshape(B, L, Dout)


# ----------------------------------------------------------------------------
# Plain-JAX glue (shuffle / gather / tiny single-token MLP / param init)
# ----------------------------------------------------------------------------
def random_masking(x, mask_ratio, key):
    N, L, D = x.shape
    len_keep = int(L * (1 - mask_ratio))
    noise = jax.random.uniform(key, (N, L))
    ids_shuffle = jnp.argsort(noise, axis=1)
    ids_restore = jnp.argsort(ids_shuffle, axis=1)
    ids_keep = ids_shuffle[:, :len_keep]
    x_masked = jnp.take_along_axis(x, ids_keep[..., None], axis=1)
    mask = jnp.ones((N, L), dtype=bool).at[:, :len_keep].set(False)
    mask = jnp.take_along_axis(mask, ids_restore, axis=1)[..., None]
    return x_masked, mask, ids_restore


def mask_token_mlp(p, mean_pose):
    h = jax.nn.relu(mean_pose @ p["mt_w1"] + p["mt_b1"])
    h = jax.nn.relu(h @ p["mt_w2"] + p["mt_b2"])
    return h @ p["mt_w3"] + p["mt_b3"]


def transformer_forward(params, x, num_heads, is_train=True, mask_ratio=0.0, rng=None):
    # ---- encoder (blocks + norm + decoder_embed, fused in one pallas_call) ----
    x = x + params["pos_embed"]
    if is_train:
        x, mask, ids_restore = random_masking(x, mask_ratio, rng)
    else:
        mask, ids_restore = None, None
    x = stack_forward(x, params["blocks"], params["norm_g"], params["norm_b"],
                      num_heads, params["dec_embed_w"], params["dec_embed_b"])

    # ---- decoder ----
    if ids_restore is not None:
        mean_pose = jnp.concatenate(
            [params["init_pose"], params["init_shape"], params["init_cam"]], axis=-1)
        mt = mask_token_mlp(params, mean_pose)                    # (1, Dd)
        B = x.shape[0]
        n_mask = ids_restore.shape[1] - x.shape[1]
        mask_tokens = jnp.broadcast_to(mt[None], (B, n_mask, mt.shape[-1]))
        x_ = jnp.concatenate([x, mask_tokens], axis=1)
        x_ = jnp.take_along_axis(x_, ids_restore[..., None], axis=1)
    else:
        x_ = x
    x = x_ + params["dec_pos_embed"]
    x = stack_forward(x, params["dec_blocks"], params["dec_norm_g"],
                      params["dec_norm_b"], num_heads)
    return x, mask


def _dense(key, din, dout, scale=0.02):
    return scale * jax.random.normal(key, (din, dout), jnp.float32)


def init_block_params(key, dim, hidden):
    k = jax.random.split(key, 4)
    return dict(
        ln1_g=jnp.ones((1, dim), jnp.float32), ln1_b=jnp.zeros((1, dim), jnp.float32),
        wqkv=_dense(k[0], dim, 3 * dim), bqkv=jnp.zeros((1, 3 * dim), jnp.float32),
        wproj=_dense(k[1], dim, dim), bproj=jnp.zeros((1, dim), jnp.float32),
        ln2_g=jnp.ones((1, dim), jnp.float32), ln2_b=jnp.zeros((1, dim), jnp.float32),
        w1=_dense(k[2], dim, hidden), b1=jnp.zeros((1, hidden), jnp.float32),
        w2=_dense(k[3], hidden, dim), b2=jnp.zeros((1, dim), jnp.float32),
    )


def init_params(key, depth, embed_dim, mlp_hidden_dim, length):
    dec_dim = embed_dim // 2
    keys = jax.random.split(key, 16)
    blocks = [init_block_params(keys[i], embed_dim, mlp_hidden_dim) for i in range(depth)]
    dec_blocks = [init_block_params(keys[4 + i], dec_dim, embed_dim * 2)
                  for i in range(depth // 2)]
    return dict(
        pos_embed=0.02 * jax.random.normal(keys[8], (1, length, embed_dim), jnp.float32),
        blocks=blocks,
        norm_g=jnp.ones((1, embed_dim), jnp.float32),
        norm_b=jnp.zeros((1, embed_dim), jnp.float32),
        dec_embed_w=_dense(keys[9], embed_dim, dec_dim),
        dec_embed_b=jnp.zeros((1, dec_dim), jnp.float32),
        dec_pos_embed=0.02 * jax.random.normal(keys[10], (1, length, dec_dim), jnp.float32),
        dec_blocks=dec_blocks,
        dec_norm_g=jnp.ones((1, dec_dim), jnp.float32),
        dec_norm_b=jnp.zeros((1, dec_dim), jnp.float32),
        # mask_token_mlp: Linear(24*6+13, 256) -> ReLU -> Linear(256,512) -> ReLU
        #                 -> Linear(512, embed_dim//2)
        mt_w1=_dense(keys[11], 24 * 6 + 13, 256), mt_b1=jnp.zeros((256,), jnp.float32),
        mt_w2=_dense(keys[12], 256, 512), mt_b2=jnp.zeros((512,), jnp.float32),
        mt_w3=_dense(keys[13], 512, dec_dim), mt_b3=jnp.zeros((dec_dim,), jnp.float32),
        # synthetic stand-ins for SMPL mean params (no .npz load)
        init_pose=0.02 * jax.random.normal(keys[14], (1, 144), jnp.float32),
        init_shape=0.02 * jax.random.normal(keys[15], (1, 10), jnp.float32),
        init_cam=jnp.array([[0.9, 0.0, 0.0]], jnp.float32),
    )


# ----------------------------------------------------------------------------
if __name__ == "__main__":
    # Small config consistent with the module's structure.
    DEPTH, EMBED_DIM, MLP_HIDDEN, HEADS, LENGTH = 3, 256, 512, 8, 16
    B = 2

    root = jax.random.PRNGKey(0)
    k_param, k_x, k_mask = jax.random.split(root, 3)

    params = init_params(k_param, DEPTH, EMBED_DIM, MLP_HIDDEN, LENGTH)
    x = jax.random.normal(k_x, (B, LENGTH, EMBED_DIM), jnp.float32)

    pred, mask = transformer_forward(params, x, num_heads=HEADS,
                                     is_train=True, mask_ratio=0.5, rng=k_mask)
    jax.block_until_ready(pred)
    jax.block_until_ready(mask)

    assert pred.shape == (B, LENGTH, EMBED_DIM // 2)
    assert mask.shape == (B, LENGTH, 1)
    assert bool(jnp.all(jnp.isfinite(pred)))

    # Also exercise the is_train=False path (no masking / restore).
    pred_eval, mask_eval = transformer_forward(params, x, num_heads=HEADS, is_train=False)
    jax.block_until_ready(pred_eval)
    assert pred_eval.shape == (B, LENGTH, EMBED_DIM // 2) and mask_eval is None
    assert bool(jnp.all(jnp.isfinite(pred_eval)))

    print("KERNEL_OK")
</pallas_src>

<mosaic_0001>
module attributes {stable_mosaic.version = 11 : i64} {
  func.func @stack_kernel(%arg0: i32, %arg1: memref<16x256xf32, #tpu.memory_space<vmem>>, %arg2: memref<1x1x256xf32, #tpu.memory_space<vmem>>, %arg3: memref<1x1x256xf32, #tpu.memory_space<vmem>>, %arg4: memref<1x256x768xbf16, #tpu.memory_space<vmem>>, %arg5: memref<1x1x768xf32, #tpu.memory_space<vmem>>, %arg6: memref<1x256x256xbf16, #tpu.memory_space<vmem>>, %arg7: memref<1x1x256xf32, #tpu.memory_space<vmem>>, %arg8: memref<1x1x256xf32, #tpu.memory_space<vmem>>, %arg9: memref<1x1x256xf32, #tpu.memory_space<vmem>>, %arg10: memref<1x256x512xbf16, #tpu.memory_space<vmem>>, %arg11: memref<1x1x512xf32, #tpu.memory_space<vmem>>, %arg12: memref<1x512x256xbf16, #tpu.memory_space<vmem>>, %arg13: memref<1x1x256xf32, #tpu.memory_space<vmem>>, %arg14: memref<1x256xf32, #tpu.memory_space<vmem>>, %arg15: memref<1x256xf32, #tpu.memory_space<vmem>>, %arg16: memref<256x128xbf16, #tpu.memory_space<vmem>>, %arg17: memref<1x128xf32, #tpu.memory_space<vmem>>, %arg18: memref<16x128xf32, #tpu.memory_space<vmem>>, %arg19: memref<16x256xf32, #tpu.memory_space<vmem>>) attributes {dimension_semantics = [#tpu.dimension_semantics<arbitrary>], iteration_bounds = array<i64: 3>, scalar_prefetch = 0 : i64, scratch_operands = 1 : i64, tpu.core_type = #tpu.core_type<tc>, window_params = [{pipeline_mode = #tpu.pipeline_mode<synchronous>, transform_indices = @transform_0, window_bounds = array<i64: 16, 256>}, {transform_indices = @transform_1, window_bounds = array<i64: 1, 1, 256>}, {transform_indices = @transform_2, window_bounds = array<i64: 1, 1, 256>}, {transform_indices = @transform_3, window_bounds = array<i64: 1, 256, 768>}, {transform_indices = @transform_4, window_bounds = array<i64: 1, 1, 768>}, {transform_indices = @transform_5, window_bounds = array<i64: 1, 256, 256>}, {transform_indices = @transform_6, window_bounds = array<i64: 1, 1, 256>}, {transform_indices = @transform_7, window_bounds = array<i64: 1, 1, 256>}, {transform_indices = @transform_8, window_bounds = array<i64: 1, 1, 256>}, {transform_indices = @transform_9, window_bounds = array<i64: 1, 256, 512>}, {transform_indices = @transform_10, window_bounds = array<i64: 1, 1, 512>}, {transform_indices = @transform_11, window_bounds = array<i64: 1, 512, 256>}, {transform_indices = @transform_12, window_bounds = array<i64: 1, 1, 256>}, {pipeline_mode = #tpu.pipeline_mode<synchronous>, transform_indices = @transform_13, window_bounds = array<i64: 1, 256>}, {pipeline_mode = #tpu.pipeline_mode<synchronous>, transform_indices = @transform_14, window_bounds = array<i64: 1, 256>}, {pipeline_mode = #tpu.pipeline_mode<synchronous>, transform_indices = @transform_15, window_bounds = array<i64: 256, 128>}, {pipeline_mode = #tpu.pipeline_mode<synchronous>, transform_indices = @transform_16, window_bounds = array<i64: 1, 128>}, {pipeline_mode = #tpu.pipeline_mode<synchronous>, transform_indices = @transform_17, window_bounds = array<i64: 16, 128>}]} {
    %c0_i32 = arith.constant 0 : i32
    %0 = arith.cmpi eq, %arg0, %c0_i32 : i32
    %1 = arith.extui %0 : i1 to i32
    %c0_i32_0 = arith.constant 0 : i32
    %2 = arith.cmpi ne, %1, %c0_i32_0 : i32
    scf.if %2 {
      %c0_105 = arith.constant 0 : index
      %c0_106 = arith.constant 0 : index
      %282 = vector.load %arg1[%c0_105, %c0_106] : memref<16x256xf32, #tpu.memory_space<vmem>>, vector<16x256xf32>
      %c0_107 = arith.constant 0 : index
      %c0_108 = arith.constant 0 : index
      %283 = vector.load %arg19[%c0_107, %c0_108] : memref<16x256xf32, #tpu.memory_space<vmem>>, vector<16x256xf32>
      tpu.vector_store %arg19[%c0_107, %c0_108], %282 {strides = array<i32>} : memref<16x256xf32, #tpu.memory_space<vmem>>, vector<16x256xf32>,
    } else {
    }
    %c0 = arith.constant 0 : index
    %c0_1 = arith.constant 0 : index
    %3 = vector.load %arg19[%c0, %c0_1] : memref<16x256xf32, #tpu.memory_space<vmem>>, vector<16x256xf32>
    %c0_2 = arith.constant 0 : index
    %c0_3 = arith.constant 0 : index
    %c0_4 = arith.constant 0 : index
    %4 = vector.load %arg2[%c0_2, %c0_3, %c0_4] : memref<1x1x256xf32, #tpu.memory_space<vmem>>, vector<1x1x256xf32>
    %5 = vector.shape_cast %4 : vector<1x1x256xf32> to vector<1x256xf32>
    %c0_5 = arith.constant 0 : index
    %c0_6 = arith.constant 0 : index
    %c0_7 = arith.constant 0 : index
    %6 = vector.load %arg3[%c0_5, %c0_6, %c0_7] : memref<1x1x256xf32, #tpu.memory_space<vmem>>, vector<1x1x256xf32>
    %7 = vector.shape_cast %6 : vector<1x1x256xf32> to vector<1x256xf32>
    %cst = arith.constant dense<0.000000e+00> : vector<16xf32>
    %8 = vector.multi_reduction <add>, %3, %cst [1] : vector<16x256xf32> to vector<16xf32>
    %9 = vector.shape_cast %8 : vector<16xf32> to vector<16x1xf32>
    %cst_8 = arith.constant 2.560000e+02 : f32
    %10 = vector.broadcast %cst_8 : f32 to vector<16x1xf32>
    %11 = arith.divf %9, %10 : vector<16x1xf32>
    %12 = vector.broadcast %11 : vector<16x1xf32> to vector<16x256xf32>
    %13 = arith.subf %3, %12 : vector<16x256xf32>
    %14 = arith.mulf %13, %13 : vector<16x256xf32>
    %cst_9 = arith.constant dense<0.000000e+00> : vector<16xf32>
    %15 = vector.multi_reduction <add>, %14, %cst_9 [1] : vector<16x256xf32> to vector<16xf32>
    %16 = vector.shape_cast %15 : vector<16xf32> to vector<16x1xf32>
    %cst_10 = arith.constant 2.560000e+02 : f32
    %17 = vector.broadcast %cst_10 : f32 to vector<16x1xf32>
    %18 = arith.divf %16, %17 : vector<16x1xf32>
    %19 = vector.broadcast %11 : vector<16x1xf32> to vector<16x256xf32>
    %20 = arith.subf %3, %19 : vector<16x256xf32>
    %cst_11 = arith.constant 9.99999997E-7 : f32
    %21 = vector.broadcast %cst_11 : f32 to vector<16x1xf32>
    %22 = arith.addf %18, %21 : vector<16x1xf32>
    %23 = math.rsqrt %22 : vector<16x1xf32>
    %24 = vector.broadcast %23 : vector<16x1xf32> to vector<16x256xf32>
    %25 = arith.mulf %20, %24 : vector<16x256xf32>
    %26 = vector.broadcast %5 : vector<1x256xf32> to vector<16x256xf32>
    %27 = arith.mulf %25, %26 : vector<16x256xf32>
    %28 = vector.broadcast %7 : vector<1x256xf32> to vector<16x256xf32>
    %29 = arith.addf %27, %28 : vector<16x256xf32>
    %30 = arith.truncf %29 : vector<16x256xf32> to vector<16x256xbf16>
    %c0_12 = arith.constant 0 : index
    %c0_13 = arith.constant 0 : index
    %c0_14 = arith.constant 0 : index
    %31 = vector.load %arg4[%c0_12, %c0_13, %c0_14] : memref<1x256x768xbf16, #tpu.memory_space<vmem>>, vector<1x256x768xbf16>
    %32 = vector.shape_cast %31 : vector<1x256x768xbf16> to vector<256x768xbf16>
    %cst_15 = arith.constant dense<0.000000e+00> : vector<16x768xf32>
    %33 = tpu.matmul %30, %32, %cst_15 {dimension_numbers = #tpu.dot_dimension_numbers<[1], [0], [0], [1], [0, 0, 1, 1], [], []>} : vector<16x256xbf16>, vector<256x768xbf16>, vector<16x768xf32> -> vector<16x768xf32>
    %c0_16 = arith.constant 0 : index
    %c0_17 = arith.constant 0 : index
    %c0_18 = arith.constant 0 : index
    %34 = vector.load %arg5[%c0_16, %c0_17, %c0_18] : memref<1x1x768xf32, #tpu.memory_space<vmem>>, vector<1x1x768xf32>
    %35 = vector.shape_cast %34 : vector<1x1x768xf32> to vector<1x768xf32>
    %36 = vector.broadcast %35 : vector<1x768xf32> to vector<16x768xf32>
    %37 = arith.addf %33, %36 : vector<16x768xf32>
    %38 = vector.shape_cast %37 : vector<16x768xf32> to vector<2x8x768xf32>
    %39 = arith.truncf %38 : vector<2x8x768xf32> to vector<2x8x768xbf16>
    %c0_19 = arith.constant 0 : index
    %c0_20 = arith.constant 0 : index
    %c0_21 = arith.constant 0 : index
    %40 = vector.load %arg6[%c0_19, %c0_20, %c0_21] : memref<1x256x256xbf16, #tpu.memory_space<vmem>>, vector<1x256x256xbf16>
    %41 = vector.shape_cast %40 : vector<1x256x256xbf16> to vector<256x256xbf16>
    %42 = vector.extract_strided_slice %39 {offsets = [0, 0, 0], sizes = [2, 8, 32], strides = [1, 1, 1]} : vector<2x8x768xbf16> to vector<2x8x32xbf16>
    %43 = vector.extract_strided_slice %39 {offsets = [0, 0, 256], sizes = [2, 8, 32], strides = [1, 1, 1]} : vector<2x8x768xbf16> to vector<2x8x32xbf16>
    %44 = vector.extract_strided_slice %39 {offsets = [0, 0, 512], sizes = [2, 8, 32], strides = [1, 1, 1]} : vector<2x8x768xbf16> to vector<2x8x32xbf16>
    "tpu.trace_start"() <{level = 10 : i32, message = "bqd,bkd->bqk"}> : () -> ()
    %cst_22 = arith.constant dense<0.000000e+00> : vector<2x8x8xf32>
    %45 = tpu.matmul %42, %43, %cst_22 {dimension_numbers = #tpu.dot_dimension_numbers<[2], [2], [1], [1], [0, 0, 0, 1, 1, 1], [0], [0]>} : vector<2x8x32xbf16>, vector<2x8x32xbf16>, vector<2x8x8xf32> -> vector<2x8x8xf32>
    "tpu.trace_stop"() : () -> ()
    %cst_23 = arith.constant 0.176776692 : f32
    %46 = vector.broadcast %cst_23 : f32 to vector<2x8x8xf32>
    %47 = arith.mulf %45, %46 : vector<2x8x8xf32>
    %cst_24 = arith.constant dense<0xFF800000> : vector<2x8xf32>
    %48 = vector.multi_reduction <maximumf>, %47, %cst_24 [2] : vector<2x8x8xf32> to vector<2x8xf32>
    %49 = vector.shape_cast %48 : vector<2x8xf32> to vector<2x8x1xf32>
    %50 = vector.broadcast %49 : vector<2x8x1xf32> to vector<2x8x8xf32>
    %51 = arith.subf %47, %50 : vector<2x8x8xf32>
    %52 = math.exp %51 : vector<2x8x8xf32>
    %cst_25 = arith.constant dense<0.000000e+00> : vector<2x8xf32>
    %53 = vector.multi_reduction <add>, %52, %cst_25 [2] : vector<2x8x8xf32> to vector<2x8xf32>
    %54 = vector.shape_cast %53 : vector<2x8xf32> to vector<2x8x1xf32>
    %55 = vector.broadcast %54 : vector<2x8x1xf32> to vector<2x8x8xf32>
    %56 = arith.divf %52, %55 : vector<2x8x8xf32>
    %57 = arith.truncf %56 : vector<2x8x8xf32> to vector<2x8x8xbf16>
    "tpu.trace_start"() <{level = 10 : i32, message = "bqk,bkd->bqd"}> : () -> ()
    %cst_26 = arith.constant dense<0.000000e+00> : vector<2x8x32xf32>
    %58 = tpu.matmul %57, %44, %cst_26 {dimension_numbers = #tpu.dot_dimension_numbers<[2], [1], [1], [2], [0, 0, 0, 1, 1, 2], [0], [0]>} : vector<2x8x8xbf16>, vector<2x8x32xbf16>, vector<2x8x32xf32> -> vector<2x8x32xf32>
    "tpu.trace_stop"() : () -> ()
    %59 = vector.shape_cast %58 : vector<2x8x32xf32> to vector<16x32xf32>
    %60 = arith.truncf %59 : vector<16x32xf32> to vector<16x32xbf16>
    %61 = vector.extract_strided_slice %41 {offsets = [0, 0], sizes = [32, 256], strides = [1, 1]} : vector<256x256xbf16> to vector<32x256xbf16>
    %cst_27 = arith.constant dense<0.000000e+00> : vector<16x256xf32>
    %62 = tpu.matmul %60, %61, %cst_27 {dimension_numbers = #tpu.dot_dimension_numbers<[1], [0], [0], [1], [0, 0, 1, 1], [], []>} : vector<16x32xbf16>, vector<32x256xbf16>, vector<16x256xf32> -> vector<16x256xf32>
    %63 = vector.extract_strided_slice %39 {offsets = [0, 0, 32], sizes = [2, 8, 32], strides = [1, 1, 1]} : vector<2x8x768xbf16> to vector<2x8x32xbf16>
    %64 = vector.extract_strided_slice %39 {offsets = [0, 0, 288], sizes = [2, 8, 32], strides = [1, 1, 1]} : vector<2x8x768xbf16> to vector<2x8x32xbf16>
    %65 = vector.extract_strided_slice %39 {offsets = [0, 0, 544], sizes = [2, 8, 32], strides = [1, 1, 1]} : vector<2x8x768xbf16> to vector<2x8x32xbf16>
    "tpu.trace_start"() <{level = 10 : i32, message = "bqd,bkd->bqk"}> : () -> ()
    %cst_28 = arith.constant dense<0.000000e+00> : vector<2x8x8xf32>
    %66 = tpu.matmul %63, %64, %cst_28 {dimension_numbers = #tpu.dot_dimension_numbers<[2], [2], [1], [1], [0, 0, 0, 1, 1, 1], [0], [0]>} : vector<2x8x32xbf16>, vector<2x8x32xbf16>, vector<2x8x8xf32> -> vector<2x8x8xf32>
    "tpu.trace_stop"() : () -> ()
    %cst_29 = arith.constant 0.176776692 : f32
    %67 = vector.broadcast %cst_29 : f32 to vector<2x8x8xf32>
    %68 = arith.mulf %66, %67 : vector<2x8x8xf32>
    %cst_30 = arith.constant dense<0xFF800000> : vector<2x8xf32>
    %69 = vector.multi_reduction <maximumf>, %68, %cst_30 [2] : vector<2x8x8xf32> to vector<2x8xf32>
    %70 = vector.shape_cast %69 : vector<2x8xf32> to vector<2x8x1xf32>
    %71 = vector.broadcast %70 : vector<2x8x1xf32> to vector<2x8x8xf32>
    %72 = arith.subf %68, %71 : vector<2x8x8xf32>
    %73 = math.exp %72 : vector<2x8x8xf32>
    %cst_31 = arith.constant dense<0.000000e+00> : vector<2x8xf32>
    %74 = vector.multi_reduction <add>, %73, %cst_31 [2] : vector<2x8x8xf32> to vector<2x8xf32>
    %75 = vector.shape_cast %74 : vector<2x8xf32> to vector<2x8x1xf32>
    %76 = vector.broadcast %75 : vector<2x8x1xf32> to vector<2x8x8xf32>
    %77 = arith.divf %73, %76 : vector<2x8x8xf32>
    %78 = arith.truncf %77 : vector<2x8x8xf32> to vector<2x8x8xbf16>
    "tpu.trace_start"() <{level = 10 : i32, message = "bqk,bkd->bqd"}> : () -> ()
    %cst_32 = arith.constant dense<0.000000e+00> : vector<2x8x32xf32>
    %79 = tpu.matmul %78, %65, %cst_32 {dimension_numbers = #tpu.dot_dimension_numbers<[2], [1], [1], [2], [0, 0, 0, 1, 1, 2], [0], [0]>} : vector<2x8x8xbf16>, vector<2x8x32xbf16>, vector<2x8x32xf32> -> vector<2x8x32xf32>
    "tpu.trace_stop"() : () -> ()
    %80 = vector.shape_cast %79 : vector<2x8x32xf32> to vector<16x32xf32>
    %81 = arith.truncf %80 : vector<16x32xf32> to vector<16x32xbf16>
    %82 = vector.extract_strided_slice %41 {offsets = [32, 0], sizes = [32, 256], strides = [1, 1]} : vector<256x256xbf16> to vector<32x256xbf16>
    %cst_33 = arith.constant dense<0.000000e+00> : vector<16x256xf32>
    %83 = tpu.matmul %81, %82, %cst_33 {dimension_numbers = #tpu.dot_dimension_numbers<[1], [0], [0], [1], [0, 0, 1, 1], [], []>} : vector<16x32xbf16>, vector<32x256xbf16>, vector<16x256xf32> -> vector<16x256xf32>
    %84 = arith.addf %62, %83 : vector<16x256xf32>
    %85 = vector.extract_strided_slice %39 {offsets = [0, 0, 64], sizes = [2, 8, 32], strides = [1, 1, 1]} : vector<2x8x768xbf16> to vector<2x8x32xbf16>
    %86 = vector.extract_strided_slice %39 {offsets = [0, 0, 320], sizes = [2, 8, 32], strides = [1, 1, 1]} : vector<2x8x768xbf16> to vector<2x8x32xbf16>
    %87 = vector.extract_strided_slice %39 {offsets = [0, 0, 576], sizes = [2, 8, 32], strides = [1, 1, 1]} : vector<2x8x768xbf16> to vector<2x8x32xbf16>
    "tpu.trace_start"() <{level = 10 : i32, message = "bqd,bkd->bqk"}> : () -> ()
    %cst_34 = arith.constant dense<0.000000e+00> : vector<2x8x8xf32>
    %88 = tpu.matmul %85, %86, %cst_34 {dimension_numbers = #tpu.dot_dimension_numbers<[2], [2], [1], [1], [0, 0, 0, 1, 1, 1], [0], [0]>} : vector<2x8x32xbf16>, vector<2x8x32xbf16>, vector<2x8x8xf32> -> vector<2x8x8xf32>
    "tpu.trace_stop"() : () -> ()
    %cst_35 = arith.constant 0.176776692 : f32
    %89 = vector.broadcast %cst_35 : f32 to vector<2x8x8xf32>
    %90 = arith.mulf %88, %89 : vector<2x8x8xf32>
    %cst_36 = arith.constant dense<0xFF800000> : vector<2x8xf32>
    %91 = vector.multi_reduction <maximumf>, %90, %cst_36 [2] : vector<2x8x8xf32> to vector<2x8xf32>
    %92 = vector.shape_cast %91 : vector<2x8xf32> to vector<2x8x1xf32>
    %93 = vector.broadcast %92 : vector<2x8x1xf32> to vector<2x8x8xf32>
    %94 = arith.subf %90, %93 : vector<2x8x8xf32>
    %95 = math.exp %94 : vector<2x8x8xf32>
    %cst_37 = arith.constant dense<0.000000e+00> : vector<2x8xf32>
    %96 = vector.multi_reduction <add>, %95, %cst_37 [2] : vector<2x8x8xf32> to vector<2x8xf32>
    %97 = vector.shape_cast %96 : vector<2x8xf32> to vector<2x8x1xf32>
    %98 = vector.broadcast %97 : vector<2x8x1xf32> to vector<2x8x8xf32>
    %99 = arith.divf %95, %98 : vector<2x8x8xf32>
    %100 = arith.truncf %99 : vector<2x8x8xf32> to vector<2x8x8xbf16>
    "tpu.trace_start"() <{level = 10 : i32, message = "bqk,bkd->bqd"}> : () -> ()
    %cst_38 = arith.constant dense<0.000000e+00> : vector<2x8x32xf32>
    %101 = tpu.matmul %100, %87, %cst_38 {dimension_numbers = #tpu.dot_dimension_numbers<[2], [1], [1], [2], [0, 0, 0, 1, 1, 2], [0], [0]>} : vector<2x8x8xbf16>, vector<2x8x32xbf16>, vector<2x8x32xf32> -> vector<2x8x32xf32>
    "tpu.trace_stop"() : () -> ()
    %102 = vector.shape_cast %101 : vector<2x8x32xf32> to vector<16x32xf32>
    %103 = arith.truncf %102 : vector<16x32xf32> to vector<16x32xbf16>
    %104 = vector.extract_strided_slice %41 {offsets = [64, 0], sizes = [32, 256], strides = [1, 1]} : vector<256x256xbf16> to vector<32x256xbf16>
    %cst_39 = arith.constant dense<0.000000e+00> : vector<16x256xf32>
    %105 = tpu.matmul %103, %104, %cst_39 {dimension_numbers = #tpu.dot_dimension_numbers<[1], [0], [0], [1], [0, 0, 1, 1], [], []>} : vector<16x32xbf16>, vector<32x256xbf16>, vector<16x256xf32> -> vector<16x256xf32>
    %106 = arith.addf %84, %105 : vector<16x256xf32>
    %107 = vector.extract_strided_slice %39 {offsets = [0, 0, 96], sizes = [2, 8, 32], strides = [1, 1, 1]} : vector<2x8x768xbf16> to vector<2x8x32xbf16>
    %108 = vector.extract_strided_slice %39 {offsets = [0, 0, 352], sizes = [2, 8, 32], strides = [1, 1, 1]} : vector<2x8x768xbf16> to vector<2x8x32xbf16>
    %109 = vector.extract_strided_slice %39 {offsets = [0, 0, 608], sizes = [2, 8, 32], strides = [1, 1, 1]} : vector<2x8x768xbf16> to vector<2x8x32xbf16>
    "tpu.trace_start"() <{level = 10 : i32, message = "bqd,bkd->bqk"}> : () -> ()
    %cst_40 = arith.constant dense<0.000000e+00> : vector<2x8x8xf32>
    %110 = tpu.matmul %107, %108, %cst_40 {dimension_numbers = #tpu.dot_dimension_numbers<[2], [2], [1], [1], [0, 0, 0, 1, 1, 1], [0], [0]>} : vector<2x8x32xbf16>, vector<2x8x32xbf16>, vector<2x8x8xf32> -> vector<2x8x8xf32>
    "tpu.trace_stop"() : () -> ()
    %cst_41 = arith.constant 0.176776692 : f32
    %111 = vector.broadcast %cst_41 : f32 to vector<2x8x8xf32>
    %112 = arith.mulf %110, %111 : vector<2x8x8xf32>
    %cst_42 = arith.constant dense<0xFF800000> : vector<2x8xf32>
    %113 = vector.multi_reduction <maximumf>, %112, %cst_42 [2] : vector<2x8x8xf32> to vector<2x8xf32>
    %114 = vector.shape_cast %113 : vector<2x8xf32> to vector<2x8x1xf32>
    %115 = vector.broadcast %114 : vector<2x8x1xf32> to vector<2x8x8xf32>
    %116 = arith.subf %112, %115 : vector<2x8x8xf32>
    %117 = math.exp %116 : vector<2x8x8xf32>
    %cst_43 = arith.constant dense<0.000000e+00> : vector<2x8xf32>
    %118 = vector.multi_reduction <add>, %117, %cst_43 [2] : vector<2x8x8xf32> to vector<2x8xf32>
    %119 = vector.shape_cast %118 : vector<2x8xf32> to vector<2x8x1xf32>
    %120 = vector.broadcast %119 : vector<2x8x1xf32> to vector<2x8x8xf32>
    %121 = arith.divf %117, %120 : vector<2x8x8xf32>
    %122 = arith.truncf %121 : vector<2x8x8xf32> to vector<2x8x8xbf16>
    "tpu.trace_start"() <{level = 10 : i32, message = "bqk,bkd->bqd"}> : () -> ()
    %cst_44 = arith.constant dense<0.000000e+00> : vector<2x8x32xf32>
    %123 = tpu.matmul %122, %109, %cst_44 {dimension_numbers = #tpu.dot_dimension_numbers<[2], [1], [1], [2], [0, 0, 0, 1, 1, 2], [0], [0]>} : vector<2x8x8xbf16>, vector<2x8x32xbf16>, vector<2x8x32xf32> -> vector<2x8x32xf32>
    "tpu.trace_stop"() : () -> ()
    %124 = vector.shape_cast %123 : vector<2x8x32xf32> to vector<16x32xf32>
    %125 = arith.truncf %124 : vector<16x32xf32> to vector<16x32xbf16>
    %126 = vector.extract_strided_slice %41 {offsets = [96, 0], sizes = [32, 256], strides = [1, 1]} : vector<256x256xbf16> to vector<32x256xbf16>
    %cst_45 = arith.constant dense<0.000000e+00> : vector<16x256xf32>
    %127 = tpu.matmul %125, %126, %cst_45 {dimension_numbers = #tpu.dot_dimension_numbers<[1], [0], [0], [1], [0, 0, 1, 1], [], []>} : vector<16x32xbf16>, vector<32x256xbf16>, vector<16x256xf32> -> vector<16x256xf32>
    %128 = arith.addf %106, %127 : vector<16x256xf32>
    %129 = vector.extract_strided_slice %39 {offsets = [0, 0, 128], sizes = [2, 8, 32], strides = [1, 1, 1]} : vector<2x8x768xbf16> to vector<2x8x32xbf16>
    %130 = vector.extract_strided_slice %39 {offsets = [0, 0, 384], sizes = [2, 8, 32], strides = [1, 1, 1]} : vector<2x8x768xbf16> to vector<2x8x32xbf16>
    %131 = vector.extract_strided_slice %39 {offsets = [0, 0, 640], sizes = [2, 8, 32], strides = [1, 1, 1]} : vector<2x8x768xbf16> to vector<2x8x32xbf16>
    "tpu.trace_start"() <{level = 10 : i32, message = "bqd,bkd->bqk"}> : () -> ()
    %cst_46 = arith.constant dense<0.000000e+00> : vector<2x8x8xf32>
    %132 = tpu.matmul %129, %130, %cst_46 {dimension_numbers = #tpu.dot_dimension_numbers<[2], [2], [1], [1], [0, 0, 0, 1, 1, 1], [0], [0]>} : vector<2x8x32xbf16>, vector<2x8x32xbf16>, vector<2x8x8xf32> -> vector<2x8x8xf32>
    "tpu.trace_stop"() : () -> ()
    %cst_47 = arith.constant 0.176776692 : f32
    %133 = vector.broadcast %cst_47 : f32 to vector<2x8x8xf32>
    %134 = arith.mulf %132, %133 : vector<2x8x8xf32>
    %cst_48 = arith.constant dense<0xFF800000> : vector<2x8xf32>
    %135 = vector.multi_reduction <maximumf>, %134, %cst_48 [2] : vector<2x8x8xf32> to vector<2x8xf32>
    %136 = vector.shape_cast %135 : vector<2x8xf32> to vector<2x8x1xf32>
    %137 = vector.broadcast %136 : vector<2x8x1xf32> to vector<2x8x8xf32>
    %138 = arith.subf %134, %137 : vector<2x8x8xf32>
    %139 = math.exp %138 : vector<2x8x8xf32>
    %cst_49 = arith.constant dense<0.000000e+00> : vector<2x8xf32>
    %140 = vector.multi_reduction <add>, %139, %cst_49 [2] : vector<2x8x8xf32> to vector<2x8xf32>
    %141 = vector.shape_cast %140 : vector<2x8xf32> to vector<2x8x1xf32>
    %142 = vector.broadcast %141 : vector<2x8x1xf32> to vector<2x8x8xf32>
    %143 = arith.divf %139, %142 : vector<2x8x8xf32>
    %144 = arith.truncf %143 : vector<2x8x8xf32> to vector<2x8x8xbf16>
    "tpu.trace_start"() <{level = 10 : i32, message = "bqk,bkd->bqd"}> : () -> ()
    %cst_50 = arith.constant dense<0.000000e+00> : vector<2x8x32xf32>
    %145 = tpu.matmul %144, %131, %cst_50 {dimension_numbers = #tpu.dot_dimension_numbers<[2], [1], [1], [2], [0, 0, 0, 1, 1, 2], [0], [0]>} : vector<2x8x8xbf16>, vector<2x8x32xbf16>, vector<2x8x32xf32> -> vector<2x8x32xf32>
    "tpu.trace_stop"() : () -> ()
    %146 = vector.shape_cast %145 : vector<2x8x32xf32> to vector<16x32xf32>
    %147 = arith.truncf %146 : vector<16x32xf32> to vector<16x32xbf16>
    %148 = vector.extract_strided_slice %41 {offsets = [128, 0], sizes = [32, 256], strides = [1, 1]} : vector<256x256xbf16> to vector<32x256xbf16>
    %cst_51 = arith.constant dense<0.000000e+00> : vector<16x256xf32>
    %149 = tpu.matmul %147, %148, %cst_51 {dimension_numbers = #tpu.dot_dimension_numbers<[1], [0], [0], [1], [0, 0, 1, 1], [], []>} : vector<16x32xbf16>, vector<32x256xbf16>, vector<16x256xf32> -> vector<16x256xf32>
    %150 = arith.addf %128, %149 : vector<16x256xf32>
    %151 = vector.extract_strided_slice %39 {offsets = [0, 0, 160], sizes = [2, 8, 32], strides = [1, 1, 1]} : vector<2x8x768xbf16> to vector<2x8x32xbf16>
    %152 = vector.extract_strided_slice %39 {offsets = [0, 0, 416], sizes = [2, 8, 32], strides = [1, 1, 1]} : vector<2x8x768xbf16> to vector<2x8x32xbf16>
    %153 = vector.extract_strided_slice %39 {offsets = [0, 0, 672], sizes = [2, 8, 32], strides = [1, 1, 1]} : vector<2x8x768xbf16> to vector<2x8x32xbf16>
    "tpu.trace_start"() <{level = 10 : i32, message = "bqd,bkd->bqk"}> : () -> ()
    %cst_52 = arith.constant dense<0.000000e+00> : vector<2x8x8xf32>
    %154 = tpu.matmul %151, %152, %cst_52 {dimension_numbers = #tpu.dot_dimension_numbers<[2], [2], [1], [1], [0, 0, 0, 1, 1, 1], [0], [0]>} : vector<2x8x32xbf16>, vector<2x8x32xbf16>, vector<2x8x8xf32> -> vector<2x8x8xf32>
    "tpu.trace_stop"() : () -> ()
    %cst_53 = arith.constant 0.176776692 : f32
    %155 = vector.broadcast %cst_53 : f32 to vector<2x8x8xf32>
    %156 = arith.mulf %154, %155 : vector<2x8x8xf32>
    %cst_54 = arith.constant dense<0xFF800000> : vector<2x8xf32>
    %157 = vector.multi_reduction <maximumf>, %156, %cst_54 [2] : vector<2x8x8xf32> to vector<2x8xf32>
    %158 = vector.shape_cast %157 : vector<2x8xf32> to vector<2x8x1xf32>
    %159 = vector.broadcast %158 : vector<2x8x1xf32> to vector<2x8x8xf32>
    %160 = arith.subf %156, %159 : vector<2x8x8xf32>
    %161 = math.exp %160 : vector<2x8x8xf32>
    %cst_55 = arith.constant dense<0.000000e+00> : vector<2x8xf32>
    %162 = vector.multi_reduction <add>, %161, %cst_55 [2] : vector<2x8x8xf32> to vector<2x8xf32>
    %163 = vector.shape_cast %162 : vector<2x8xf32> to vector<2x8x1xf32>
    %164 = vector.broadcast %163 : vector<2x8x1xf32> to vector<2x8x8xf32>
    %165 = arith.divf %161, %164 : vector<2x8x8xf32>
    %166 = arith.truncf %165 : vector<2x8x8xf32> to vector<2x8x8xbf16>
    "tpu.trace_start"() <{level = 10 : i32, message = "bqk,bkd->bqd"}> : () -> ()
    %cst_56 = arith.constant dense<0.000000e+00> : vector<2x8x32xf32>
    %167 = tpu.matmul %166, %153, %cst_56 {dimension_numbers = #tpu.dot_dimension_numbers<[2], [1], [1], [2], [0, 0, 0, 1, 1, 2], [0], [0]>} : vector<2x8x8xbf16>, vector<2x8x32xbf16>, vector<2x8x32xf32> -> vector<2x8x32xf32>
    "tpu.trace_stop"() : () -> ()
    %168 = vector.shape_cast %167 : vector<2x8x32xf32> to vector<16x32xf32>
    %169 = arith.truncf %168 : vector<16x32xf32> to vector<16x32xbf16>
    %170 = vector.extract_strided_slice %41 {offsets = [160, 0], sizes = [32, 256], strides = [1, 1]} : vector<256x256xbf16> to vector<32x256xbf16>
    %cst_57 = arith.constant dense<0.000000e+00> : vector<16x256xf32>
    %171 = tpu.matmul %169, %170, %cst_57 {dimension_numbers = #tpu.dot_dimension_numbers<[1], [0], [0], [1], [0, 0, 1, 1], [], []>} : vector<16x32xbf16>, vector<32x256xbf16>, vector<16x256xf32> -> vector<16x256xf32>
    %172 = arith.addf %150, %171 : vector<16x256xf32>
    %173 = vector.extract_strided_slice %39 {offsets = [0, 0, 192], sizes = [2, 8, 32], strides = [1, 1, 1]} : vector<2x8x768xbf16> to vector<2x8x32xbf16>
    %174 = vector.extract_strided_slice %39 {offsets = [0, 0, 448], sizes = [2, 8, 32], strides = [1, 1, 1]} : vector<2x8x768xbf16> to vector<2x8x32xbf16>
    %175 = vector.extract_strided_slice %39 {offsets = [0, 0, 704], sizes = [2, 8, 32], strides = [1, 1, 1]} : vector<2x8x768xbf16> to vector<2x8x32xbf16>
    "tpu.trace_start"() <{level = 10 : i32, message = "bqd,bkd->bqk"}> : () -> ()
    %cst_58 = arith.constant dense<0.000000e+00> : vector<2x8x8xf32>
    %176 = tpu.matmul %173, %174, %cst_58 {dimension_numbers = #tpu.dot_dimension_numbers<[2], [2], [1], [1], [0, 0, 0, 1, 1, 1], [0], [0]>} : vector<2x8x32xbf16>, vector<2x8x32xbf16>, vector<2x8x8xf32> -> vector<2x8x8xf32>
    "tpu.trace_stop"() : () -> ()
    %cst_59 = arith.constant 0.176776692 : f32
    %177 = vector.broadcast %cst_59 : f32 to vector<2x8x8xf32>
    %178 = arith.mulf %176, %177 : vector<2x8x8xf32>
    %cst_60 = arith.constant dense<0xFF800000> : vector<2x8xf32>
    %179 = vector.multi_reduction <maximumf>, %178, %cst_60 [2] : vector<2x8x8xf32> to vector<2x8xf32>
    %180 = vector.shape_cast %179 : vector<2x8xf32> to vector<2x8x1xf32>
    %181 = vector.broadcast %180 : vector<2x8x1xf32> to vector<2x8x8xf32>
    %182 = arith.subf %178, %181 : vector<2x8x8xf32>
    %183 = math.exp %182 : vector<2x8x8xf32>
    %cst_61 = arith.constant dense<0.000000e+00> : vector<2x8xf32>
    %184 = vector.multi_reduction <add>, %183, %cst_61 [2] : vector<2x8x8xf32> to vector<2x8xf32>
    %185 = vector.shape_cast %184 : vector<2x8xf32> to vector<2x8x1xf32>
    %186 = vector.broadcast %185 : vector<2x8x1xf32> to vector<2x8x8xf32>
    %187 = arith.divf %183, %186 : vector<2x8x8xf32>
    %188 = arith.truncf %187 : vector<2x8x8xf32> to vector<2x8x8xbf16>
    "tpu.trace_start"() <{level = 10 : i32, message = "bqk,bkd->bqd"}> : () -> ()
    %cst_62 = arith.constant dense<0.000000e+00> : vector<2x8x32xf32>
    %189 = tpu.matmul %188, %175, %cst_62 {dimension_numbers = #tpu.dot_dimension_numbers<[2], [1], [1], [2], [0, 0, 0, 1, 1, 2], [0], [0]>} : vector<2x8x8xbf16>, vector<2x8x32xbf16>, vector<2x8x32xf32> -> vector<2x8x32xf32>
    "tpu.trace_stop"() : () -> ()
    %190 = vector.shape_cast %189 : vector<2x8x32xf32> to vector<16x32xf32>
    %191 = arith.truncf %190 : vector<16x32xf32> to vector<16x32xbf16>
    %192 = vector.extract_strided_slice %41 {offsets = [192, 0], sizes = [32, 256], strides = [1, 1]} : vector<256x256xbf16> to vector<32x256xbf16>
    %cst_63 = arith.constant dense<0.000000e+00> : vector<16x256xf32>
    %193 = tpu.matmul %191, %192, %cst_63 {dimension_numbers = #tpu.dot_dimension_numbers<[1], [0], [0], [1], [0, 0, 1, 1], [], []>} : vector<16x32xbf16>, vector<32x256xbf16>, vector<16x256xf32> -> vector<16x256xf32>
    %194 = arith.addf %172, %193 : vector<16x256xf32>
    %195 = vector.extract_strided_slice %39 {offsets = [0, 0, 224], sizes = [2, 8, 32], strides = [1, 1, 1]} : vector<2x8x768xbf16> to vector<2x8x32xbf16>
    %196 = vector.extract_strided_slice %39 {offsets = [0, 0, 480], sizes = [2, 8, 32], strides = [1, 1, 1]} : vector<2x8x768xbf16> to vector<2x8x32xbf16>
    %197 = vector.extract_strided_slice %39 {offsets = [0, 0, 736], sizes = [2, 8, 32], strides = [1, 1, 1]} : vector<2x8x768xbf16> to vector<2x8x32xbf16>
    "tpu.trace_start"() <{level = 10 : i32, message = "bqd,bkd->bqk"}> : () -> ()
    %cst_64 = arith.constant dense<0.000000e+00> : vector<2x8x8xf32>
    %198 = tpu.matmul %195, %196, %cst_64 {dimension_numbers = #tpu.dot_dimension_numbers<[2], [2], [1], [1], [0, 0, 0, 1, 1, 1], [0], [0]>} : vector<2x8x32xbf16>, vector<2x8x32xbf16>, vector<2x8x8xf32> -> vector<2x8x8xf32>
    "tpu.trace_stop"() : () -> ()
    %cst_65 = arith.constant 0.176776692 : f32
    %199 = vector.broadcast %cst_65 : f32 to vector<2x8x8xf32>
    %200 = arith.mulf %198, %199 : vector<2x8x8xf32>
    %cst_66 = arith.constant dense<0xFF800000> : vector<2x8xf32>
    %201 = vector.multi_reduction <maximumf>, %200, %cst_66 [2] : vector<2x8x8xf32> to vector<2x8xf32>
    %202 = vector.shape_cast %201 : vector<2x8xf32> to vector<2x8x1xf32>
    %203 = vector.broadcast %202 : vector<2x8x1xf32> to vector<2x8x8xf32>
    %204 = arith.subf %200, %203 : vector<2x8x8xf32>
    %205 = math.exp %204 : vector<2x8x8xf32>
    %cst_67 = arith.constant dense<0.000000e+00> : vector<2x8xf32>
    %206 = vector.multi_reduction <add>, %205, %cst_67 [2] : vector<2x8x8xf32> to vector<2x8xf32>
    %207 = vector.shape_cast %206 : vector<2x8xf32> to vector<2x8x1xf32>
    %208 = vector.broadcast %207 : vector<2x8x1xf32> to vector<2x8x8xf32>
    %209 = arith.divf %205, %208 : vector<2x8x8xf32>
    %210 = arith.truncf %209 : vector<2x8x8xf32> to vector<2x8x8xbf16>
    "tpu.trace_start"() <{level = 10 : i32, message = "bqk,bkd->bqd"}> : () -> ()
    %cst_68 = arith.constant dense<0.000000e+00> : vector<2x8x32xf32>
    %211 = tpu.matmul %210, %197, %cst_68 {dimension_numbers = #tpu.dot_dimension_numbers<[2], [1], [1], [2], [0, 0, 0, 1, 1, 2], [0], [0]>} : vector<2x8x8xbf16>, vector<2x8x32xbf16>, vector<2x8x32xf32> -> vector<2x8x32xf32>
    "tpu.trace_stop"() : () -> ()
    %212 = vector.shape_cast %211 : vector<2x8x32xf32> to vector<16x32xf32>
    %213 = arith.truncf %212 : vector<16x32xf32> to vector<16x32xbf16>
    %214 = vector.extract_strided_slice %41 {offsets = [224, 0], sizes = [32, 256], strides = [1, 1]} : vector<256x256xbf16> to vector<32x256xbf16>
    %cst_69 = arith.constant dense<0.000000e+00> : vector<16x256xf32>
    %215 = tpu.matmul %213, %214, %cst_69 {dimension_numbers = #tpu.dot_dimension_numbers<[1], [0], [0], [1], [0, 0, 1, 1], [], []>} : vector<16x32xbf16>, vector<32x256xbf16>, vector<16x256xf32> -> vector<16x256xf32>
    %216 = arith.addf %194, %215 : vector<16x256xf32>
    %217 = arith.addf %3, %216 : vector<16x256xf32>
    %c0_70 = arith.constant 0 : index
    %c0_71 = arith.constant 0 : index
    %c0_72 = arith.constant 0 : index
    %218 = vector.load %arg7[%c0_70, %c0_71, %c0_72] : memref<1x1x256xf32, #tpu.memory_space<vmem>>, vector<1x1x256xf32>
    %219 = vector.shape_cast %218 : vector<1x1x256xf32> to vector<1x256xf32>
    %220 = vector.broadcast %219 : vector<1x256xf32> to vector<16x256xf32>
    %221 = arith.addf %217, %220 : vector<16x256xf32>
    %c0_73 = arith.constant 0 : index
    %c0_74 = arith.constant 0 : index
    %c0_75 = arith.constant 0 : index
    %222 = vector.load %arg8[%c0_73, %c0_74, %c0_75] : memref<1x1x256xf32, #tpu.memory_space<vmem>>, vector<1x1x256xf32>
    %223 = vector.shape_cast %222 : vector<1x1x256xf32> to vector<1x256xf32>
    %c0_76 = arith.constant 0 : index
    %c0_77 = arith.constant 0 : index
    %c0_78 = arith.constant 0 : index
    %224 = vector.load %arg9[%c0_76, %c0_77, %c0_78] : memref<1x1x256xf32, #tpu.memory_space<vmem>>, vector<1x1x256xf32>
    %225 = vector.shape_cast %224 : vector<1x1x256xf32> to vector<1x256xf32>
    %cst_79 = arith.constant dense<0.000000e+00> : vector<16xf32>
    %226 = vector.multi_reduction <add>, %221, %cst_79 [1] : vector<16x256xf32> to vector<16xf32>
    %227 = vector.shape_cast %226 : vector<16xf32> to vector<16x1xf32>
    %cst_80 = arith.constant 2.560000e+02 : f32
    %228 = vector.broadcast %cst_80 : f32 to vector<16x1xf32>
    %229 = arith.divf %227, %228 : vector<16x1xf32>
    %230 = vector.broadcast %229 : vector<16x1xf32> to vector<16x256xf32>
    %231 = arith.subf %221, %230 : vector<16x256xf32>
    %232 = arith.mulf %231, %231 : vector<16x256xf32>
    %cst_81 = arith.constant dense<0.000000e+00> : vector<16xf32>
    %233 = vector.multi_reduction <add>, %232, %cst_81 [1] : vector<16x256xf32> to vector<16xf32>
    %234 = vector.shape_cast %233 : vector<16xf32> to vector<16x1xf32>
    %cst_82 = arith.constant 2.560000e+02 : f32
    %235 = vector.broadcast %cst_82 : f32 to vector<16x1xf32>
    %236 = arith.divf %234, %235 : vector<16x1xf32>
    %237 = vector.broadcast %229 : vector<16x1xf32> to vector<16x256xf32>
    %238 = arith.subf %221, %237 : vector<16x256xf32>
    %cst_83 = arith.constant 9.99999997E-7 : f32
    %239 = vector.broadcast %cst_83 : f32 to vector<16x1xf32>
    %240 = arith.addf %236, %239 : vector<16x1xf32>
    %241 = math.rsqrt %240 : vector<16x1xf32>
    %242 = vector.broadcast %241 : vector<16x1xf32> to vector<16x256xf32>
    %243 = arith.mulf %238, %242 : vector<16x256xf32>
    %244 = vector.broadcast %223 : vector<1x256xf32> to vector<16x256xf32>
    %245 = arith.mulf %243, %244 : vector<16x256xf32>
    %246 = vector.broadcast %225 : vector<1x256xf32> to vector<16x256xf32>
    %247 = arith.addf %245, %246 : vector<16x256xf32>
    %248 = arith.truncf %247 : vector<16x256xf32> to vector<16x256xbf16>
    %c0_84 = arith.constant 0 : index
    %c0_85 = arith.constant 0 : index
    %c0_86 = arith.constant 0 : index
    %249 = vector.load %arg10[%c0_84, %c0_85, %c0_86] : memref<1x256x512xbf16, #tpu.memory_space<vmem>>, vector<1x256x512xbf16>
    %250 = vector.shape_cast %249 : vector<1x256x512xbf16> to vector<256x512xbf16>
    %cst_87 = arith.constant dense<0.000000e+00> : vector<16x512xf32>
    %251 = tpu.matmul %248, %250, %cst_87 {dimension_numbers = #tpu.dot_dimension_numbers<[1], [0], [0], [1], [0, 0, 1, 1], [], []>} : vector<16x256xbf16>, vector<256x512xbf16>, vector<16x512xf32> -> vector<16x512xf32>
    %c0_88 = arith.constant 0 : index
    %c0_89 = arith.constant 0 : index
    %c0_90 = arith.constant 0 : index
    %252 = vector.load %arg11[%c0_88, %c0_89, %c0_90] : memref<1x1x512xf32, #tpu.memory_space<vmem>>, vector<1x1x512xf32>
    %253 = vector.shape_cast %252 : vector<1x1x512xf32> to vector<1x512xf32>
    %254 = vector.broadcast %253 : vector<1x512xf32> to vector<16x512xf32>
    %255 = arith.addf %251, %254 : vector<16x512xf32>
    %256 = arith.mulf %255, %255 : vector<16x512xf32>
    %257 = arith.mulf %255, %256 : vector<16x512xf32>
    %cst_91 = arith.constant 4.471500e-02 : f32
    %258 = vector.broadcast %cst_91 : f32 to vector<16x512xf32>
    %259 = arith.mulf %258, %257 : vector<16x512xf32>
    %260 = arith.addf %255, %259 : vector<16x512xf32>
    %cst_92 = arith.constant 0.797884583 : f32
    %261 = vector.broadcast %cst_92 : f32 to vector<16x512xf32>
    %262 = arith.mulf %261, %260 : vector<16x512xf32>
    %263 = math.tanh %262 : vector<16x512xf32>
    %cst_93 = arith.constant 1.000000e+00 : f32
    %264 = vector.broadcast %cst_93 : f32 to vector<16x512xf32>
    %265 = arith.addf %264, %263 : vector<16x512xf32>
    %cst_94 = arith.constant 5.000000e-01 : f32
    %266 = vector.broadcast %cst_94 : f32 to vector<16x512xf32>
    %267 = arith.mulf %266, %265 : vector<16x512xf32>
    %268 = arith.mulf %255, %267 : vector<16x512xf32>
    %269 = arith.truncf %268 : vector<16x512xf32> to vector<16x512xbf16>
    %c0_95 = arith.constant 0 : index
    %c0_96 = arith.constant 0 : index
    %c0_97 = arith.constant 0 : index
    %270 = vector.load %arg12[%c0_95, %c0_96, %c0_97] : memref<1x512x256xbf16, #tpu.memory_space<vmem>>, vector<1x512x256xbf16>
    %271 = vector.shape_cast %270 : vector<1x512x256xbf16> to vector<512x256xbf16>
    %cst_98 = arith.constant dense<0.000000e+00> : vector<16x256xf32>
    %272 = tpu.matmul %269, %271, %cst_98 {dimension_numbers = #tpu.dot_dimension_numbers<[1], [0], [0], [1], [0, 0, 1, 1], [], []>} : vector<16x512xbf16>, vector<512x256xbf16>, vector<16x256xf32> -> vector<16x256xf32>
    %c0_99 = arith.constant 0 : index
    %c0_100 = arith.constant 0 : index
    %c0_101 = arith.constant 0 : index
    %273 = vector.load %arg13[%c0_99, %c0_100, %c0_101] : memref<1x1x256xf32, #tpu.memory_space<vmem>>, vector<1x1x256xf32>
    %274 = vector.shape_cast %273 : vector<1x1x256xf32> to vector<1x256xf32>
    %275 = vector.broadcast %274 : vector<1x256xf32> to vector<16x256xf32>
    %276 = arith.addf %272, %275 : vector<16x256xf32>
    %277 = arith.addf %221, %276 : vector<16x256xf32>
    %c0_102 = arith.constant 0 : index
    %c0_103 = arith.constant 0 : index
    %278 = vector.load %arg19[%c0_102, %c0_103] : memref<16x256xf32, #tpu.memory_space<vmem>>, vector<16x256xf32>
    tpu.vector_store %arg19[%c0_102, %c0_103], %277 {strides = array<i32>} : memref<16x256xf32, #tpu.memory_space<vmem>>, vector<16x256xf32>,
    %c2_i32 = arith.constant 2 : i32
    %279 = arith.cmpi eq, %arg0, %c2_i32 : i32
    %280 = arith.extui %279 : i1 to i32
    %c0_i32_104 = arith.constant 0 : i32
    %281 = arith.cmpi ne, %280, %c0_i32_104 : i32
    scf.if %281 {
      %c0_105 = arith.constant 0 : index
      %c0_106 = arith.constant 0 : index
      %282 = vector.load %arg14[%c0_105, %c0_106] : memref<1x256xf32, #tpu.memory_space<vmem>>, vector<1x256xf32>
      %c0_107 = arith.constant 0 : index
      %c0_108 = arith.constant 0 : index
      %283 = vector.load %arg15[%c0_107, %c0_108] : memref<1x256xf32, #tpu.memory_space<vmem>>, vector<1x256xf32>
      %cst_109 = arith.constant dense<0.000000e+00> : vector<16xf32>
      %284 = vector.multi_reduction <add>, %277, %cst_109 [1] : vector<16x256xf32> to vector<16xf32>
      %285 = vector.shape_cast %284 : vector<16xf32> to vector<16x1xf32>
      %cst_110 = arith.constant 2.560000e+02 : f32
      %286 = vector.broadcast %cst_110 : f32 to vector<16x1xf32>
      %287 = arith.divf %285, %286 : vector<16x1xf32>
      %288 = vector.broadcast %287 : vector<16x1xf32> to vector<16x256xf32>
      %289 = arith.subf %277, %288 : vector<16x256xf32>
      %290 = arith.mulf %289, %289 : vector<16x256xf32>
      %cst_111 = arith.constant dense<0.000000e+00> : vector<16xf32>
      %291 = vector.multi_reduction <add>, %290, %cst_111 [1] : vector<16x256xf32> to vector<16xf32>
      %292 = vector.shape_cast %291 : vector<16xf32> to vector<16x1xf32>
      %cst_112 = arith.constant 2.560000e+02 : f32
      %293 = vector.broadcast %cst_112 : f32 to vector<16x1xf32>
      %294 = arith.divf %292, %293 : vector<16x1xf32>
      %295 = vector.broadcast %287 : vector<16x1xf32> to vector<16x256xf32>
      %296 = arith.subf %277, %295 : vector<16x256xf32>
      %cst_113 = arith.constant 9.99999997E-7 : f32
      %297 = vector.broadcast %cst_113 : f32 to vector<16x1xf32>
      %298 = arith.addf %294, %297 : vector<16x1xf32>
      %299 = math.rsqrt %298 : vector<16x1xf32>
      %300 = vector.broadcast %299 : vector<16x1xf32> to vector<16x256xf32>
      %301 = arith.mulf %296, %300 : vector<16x256xf32>
      %302 = vector.broadcast %282 : vector<1x256xf32> to vector<16x256xf32>
      %303 = arith.mulf %301, %302 : vector<16x256xf32>
      %304 = vector.broadcast %283 : vector<1x256xf32> to vector<16x256xf32>
      %305 = arith.addf %303, %304 : vector<16x256xf32>
      %306 = arith.truncf %305 : vector<16x256xf32> to vector<16x256xbf16>
      %c0_114 = arith.constant 0 : index
      %c0_115 = arith.constant 0 : index
      %307 = vector.load %arg16[%c0_114, %c0_115] : memref<256x128xbf16, #tpu.memory_space<vmem>>, vector<256x128xbf16>
      %cst_116 = arith.constant dense<0.000000e+00> : vector<16x128xf32>
      %308 = tpu.matmul %306, %307, %cst_116 {dimension_numbers = #tpu.dot_dimension_numbers<[1], [0], [0], [1], [0, 0, 1, 1], [], []>} : vector<16x256xbf16>, vector<256x128xbf16>, vector<16x128xf32> -> vector<16x128xf32>
      %c0_117 = arith.constant 0 : index
      %c0_118 = arith.constant 0 : index
      %309 = vector.load %arg17[%c0_117, %c0_118] : memref<1x128xf32, #tpu.memory_space<vmem>>, vector<1x128xf32>
      %310 = vector.broadcast %309 : vector<1x128xf32> to vector<16x128xf32>
      %311 = arith.addf %308, %310 : vector<16x128xf32>
      %c0_119 = arith.constant 0 : index
      %c0_120 = arith.constant 0 : index
      %312 = vector.load %arg18[%c0_119, %c0_120] : memref<16x128xf32, #tpu.memory_space<vmem>>, vector<16x128xf32>
      tpu.vector_store %arg18[%c0_119, %c0_120], %311 {strides = array<i32>} : memref<16x128xf32, #tpu.memory_space<vmem>>, vector<16x128xf32>,
    } else {
    }
    return
  }
  func.func @transform_0(%arg0: i32) -> (i32, i32) {
    %c0_i32 = arith.constant 0 : i32
    %c0_i32_0 = arith.constant 0 : i32
    %c0_i32_1 = arith.constant 0 : i32
    return %c0_i32, %c0_i32_0 : i32, i32
  }
  func.func @transform_1(%arg0: i32) -> (i32, i32, i32) {
    %c0_i32 = arith.constant 0 : i32
    %c0_i32_0 = arith.constant 0 : i32
    %c0_i32_1 = arith.constant 0 : i32
    return %arg0, %c0_i32, %c0_i32_0 : i32, i32, i32
  }
  func.func @transform_2(%arg0: i32) -> (i32, i32, i32) {
    %c0_i32 = arith.constant 0 : i32
    %c0_i32_0 = arith.constant 0 : i32
    %c0_i32_1 = arith.constant 0 : i32
    return %arg0, %c0_i32, %c0_i32_0 : i32, i32, i32
  }
  func.func @transform_3(%arg0: i32) -> (i32, i32, i32) {
    %c0_i32 = arith.constant 0 : i32
    %c0_i32_0 = arith.constant 0 : i32
    %c0_i32_1 = arith.constant 0 : i32
    return %arg0, %c0_i32, %c0_i32_0 : i32, i32, i32
  }
  func.func @transform_4(%arg0: i32) -> (i32, i32, i32) {
    %c0_i32 = arith.constant 0 : i32
    %c0_i32_0 = arith.constant 0 : i32
    %c0_i32_1 = arith.constant 0 : i32
    return %arg0, %c0_i32, %c0_i32_0 : i32, i32, i32
  }
  func.func @transform_5(%arg0: i32) -> (i32, i32, i32) {
    %c0_i32 = arith.constant 0 : i32
    %c0_i32_0 = arith.constant 0 : i32
    %c0_i32_1 = arith.constant 0 : i32
    return %arg0, %c0_i32, %c0_i32_0 : i32, i32, i32
  }
  func.func @transform_6(%arg0: i32) -> (i32, i32, i32) {
    %c0_i32 = arith.constant 0 : i32
    %c0_i32_0 = arith.constant 0 : i32
    %c0_i32_1 = arith.constant 0 : i32
    return %arg0, %c0_i32, %c0_i32_0 : i32, i32, i32
  }
  func.func @transform_7(%arg0: i32) -> (i32, i32, i32) {
    %c0_i32 = arith.constant 0 : i32
    %c0_i32_0 = arith.constant 0 : i32
    %c0_i32_1 = arith.constant 0 : i32
    return %arg0, %c0_i32, %c0_i32_0 : i32, i32, i32
  }
  func.func @transform_8(%arg0: i32) -> (i32, i32, i32) {
    %c0_i32 = arith.constant 0 : i32
    %c0_i32_0 = arith.constant 0 : i32
    %c0_i32_1 = arith.constant 0 : i32
    return %arg0, %c0_i32, %c0_i32_0 : i32, i32, i32
  }
  func.func @transform_9(%arg0: i32) -> (i32, i32, i32) {
    %c0_i32 = arith.constant 0 : i32
    %c0_i32_0 = arith.constant 0 : i32
    %c0_i32_1 = arith.constant 0 : i32
    return %arg0, %c0_i32, %c0_i32_0 : i32, i32, i32
  }
  func.func @transform_10(%arg0: i32) -> (i32, i32, i32) {
    %c0_i32 = arith.constant 0 : i32
    %c0_i32_0 = arith.constant 0 : i32
    %c0_i32_1 = arith.constant 0 : i32
    return %arg0, %c0_i32, %c0_i32_0 : i32, i32, i32
  }
  func.func @transform_11(%arg0: i32) -> (i32, i32, i32) {
    %c0_i32 = arith.constant 0 : i32
    %c0_i32_0 = arith.constant 0 : i32
    %c0_i32_1 = arith.constant 0 : i32
    return %arg0, %c0_i32, %c0_i32_0 : i32, i32, i32
  }
  func.func @transform_12(%arg0: i32) -> (i32, i32, i32) {
    %c0_i32 = arith.constant 0 : i32
    %c0_i32_0 = arith.constant 0 : i32
    %c0_i32_1 = arith.constant 0 : i32
    return %arg0, %c0_i32, %c0_i32_0 : i32, i32, i32
  }
  func.func @transform_13(%arg0: i32) -> (i32, i32) {
    %c0_i32 = arith.constant 0 : i32
    %c0_i32_0 = arith.constant 0 : i32
    %c0_i32_1 = arith.constant 0 : i32
    return %c0_i32, %c0_i32_0 : i32, i32
  }
  func.func @transform_14(%arg0: i32) -> (i32, i32) {
    %c0_i32 = arith.constant 0 : i32
    %c0_i32_0 = arith.constant 0 : i32
    %c0_i32_1 = arith.constant 0 : i32
    return %c0_i32, %c0_i32_0 : i32, i32
  }
  func.func @transform_15(%arg0: i32) -> (i32, i32) {
    %c0_i32 = arith.constant 0 : i32
    %c0_i32_0 = arith.constant 0 : i32
    %c0_i32_1 = arith.constant 0 : i32
    return %c0_i32, %c0_i32_0 : i32, i32
  }
  func.func @transform_16(%arg0: i32) -> (i32, i32) {
    %c0_i32 = arith.constant 0 : i32
    %c0_i32_0 = arith.constant 0 : i32
    %c0_i32_1 = arith.constant 0 : i32
    return %c0_i32, %c0_i32_0 : i32, i32
  }
  func.func @transform_17(%arg0: i32) -> (i32, i32) {
    %c0_i32 = arith.constant 0 : i32
    %c0_i32_0 = arith.constant 0 : i32
    %c0_i32_1 = arith.constant 0 : i32
    return %c0_i32, %c0_i32_0 : i32, i32
  }
}

</mosaic_0001>

<bundles_post_ra>
// kernel: tpu_custom_call.1
= control target key start
LH: loop header
LB: loop body
LE: loop exit
PB: predicated region body
PF: predicated region fallthrough
CT: control target
= control target key end

     0   :  { %s9156_s0 = inlined_call_operand.hbm [shape: f32[16,256], index: 0, kind: input, shape index: {}]   ;;  %s9157_s1 = inlined_call_operand.hbm [shape: f32[3,1,256], index: 1, kind: input, shape index: {}]   ;;  %s9158_s2 = inlined_call_operand.hbm [shape: f32[3,1,256], index: 2, kind: input, shape index: {}]   ;;  %s9159_s3 = inlined_call_operand.hbm [shape: bf16[3,256,768], index: 3, kind: input, shape index: {}]   ;;  %s9160_s4 = inlined_call_operand.hbm [shape: f32[3,1,768], index: 4, kind: input, shape index: {}]   ;;  %s9161_s5 = inlined_call_operand.hbm [shape: bf16[3,256,256], index: 5, kind: input, shape index: {}]   ;;  %s9162_s6 = inlined_call_operand.hbm [shape: f32[3,1,256], index: 6, kind: input, shape index: {}]   ;;  %s9163_s7 = inlined_call_operand.hbm [shape: f32[3,1,256], index: 7, kind: input, shape index: {}]   ;;  %s9164_s8 = inlined_call_operand.hbm [shape: f32[3,1,256], index: 8, kind: input, shape index: {}]   ;;  %s9165_s9 = inlined_call_operand.hbm [shape: bf16[3,256,512], index: 9, kind: input, shape index: {}]   ;;  %s9166_s10 = inlined_call_operand.hbm [shape: f32[3,1,512], index: 10, kind: input, shape index: {}]   ;;  %s9167_s11 = inlined_call_operand.hbm [shape: bf16[3,512,256], index: 11, kind: input, shape index: {}]   ;;  %s9168_s12 = inlined_call_operand.hbm [shape: f32[3,1,256], index: 12, kind: input, shape index: {}]   ;;  %s9169_s13 = inlined_call_operand.hbm [shape: f32[1,256], index: 13, kind: input, shape index: {}]   ;;  %s9170_s14 = inlined_call_operand.hbm [shape: f32[1,256], index: 14, kind: input, shape index: {}]   ;;  %s9171_s15 = inlined_call_operand.hbm [shape: bf16[256,128], index: 15, kind: input, shape index: {}]   ;;  %s9172_s16 = inlined_call_operand.hbm [shape: f32[1,128], index: 16, kind: input, shape index: {}]   ;;  %s9173_s17 = inlined_call_operand.hbm [shape: f32[16,128], index: 17, kind: output, shape index: {}]  }
   0x1   :  { %9193 = sst [smem:[#allocation48_spill]] %s9156_s0 }
   0x2   :  { %9194 = sst [smem:[#allocation49_spill]] %s9157_s1 }
   0x3   :  { %9195 = sst [smem:[#allocation50_spill]] %s9159_s3 }
   0x4   :  { %9196 = sst [smem:[#allocation51_spill]] %s9161_s5 }
   0x5   :  { %9197 = sst [smem:[#allocation52_spill]] %s9166_s10 }
   0x6   :  { %9198 = sst [smem:[#allocation53_spill]] %s9168_s12 }
   0x7   :  { %9199 = sst [smem:[#allocation54_spill]] %s9169_s13 }
   0x8   :  { %9200 = sst [smem:[#allocation55_spill]] %s9170_s14 }
   0x9   :  { %9201 = sst [smem:[#allocation56_spill]] %s9171_s15 }
   0xa   :  { %9202 = sst [smem:[#allocation57_spill]] %s9172_s16 }
   0xb   :  { %9203 = sst [smem:[#allocation58_spill]] %s9173_s17 }
   0xc   :  { %22 = vsyncpa [#allocation4], 0 }
   0xd   :  { %23 = vsyncpa [#allocation7], 0 }
   0xe   :  { %25 = vsyncpa [#allocation7 + $0x1], 0 }
   0xf   :  { %26 = vsyncpa [#allocation10], 0 }
  0x10   :  { %28 = vsyncpa [#allocation10 + $0x1], 0 }
  0x11   :  { %29 = vsyncpa [#allocation13], 0 }
  0x12   :  { %31 = vsyncpa [#allocation13 + $0x1], 0 }
  0x13   :  { %32 = vsyncpa [#allocation16], 0 }
  0x14   :  { %34 = vsyncpa [#allocation16 + $0x1], 0 }
  0x15   :  { %35 = vsyncpa [#allocation19], 0 }
  0x16   :  { %37 = vsyncpa [#allocation19 + $0x1], 0 }
  0x17   :  { %38 = vsyncpa [#allocation22], 0 }
  0x18   :  { %40 = vsyncpa [#allocation22 + $0x1], 0 }
  0x19   :  { %41 = vsyncpa [#allocation25], 0 }
  0x1a   :  { %42 = vsyncpa [#allocation28], 0 }
  0x1b   :  { %43 = vsyncpa [#allocation5], 0  ;;  %s7687_s24 = smov 0   ;;  %s7689_s25 = smov 0  }
  0x1c   :  { %s7691_s26 = smov 0   ;;  %s7693_s27 = smov 0  }
  0x1d LB: > { %9204 = sst [smem:[#allocation41_spill]] %s7565_s25  ;;  %s7706_s28 = sadd.s32 4294967295, %s7573_s27   ;;  %s7573_s27 = sphi %s7693_s27, %s9238_s27   ;;  %s7569_s26 = sphi %s7691_s26, %s9241_s26   ;;  %s7565_s25 = sphi %s7689_s25, %s9240_s25   ;;  %s7561_s24 = sphi %s7687_s24, %s9239_s24  }
  0x1e   : > { %9205 = sst [smem:[#allocation42_spill]] %s7569_s26  ;;  %s7709_s29 = sadd.s32 1, %s7573_s27  }
  0x1f   : > { %9206 = sst [smem:[#allocation43_spill]] %s7706_s28  ;;  %s74_s0 = ssub.s32 %s7573_s27, %s7709_s29 }
  0x20   : > { %9207 = sst [smem:[#allocation44_spill]] %s7709_s29  ;;  %s77_s30 = sadd.s32 1, %s7569_s26 }
  0x21   : > { %p75_p0 = scmp.eq.s32.totalorder %s74_s0, 0  ;;  %p84_p1 = scmp.ne.s32.totalorder %s7569_s26, %s7565_s25 }
  0x22   : > { %p85_p2 = scmp.eq.s32.totalorder %s7573_s27, 0  ;;  %p90_p3 = scmp.ne.s32.totalorder %s7565_s25, %s7561_s24 }
  0x23   : > { %s7719_s18 = scalar_select %p75_p0, %s7569_s26, %s77_s30  }
  0x24   : > { %p7721_p4 = por %p85_p2, %p84_p1  ;;  %p91_p5 = scmp.eq.s32.totalorder %s7706_s28, 0 }
  0x25   : > { %9208 = sst [smem:[#allocation45_spill]] %s7719_s18  ;;  %p5290_p6 = scmp.ge.s32.totalorder %s7573_s27, 1 }
  0x26   : > { %p492_p7 = scmp.lt.s32.totalorder %s7573_s27, 4  ;;  %p7730_p8 = por %p91_p5, %p90_p3 }
  0x27   : > { %p5291_p9 = scmp.ne.s32.totalorder %s7706_s28, 0  ;;  %s9214_s13 = sld [smem:[#allocation54_spill]] }
  0x28   : > { %s9210_s1 = scalar_select %p7730_p8, 1, 0 }
  0x29   : > { %p7735_p10 = pnand %p5290_p6, %p492_p7  ;;  %s7575_s24 = smov [#allocation24]  }
  0x2a   : > { %9211 = sst [smem:[#allocation46_spill]] %s9210_s1  ;;  %s520_s0 = sshll.u32 %s7575_s24, 4  ;;  %s521_s0 = int_to_ptr.vmem [resolvable:$true] %s520_s0 }
  0x2b   : > { %s9212_s20 = scalar_select %p7735_p10, 1, 0 }
  0x2c   : > { %p6808_p11 = pneg %p7735_p10  ;;  %s9215_s15 = sld [smem:[#allocation56_spill]] }
  0x2d   : > { %9213 = sst [smem:[#allocation47_spill]] %s9212_s20  ;;  %s518_s23 = sshll.u32 %s9214_s13, 4  ;;  %s519_s23 = int_to_ptr.hbm [resolvable:$true] %s518_s23 }
  0x2e   : > { %p7749_p12 = pnand %p6808_p11, %p91_p5  ;;  %s7576_s21 = smov [#allocation27]  }
  0x2f   : > { %s543_s22 = sshll.u32 %s7576_s21, 4  ;;  %s7577_s24 = smov 64   ;;  %s544_s22 = int_to_ptr.vmem [resolvable:$true] %s543_s22 }
  0x30   : > { %6814 = dma.hbm_to_vmem [thread:$0]  (!%p7749_p12), %s519_s23, 32, %s521_s0, [#allocation25]  }
  0x31   : > { %s7578_s13 = smov 4   ;;  %s7579_s25 = smov [#allocation3]  }
  0x32   : > { %s541_s29 = sshll.u32 %s9215_s15, 4  ;;  %s9217_s15 = sld [smem:[#allocation48_spill]]  ;;  %s542_s29 = int_to_ptr.hbm [resolvable:$true] %s541_s29 }
  0x33   : > { %6820 = dma.hbm_to_vmem [thread:$0]  (!%p7749_p12), %s542_s29, 2048, %s544_s22, [#allocation28], %s7577_s24, %s7577_s24, %s7578_s13  }
  0x34   : > { %s505_s28 = sshll.u32 %s7579_s25, 4  ;;  %s9218_s14 = sld [smem:[#allocation55_spill]]  ;;  %s506_s28 = int_to_ptr.vmem [resolvable:$true] %s505_s28 }
  0x35   : > { %s7580_s23 = smov 256   ;;  %s7581_s0 = smov 16  }
  0x36   : > { %s7582_s10 = smov [#allocation26]   ;;  %s9219_s16 = sld [smem:[#allocation57_spill]] }
  0x37   : > { %s532_s13 = sshll.u32 %s7582_s10, 4  ;;  %s7583_s25 = smov [#allocation29]   ;;  %s533_s13 = int_to_ptr.vmem [resolvable:$true] %s532_s13 }
  0x38   : > { %s503_s1 = sshll.u32 %s9217_s15, 4  ;;  %s558_s24 = sshll.u32 %s7583_s25, 4  ;;  %s504_s1 = int_to_ptr.hbm [resolvable:$true] %s503_s1  ;;  %s559_s24 = int_to_ptr.vmem [resolvable:$true] %s558_s24 }
  0x39   : > { %6811 = dma.hbm_to_vmem [thread:$0]  (!%p7749_p12), %s504_s1, 512, %s506_s28, [#allocation4], %s7580_s23, %s7580_s23, %s7581_s0  }
  0x3a   : > { %s530_s21 = sshll.u32 %s9218_s14, 4  ;;  %p5296_p13 = scmp.ge.s32.totalorder %s7573_s27, 3  ;;  %s531_s21 = int_to_ptr.hbm [resolvable:$true] %s530_s21 }
  0x3b   : > { %6817 = dma.hbm_to_vmem [thread:$0]  (!%p7749_p12), %s531_s21, 32, %s533_s13, [#allocation25]  }
  0x3c   : > { %s556_s15 = sshll.u32 %s9219_s16, 4  ;;  %565 = sbr.rel (%p5296_p13) target bundleno = 270 (0x10e), region = 36  ;;  %s557_s15 = int_to_ptr.hbm [resolvable:$true] %s556_s15 }
  0x3d   : > { %6823 = dma.hbm_to_vmem [thread:$0]  (!%p7749_p12), %s557_s15, 16, %s559_s24, [#allocation28]  }
  0x3e   : > { %s7774_s10 = sand.u32 (!%p5296_p13), 1, %s7573_s27   ;;  %s7777_s12 = sand.u32 (!%p5296_p13), 1, %s7569_s26  }
  0x3f   : > { %s7780_s28 = sshll.u32 (!%p5296_p13), %s7777_s12, 1  ;;  %s7783_s1 = sshll.u32 (!%p5296_p13), %s7573_s27, 1 }
  0x40   : > { %s9220_s18 = sld [smem:[#allocation49_spill]] (!%p5296_p13)  ;;  %s573_s21 = scalar_lea.vmem (!%p5296_p13), [#allocation6], %s7780_s28 }
  0x41   : > { %s581_s23 = sshll.u32 %s573_s21, 4  ;;  %s9186_s13 = scalar_lea.sflag [#allocation7], %s7774_s10  ;;  %s582_s23 = int_to_ptr.vmem [resolvable:$true] %s581_s23 }
  0x46   : > { %s577_s30 = scalar_lea.hbm %s9220_s18, %s7783_s1  ;;  %s7145_s24 = scalar_lea.hbm %s9220_s18, 6 }
  0x47   : > { %s579_s0 = sshll.u32 %s577_s30, 4  ;;  %s580_s0 = int_to_ptr.hbm [resolvable:$true] %s579_s0 }
  0x48   : > { %s7139_s29 = sshra.s32 %s580_s0, 4  ;;  %s7140_s29 = int_to_ptr.hbm [resolvable:$true] %s7139_s29 }
  0x49   : > { %s7141_s22 = scalar_lea.hbm %s7140_s29, 2  ;;  %p7146_p3 = scmp.lt.s32.totalorder %s7140_s29, %s9220_s18 }
  0x4a   : > { %p7142_p0 = scmp.ne.s32.totalorder %s7140_s29, %s7141_s22  ;;  %p7147_p6 = scmp.lt.s32.totalorder %s7145_s24, %s7141_s22 }
  0x4c   : > { %p7143_p1 = pnand %p7142_p0, %p7721_p4  ;;  %p7148_p7 = por %p7147_p6, %p7146_p3 }
  0x4e   : > { %p7144_p2 = pneg %p7143_p1 }
  0x50   : > { %p7149_p11 = pnand %p7148_p7, %p7144_p2 }
  0x52   : > { %7152 = shalt.err (!%p7149_p11)
}
  0x53   : > { %6770 = dma.hbm_to_vmem [thread:$0]  (%p7721_p4), %s580_s0, 32, %s582_s23, %s9186_s13  }
  0x54   : > { %s6754_s20 = smul.u32 768, %s7777_s12  ;;  %s9221_s3 = sld [smem:[#allocation50_spill]] }
  0x55   : > { %s6755_s30 = smul.u32 768, %s7573_s27  ;;  %s5302_s24 = sshll.u32 %s7777_s12, 8 }
  0x56   : > { %s611_s29 = scalar_lea.vmem [#allocation9], %s6754_s20  ;;  %s9190_s17 = scalar_lea.sflag [#allocation10], %s7774_s10 }
  0x57   : > { %s619_s22 = sshll.u32 %s611_s29, 4  ;;  %s620_s22 = int_to_ptr.vmem [resolvable:$true] %s619_s22 }
  0x5a   : > { %s616_s14 = scalar_lea.hbm %s9221_s3, %s6755_s30  ;;  %s7173_s13 = scalar_lea.hbm %s9221_s3, 2304 }
  0x5b   : > { %s617_s25 = sshll.u32 %s616_s14, 4  ;;  %s618_s25 = int_to_ptr.hbm [resolvable:$true] %s617_s25 }
  0x5c   : > { %s7167_s16 = sshra.s32 %s618_s25, 4  ;;  %s7168_s16 = int_to_ptr.hbm [resolvable:$true] %s7167_s16 }
  0x5d   : > { %s7169_s18 = scalar_lea.hbm %s7168_s16, 768  ;;  %p7174_p1 = scmp.lt.s32.totalorder %s7168_s16, %s9221_s3 }
  0x5e   : > { %p7170_p12 = scmp.ne.s32.totalorder %s7168_s16, %s7169_s18  ;;  %p7175_p2 = scmp.lt.s32.totalorder %s7173_s13, %s7169_s18 }
  0x60   : > { %p7171_p13 = pnand %p7170_p12, %p7721_p4  ;;  %p7176_p3 = por %p7175_p2, %p7174_p1 }
  0x62   : > { %p7172_p0 = pneg %p7171_p13 }
  0x64   : > { %p7177_p6 = pnand %p7176_p3, %p7172_p0 }
  0x66   : > { %7180 = shalt.err (!%p7177_p6)
}
  0x67   : > { %s7584_s20 = smov 384   ;;  %s7585_s15 = smov 24  }
  0x68   : > { %6772 = dma.hbm_to_vmem [thread:$0]  (%p7721_p4), %s618_s25, 12288, %s620_s22, %s9190_s17, %s7584_s20, %s7584_s20, %s7585_s15  }
  0x69   : > { %s6479_s14 = sshll.u32 %s7573_s27, 8  ;;  %s9222_s5 = sld [smem:[#allocation51_spill]] }
  0x6a   : > { %s652_s16 = scalar_lea.vmem [#allocation12], %s5302_s24  ;;  %s9188_s21 = scalar_lea.sflag [#allocation13], %s7774_s10 }
  0x6b   : > { %s660_s18 = sshll.u32 %s652_s16, 4  ;;  %s661_s18 = int_to_ptr.vmem [resolvable:$true] %s660_s18 }
  0x6f   : > { %s657_s0 = scalar_lea.hbm %s9222_s5, %s6479_s14  ;;  %s7201_s25 = scalar_lea.hbm %s9222_s5, 768 }
  0x70   : > { %s658_s13 = sshll.u32 %s657_s0, 4  ;;  %s659_s13 = int_to_ptr.hbm [resolvable:$true] %s658_s13 }
  0x71   : > { %s7195_s30 = sshra.s32 %s659_s13, 4  ;;  %s7196_s30 = int_to_ptr.hbm [resolvable:$true] %s7195_s30 }
  0x72   : > { %s7197_s3 = scalar_lea.hbm %s7196_s30, 256  ;;  %p7202_p13 = scmp.lt.s32.totalorder %s7196_s30, %s9222_s5 }
  0x73   : > { %p7198_p7 = scmp.ne.s32.totalorder %s7196_s30, %s7197_s3  ;;  %p7203_p0 = scmp.lt.s32.totalorder %s7201_s25, %s7197_s3 }
  0x75   : > { %p7199_p11 = pnand %p7198_p7, %p7721_p4  ;;  %p7204_p1 = por %p7203_p0, %p7202_p13 }
  0x77   : > { %p7200_p12 = pneg %p7199_p11 }
  0x79   : > { %p7205_p2 = pnand %p7204_p1, %p7200_p12 }
  0x7b   : > { %7208 = shalt.err (!%p7205_p2)
}
  0x7c   : > { %s9191_s24 = smov 128   ;;  %s9192_s14 = smov 8  }
  0x7d   : > { %6774 = dma.hbm_to_vmem [thread:$0]  (%p7721_p4), %s659_s13, 4096, %s661_s18, %s9188_s21, %s9191_s24, %s9191_s24, %s9192_s14  }
  0x7e   : > { %s697_s3 = scalar_lea.hbm %s9163_s7, %s7783_s1  ;;  %s693_s0 = scalar_lea.vmem [#allocation15], %s7780_s28 }
  0x7f   : > { %s699_s23 = sshll.u32 %s697_s3, 4  ;;  %s701_s16 = sshll.u32 %s693_s0, 4  ;;  %s700_s23 = int_to_ptr.hbm [resolvable:$true] %s699_s23  ;;  %s702_s16 = int_to_ptr.vmem [resolvable:$true] %s701_s16 }
  0x80   : > { %s9189_s30 = scalar_lea.sflag [#allocation16], %s7774_s10  ;;  %s7223_s22 = sshra.s32 %s700_s23, 4  ;;  %s7224_s22 = int_to_ptr.hbm [resolvable:$true] %s7223_s22 }
  0x81   : > { %s7225_s25 = scalar_lea.hbm %s7224_s22, 2  ;;  %s7229_s18 = scalar_lea.hbm %s9163_s7, 6 }
  0x82   : > { %p7226_p3 = scmp.ne.s32.totalorder %s7224_s22, %s7225_s25  ;;  %p7230_p11 = scmp.lt.s32.totalorder %s7224_s22, %s9163_s7 }
  0x83   : > { %p7231_p12 = scmp.lt.s32.totalorder %s7229_s18, %s7225_s25 }
  0x84   : > { %p7227_p6 = pnand %p7226_p3, %p7721_p4 }
  0x85   : > { %p7232_p13 = por %p7231_p12, %p7230_p11 }
  0x86   : > { %p7228_p7 = pneg %p7227_p6 }
  0x88   : > { %p7233_p0 = pnand %p7232_p13, %p7228_p7 }
  0x8a   : > { %7236 = shalt.err (!%p7233_p0)
}
  0x8b   : > { %6776 = dma.hbm_to_vmem [thread:$0]  (%p7721_p4), %s700_s23, 32, %s702_s16, %s9189_s30  }
  0x8c   : > { %s5311_s29 = sshll.u32 %s7777_s12, 9  ;;  %s6480_s3 = sshll.u32 %s7573_s27, 9 }
  0x8d   : > { %s736_s15 = scalar_lea.hbm %s9165_s9, %s6480_s3  ;;  %s731_s22 = scalar_lea.vmem [#allocation18], %s5311_s29 }
  0x8e   : > { %s739_s25 = sshll.u32 %s731_s22, 4  ;;  %s737_s18 = sshll.u32 %s736_s15, 4  ;;  %s740_s25 = int_to_ptr.vmem [resolvable:$true] %s739_s25  ;;  %s738_s18 = int_to_ptr.hbm [resolvable:$true] %s737_s18 }
  0x8f   : > { %s728_s13 = scalar_lea.sflag [#allocation19], %s7774_s10  ;;  %s7251_s26 = sshra.s32 %s738_s18, 4  ;;  %s7252_s26 = int_to_ptr.hbm [resolvable:$true] %s7251_s26 }
  0x90   : > { %s7253_s21 = scalar_lea.hbm %s7252_s26, 512  ;;  %s7257_s30 = scalar_lea.hbm %s9165_s9, 1536 }
  0x91   : > { %p7254_p1 = scmp.ne.s32.totalorder %s7252_s26, %s7253_s21  ;;  %p7258_p6 = scmp.lt.s32.totalorder %s7252_s26, %s9165_s9 }
  0x92   : > { %p7259_p7 = scmp.lt.s32.totalorder %s7257_s30, %s7253_s21 }
  0x93   : > { %p7255_p2 = pnand %p7254_p1, %p7721_p4 }
  0x94   : > { %p7260_p11 = por %p7259_p7, %p7258_p6 }
  0x95   : > { %p7256_p3 = pneg %p7255_p2 }
  0x97   : > { %p7261_p12 = pnand %p7260_p11, %p7256_p3 }
  0x99   : > { %7264 = shalt.err (!%p7261_p12)
}
  0x9a   : > { %s7588_s20 = smov 256   ;;  %s7589_s15 = smov 16  }
  0x9b   : > { %6778 = dma.hbm_to_vmem [thread:$0]  (%p7721_p4), %s738_s18, 8192, %s740_s25, %s728_s13, %s7588_s20, %s7588_s20, %s7589_s15  }
  0x9c   : > { %s777_s16 = scalar_lea.hbm %s9167_s11, %s6480_s3  ;;  %s772_s17 = scalar_lea.vmem [#allocation21], %s5311_s29 }
  0x9d   : > { %s778_s24 = sshll.u32 %s777_s16, 4  ;;  %s780_s26 = sshll.u32 %s772_s17, 4  ;;  %s779_s24 = int_to_ptr.hbm [resolvable:$true] %s778_s24  ;;  %s781_s26 = int_to_ptr.vmem [resolvable:$true] %s780_s26 }
  0x9e   : > { %s769_s21 = scalar_lea.sflag [#allocation22], %s7774_s10  ;;  %s7279_s30 = sshra.s32 %s779_s24, 4  ;;  %s7280_s30 = int_to_ptr.hbm [resolvable:$true] %s7279_s30 }
  0x9f   : > { %s7281_s0 = scalar_lea.hbm %s7280_s30, 512  ;;  %s7285_s25 = scalar_lea.hbm %s9167_s11, 1536 }
  0xa0   : > { %p7282_p13 = scmp.ne.s32.totalorder %s7280_s30, %s7281_s0  ;;  %p7286_p2 = scmp.lt.s32.totalorder %s7280_s30, %s9167_s11 }
  0xa1   : > { %p7287_p3 = scmp.lt.s32.totalorder %s7285_s25, %s7281_s0 }
  0xa2   : > { %p7283_p0 = pnand %p7282_p13, %p7721_p4 }
  0xa3   : > { %p7288_p6 = por %p7287_p3, %p7286_p2 }
  0xa4   : > { %p7284_p1 = pneg %p7283_p0 }
  0xa6   : > { %p7289_p7 = pnand %p7288_p6, %p7284_p1 }
  0xa8   : > { %7292 = shalt.err (!%p7289_p7)
}
  0xa9   : > { %s9223_s29 = smov 8   ;;  %s9224_s3 = smov 128  }
  0xaa   : > { %6780 = dma.hbm_to_vmem [thread:$0]  (%p7721_p4), %s779_s24, 8192, %s781_s26, %s769_s21, %s9224_s3, %s9224_s3, %s9223_s29  }
  0xab   : > { %s596_s15 = scalar_lea.hbm %s9158_s2, %s7783_s1  ;;  %s592_s23 = scalar_lea.vmem [#allocation8], %s7780_s28 }
  0xac   : > { %s598_s22 = sshll.u32 %s596_s15, 4  ;;  %s600_s16 = sshll.u32 %s592_s23, 4  ;;  %s599_s22 = int_to_ptr.hbm [resolvable:$true] %s598_s22  ;;  %s601_s16 = int_to_ptr.vmem [resolvable:$true] %s600_s16 }
  0xad   : > { %s7307_s17 = sshra.s32 %s599_s22, 4  ;;  %s7313_s24 = scalar_lea.hbm %s9158_s2, 6  ;;  %s7308_s17 = int_to_ptr.hbm [resolvable:$true] %s7307_s17 }
  0xae   : > { %s7309_s30 = scalar_lea.hbm %s7308_s17, 2  ;;  %p7314_p0 = scmp.lt.s32.totalorder %s7308_s17, %s9158_s2 }
  0xaf   : > { %p7310_p11 = scmp.ne.s32.totalorder %s7308_s17, %s7309_s30  ;;  %p7315_p1 = scmp.lt.s32.totalorder %s7313_s24, %s7309_s30 }
  0xb1   : > { %p7311_p12 = pnand %p7310_p11, %p7721_p4  ;;  %p7316_p2 = por %p7315_p1, %p7314_p0 }
  0xb3   : > { %p7312_p13 = pneg %p7311_p12 }
  0xb5   : > { %p7317_p3 = pnand %p7316_p2, %p7312_p13 }
  0xb7   : > { %7320 = shalt.err (!%p7317_p3)
}
  0xb8   : > { %s9225_s20 = scalar_lea.sflag [#allocation7], %s7774_s10  ;;  %s6756_s29 = smul.u32 6, %s7777_s12 }
  0xb9   : > { %6771 = dma.hbm_to_vmem [thread:$0]  (%p7721_p4), %s599_s22, 32, %s601_s16, %s9225_s20  }
  0xba   : > { %s6757_s3 = smul.u32 6, %s7573_s27  ;;  %s678_s15 = scalar_lea.hbm %s9162_s6, %s7783_s1 }
  0xbb   : > { %s7920_s23 = sshll.u32 %s678_s15, 4  ;;  %s633_s25 = scalar_lea.vmem [#allocation11], %s6756_s29  ;;  %s681_s23 = int_to_ptr.hbm [resolvable:$true] %s7920_s23 }
  0xbc   : > { %s637_s0 = scalar_lea.hbm %s9160_s4, %s6757_s3  ;;  %s641_s24 = sshll.u32 %s633_s25, 4  ;;  %s642_s24 = int_to_ptr.vmem [resolvable:$true] %s641_s24 }
  0xbd   : > { %s639_s26 = sshll.u32 %s637_s0, 4  ;;  %s7341_s5 = scalar_lea.hbm %s9160_s4, 18  ;;  %s640_s26 = int_to_ptr.hbm [resolvable:$true] %s639_s26 }
  0xbe   : > { %s7335_s22 = sshra.s32 %s640_s26, 4  ;;  %s7336_s22 = int_to_ptr.hbm [resolvable:$true] %s7335_s22 }
  0xbf   : > { %s7337_s16 = scalar_lea.hbm %s7336_s22, 6  ;;  %p7342_p12 = scmp.lt.s32.totalorder %s7336_s22, %s9160_s4 }
  0xc0   : > { %p7338_p6 = scmp.ne.s32.totalorder %s7336_s22, %s7337_s16  ;;  %p7343_p13 = scmp.lt.s32.totalorder %s7341_s5, %s7337_s16 }
  0xc2   : > { %p7339_p7 = pnand %p7338_p6, %p7721_p4  ;;  %p7344_p0 = por %p7343_p13, %p7342_p12 }
  0xc4   : > { %p7340_p11 = pneg %p7339_p7 }
  0xc6   : > { %p7345_p1 = pnand %p7344_p0, %p7340_p11 }
  0xc8   : > { %7348 = shalt.err (!%p7345_p1)
}
  0xc9   : > { %s9226_s29 = scalar_lea.sflag [#allocation10], %s7774_s10  ;;  %s674_s3 = scalar_lea.vmem [#allocation14], %s7780_s28 }
  0xca   : > { %6773 = dma.hbm_to_vmem [thread:$0]  (%p7721_p4), %s640_s26, 96, %s642_s24, %s9226_s29  }
  0xcb   : > { %s682_s17 = sshll.u32 %s674_s3, 4  ;;  %s716_s25 = scalar_lea.hbm %s9164_s8, %s7783_s1  ;;  %s683_s17 = int_to_ptr.vmem [resolvable:$true] %s682_s17 }
  0xcc   : > { %s7363_s22 = sshra.s32 %s681_s23, 4  ;;  %s7369_s5 = scalar_lea.hbm %s9162_s6, 6  ;;  %s7364_s22 = int_to_ptr.hbm [resolvable:$true] %s7363_s22 }
  0xcd   : > { %s7365_s16 = scalar_lea.hbm %s7364_s22, 2  ;;  %p7370_p7 = scmp.lt.s32.totalorder %s7364_s22, %s9162_s6 }
  0xce   : > { %p7366_p2 = scmp.ne.s32.totalorder %s7364_s22, %s7365_s16  ;;  %p7371_p11 = scmp.lt.s32.totalorder %s7369_s5, %s7365_s16 }
  0xd0   : > { %p7367_p3 = pnand %p7366_p2, %p7721_p4  ;;  %p7372_p12 = por %p7371_p11, %p7370_p7 }
  0xd2   : > { %p7368_p6 = pneg %p7367_p3 }
  0xd4   : > { %p7373_p13 = pnand %p7372_p12, %p7368_p6 }
  0xd6   : > { %7376 = shalt.err (!%p7373_p13)
}
  0xd7   : > { %s9227_s14 = scalar_lea.sflag [#allocation13], %s7774_s10  ;;  %s718_s15 = sshll.u32 %s716_s25, 4  ;;  %s719_s15 = int_to_ptr.hbm [resolvable:$true] %s718_s15 }
  0xd8   : > { %6775 = dma.hbm_to_vmem [thread:$0]  (%p7721_p4), %s681_s23, 32, %s683_s17, %s9227_s14  }
  0xd9   : > { %s712_s29 = scalar_lea.vmem [#allocation17], %s7780_s28  ;;  %s7391_s30 = sshra.s32 %s719_s15, 4  ;;  %s7392_s30 = int_to_ptr.hbm [resolvable:$true] %s7391_s30 }
  0xda   : > { %s720_s3 = sshll.u32 %s712_s29, 4  ;;  %s7393_s0 = scalar_lea.hbm %s7392_s30, 2  ;;  %s721_s3 = int_to_ptr.vmem [resolvable:$true] %s720_s3 }
  0xdb   : > { %p7394_p0 = scmp.ne.s32.totalorder %s7392_s30, %s7393_s0  ;;  %s7397_s18 = scalar_lea.hbm %s9164_s8, 6 }
  0xdc   : > { %p7398_p3 = scmp.lt.s32.totalorder %s7392_s30, %s9164_s8  ;;  %p7399_p6 = scmp.lt.s32.totalorder %s7397_s18, %s7393_s0 }
  0xdd   : > { %p7395_p1 = pnand %p7394_p0, %p7721_p4 }
  0xde   : > { %p7400_p7 = por %p7399_p6, %p7398_p3 }
  0xdf   : > { %p7396_p2 = pneg %p7395_p1 }
  0xe1   : > { %p7401_p11 = pnand %p7400_p7, %p7396_p2 }
  0xe3   : > { %7404 = shalt.err (!%p7401_p11)
}
  0xe4   : > { %s9228_s23 = scalar_lea.sflag [#allocation16], %s7774_s10  ;;  %s5314_s17 = sshll.u32 %s7777_s12, 2 }
  0xe5   : > { %6777 = dma.hbm_to_vmem [thread:$0]  (%p7721_p4), %s719_s15, 32, %s721_s3, %s9228_s23  }
  0xe6   : > { %s5315_s25 = sshll.u32 %s7573_s27, 2  ;;  %s9229_s14 = sld [smem:[#allocation52_spill]] }
  0xe7   : > { %s753_s30 = scalar_lea.vmem [#allocation20], %s5314_s17 }
  0xe8   : > { %s761_s0 = sshll.u32 %s753_s30, 4  ;;  %s762_s0 = int_to_ptr.vmem [resolvable:$true] %s761_s0 }
  0xec   : > { %s757_s29 = scalar_lea.hbm %s9229_s14, %s5315_s25  ;;  %s7425_s27 = scalar_lea.hbm %s9229_s14, 12 }
  0xed   : > { %s759_s22 = sshll.u32 %s757_s29, 4  ;;  %s760_s22 = int_to_ptr.hbm [resolvable:$true] %s759_s22 }
  0xee   : > { %s7419_s16 = sshra.s32 %s760_s22, 4  ;;  %s7420_s16 = int_to_ptr.hbm [resolvable:$true] %s7419_s16 }
  0xef   : > { %s7421_s18 = scalar_lea.hbm %s7420_s16, 4  ;;  %p7426_p1 = scmp.lt.s32.totalorder %s7420_s16, %s9229_s14 }
  0xf0   : > { %p7422_p12 = scmp.ne.s32.totalorder %s7420_s16, %s7421_s18  ;;  %p7427_p2 = scmp.lt.s32.totalorder %s7425_s27, %s7421_s18 }
  0xf2   : > { %p7423_p13 = pnand %p7422_p12, %p7721_p4  ;;  %p7428_p3 = por %p7427_p2, %p7426_p1 }
  0xf4   : > { %p7424_p0 = pneg %p7423_p13 }
  0xf6   : > { %p7429_p6 = pnand %p7428_p3, %p7424_p0 }
  0xf8   : > { %7432 = shalt.err (!%p7429_p6)
}
  0xf9   : > { %6779 = dma.hbm_to_vmem [thread:$0]  (%p7721_p4), %s760_s22, 64, %s762_s0, %s728_s13  }
  0xfa   : > { %s9230_s17 = sld [smem:[#allocation53_spill]]  ;;  %s794_s26 = scalar_lea.vmem [#allocation23], %s7780_s28 }
  0xfb   : > { %s802_s29 = sshll.u32 %s794_s26, 4  ;;  %s803_s29 = int_to_ptr.vmem [resolvable:$true] %s802_s29 }
 0x100   : > { %s798_s25 = scalar_lea.hbm %s9230_s17, %s7783_s1  ;;  %s7453_s13 = scalar_lea.hbm %s9230_s17, 6 }
 0x101   : > { %s800_s24 = sshll.u32 %s798_s25, 4  ;;  %s801_s24 = int_to_ptr.hbm [resolvable:$true] %s800_s24 }
 0x102   : > { %s7447_s30 = sshra.s32 %s801_s24, 4  ;;  %s7448_s30 = int_to_ptr.hbm [resolvable:$true] %s7447_s30 }
 0x103   : > { %s7449_s16 = scalar_lea.hbm %s7448_s30, 2  ;;  %p7454_p13 = scmp.lt.s32.totalorder %s7448_s30, %s9230_s17 }
 0x104   : > { %p7450_p7 = scmp.ne.s32.totalorder %s7448_s30, %s7449_s16  ;;  %p7455_p0 = scmp.lt.s32.totalorder %s7453_s13, %s7449_s16 }
 0x106   : > { %p7451_p11 = pnand %p7450_p7, %p7721_p4  ;;  %p7456_p1 = por %p7455_p0, %p7454_p13 }
 0x108   : > { %p7452_p12 = pneg %p7451_p11 }
 0x10a   : > { %p7457_p2 = pnand %p7456_p1, %p7452_p12 }
 0x10c   : > { %7460 = shalt.err (!%p7457_p2)
}
 0x10d   : > { %6781 = dma.hbm_to_vmem [thread:$0]  (%p7721_p4), %s801_s24, 32, %s803_s29, %s769_s21  }
 0x10e PF: > { %811 = sbr.rel (%p7735_p10) target bundleno = 5207 (0x1457), region = 88  ;;  %s9232_s1 = sld [smem:[#allocation43_spill]] (!%p7735_p10) }
 0x113   : > { %7520 = dma.done.wait (%p91_p5), [#allocation4], 512  }
 0x114   : > { %7522 = vsyncadd (%p91_p5), [#allocation4], 4294966784  ;;  %s9233_s15 = sld [smem:[#allocation41_spill]]  ;;  %s8013_s12 = sand.u32 1, %s9232_s1  }
 0x115   : > { %s819_s21 = scalar_lea.sflag [#allocation7], %s8013_s12 }
 0x11a   : > { %s8016_s19 = sand.u32 1, %s9233_s15  }
 0x11b   : > { %s8019_s10 = sshll.u32 %s8016_s19, 1 }
 0x11c   : > { %s822_s3 = scalar_lea.vmem [#allocation6], %s8019_s10 }
 0x11d   : > { %7524 = dma.done.wait (%p7730_p8), %s819_s21, 64  }
 0x11e   : > { %7526 = vsyncadd (%p7730_p8), %s819_s21, 4294967232  ;;  %s6758_s5 = smul.u32 768, %s8016_s19  ;;  %s832_s23 = scalar_lea.vmem [#allocation8], %s8019_s10 }
 0x11f   : > { %s839_s25 = scalar_lea.sflag [#allocation10], %s8013_s12 }
 0x120   : > { %s8030_s24 = scalar_lea.vmem [#allocation9], %s6758_s5 }
 0x121   : > { %7528 = dma.done.wait (%p7730_p8), %s839_s25, 12384  }
 0x122   : > { %7530 = vsyncadd (%p7730_p8), %s839_s25, 4294954912  ;;  %s6759_s26 = smul.u32 6, %s8016_s19  ;;  %s5325_s29 = sshll.u32 %s8016_s19, 8 }
 0x123   : > { %s859_s16 = scalar_lea.sflag [#allocation13], %s8013_s12  ;;  %s8041_s18 = scalar_lea.vmem [#allocation12], %s5325_s29 }
 0x124   : > { %s8038_s30 = scalar_lea.vmem [#allocation11], %s6759_s26 }
 0x125   : > { %7532 = dma.done.wait (%p7730_p8), %s859_s16, 4128  }
 0x126   : > { %7534 = vsyncadd (%p7730_p8), %s859_s16, 4294963168  ;;  %s872_s20 = scalar_lea.vmem [#allocation14], %s8019_s10  ;;  %s879_s13 = scalar_lea.sflag [#allocation16], %s8013_s12 }
 0x127   : > { %s882_s22 = scalar_lea.vmem [#allocation15], %s8019_s10 }
 0x128   : > { %7536 = dma.done.wait (%p7730_p8), %s879_s13, 64  }
 0x129   : > { %7538 = vsyncadd (%p7730_p8), %s879_s13, 4294967232  ;;  %s5329_s0 = sshll.u32 %s8016_s19, 9  ;;  %s892_s28 = scalar_lea.vmem [#allocation17], %s8019_s10 }
 0x12a   : > { %s899_s15 = scalar_lea.sflag [#allocation19], %s8013_s12  ;;  %s8057_s21 = scalar_lea.vmem [#allocation18], %s5329_s0 }
 0x12b   : > { %7540 = dma.done.wait (%p7730_p8), %s899_s15, 8256  }
 0x12c   : > { %7542 = vsyncadd (%p7730_p8), %s899_s15, 4294959040  ;;  %s5330_s5 = sshll.u32 %s8016_s19, 2  ;;  %s919_s26 = scalar_lea.sflag [#allocation22], %s8013_s12 }
 0x12d   : > { %s8064_s25 = scalar_lea.vmem [#allocation20], %s5330_s5  ;;  %s8067_s29 = scalar_lea.vmem [#allocation21], %s5329_s0 }
 0x12e   : > { %7544 = dma.done.wait (%p7730_p8), %s919_s26, 8224  }
 0x12f   : > { %7546 = vsyncadd (%p7730_p8), %s919_s26, 4294959072  ;;  %s932_s16 = scalar_lea.vmem [#allocation23], %s8019_s10 }
 0x130   : > { %7548 = dma.done.wait (%p91_p5), [#allocation25], 64  }
 0x131   : > { %7550 = vsyncadd (%p91_p5), [#allocation25], 4294967232 }
 0x132   : > { %7552 = dma.done.wait (%p91_p5), [#allocation28], 2064  }
 0x133   : > { %7554 = vsyncadd (%p91_p5), [#allocation28], 4294965232  ;;  %1058 = sbr.rel (%p5291_p9) target bundleno = 317 (0x13d), region = 160 }
 0x138   : > { %v1059_v0 = vld [vmem:[#allocation3] sm:$0xff]  ;;  %v1060_v1 = vld [vmem:[#allocation3 + $0x8] sm:$0xff]  ;;  %v1061_v2 = vld [vmem:[#allocation3 + $0x10] sm:$0xff] }
 0x139   : > { %1063 = vst [vmem:[#allocation2 + $0x10] sm:$0xff] %v1059_v0  ;;  %v1062_v3 = vld [vmem:[#allocation3 + $0x18] sm:$0xff] }
 0x13a   : > { %1064 = vst [vmem:[#allocation2] sm:$0xff] %v1060_v1 }
 0x13b   : > { %1065 = vst [vmem:[#allocation2 + $0x18] sm:$0xff] %v1061_v2 }
 0x13c   : > { %1066 = vst [vmem:[#allocation2 + $0x8] sm:$0xff] %v1062_v3 }
 0x13d PF: > { %v7590_v10 = vmov 256.0   ;;  %v5508_v14 = vld [vmem:[%s8030_s24 + $0x150] sm:$0xf]  ;;  %v6527_v15 = vld [vmem:[%s8030_s24 + $0x164] sm:$0xf0]  ;;  %s7591_s1 = smov 96  }
 0x13e   : > { %6890 = vrcp.f32 %v7590_v10  ;;  %v5700_v16 = vld [vmem:[%s8030_s24 + $0x2d0] sm:$0xf]  ;;  %v5509_v17 = vor.u32 %v6527_v15, %v5508_v14  ;;  %v6575_v18 = vld [vmem:[%s8030_s24 + $0x2e4] sm:$0xf0]  ;;  %v6524_v19 = vld [vmem:[%s8030_s24 + $0x154] sm:$0xf] }
 0x13f   : > { %v5510_v20 = vld [vmem:[%s8030_s24 + $0x168] sm:$0xf0]  ;;  %v5701_v21 = vor.u32 %v6575_v18, %v5700_v16  ;;  %v6572_v23 = vld [vmem:[%s8030_s24 + $0x2d4] sm:$0xf]  ;;  %v5484_v25 = vld [vmem:[%s8030_s24 + $0x120] sm:$0xf] }
 0x140   : > { %v8084_v4 = vld [vmem:[#allocation2 + $0x10] sm:$0xff]  ;;  %v5513_v22 = vor.u32 %v6524_v19, %v5510_v20  ;;  %1740 = vmatpush.bf16.msra.mxu0 %v5509_v17  ;;  %v6521_v27 = vld [vmem:[%s8030_s24 + $0x134] sm:$0xf0]  ;;  %v5676_v28 = vld [vmem:[%s8030_s24 + $0x2a0] sm:$0xf]  ;;  %vm1946_vm7 = vcmask 261120  }
 0x141   : > { %v8086_v5 = vld [vmem:[#allocation2] sm:$0xff]  ;;  %v5702_v24 = vld [vmem:[%s8030_s24 + $0x2e8] sm:$0xf0]  ;;  %1754 = vmatpush.bf16.msra.mxu1 %v5701_v21  ;;  %v5485_v30 = vor.u32 %v6521_v27, %v5484_v25  ;;  %v6518_v32 = vld [vmem:[%s8030_s24 + $0x124] sm:$0xf]  ;;  %vm2041_vm8 = vcmask 1043456  }
 0x142   : > { %v1073_v6 = vadd.f32 %v8086_v5, %v8084_v4  ;;  %v8090_v7 = vld [vmem:[#allocation2 + $0x18] sm:$0xff]  ;;  %v5705_v26 = vor.u32 %v6572_v23, %v5702_v24  ;;  %v6569_v29 = vld [vmem:[%s8030_s24 + $0x2b4] sm:$0xf0]  ;;  %1768 = vmatpush.bf16.msra.mxu2 %v5513_v22  ;;  %v5486_v33 = vld [vmem:[%s8030_s24 + $0x138] sm:$0xf0]  ;;  %vm1987_vm9 = vcmask 64512  }
 0x143   : > { %v8092_v8 = vld [vmem:[#allocation2 + $0x8] sm:$0xff]  ;;  %v5677_v31 = vor.u32 %v6569_v29, %v5676_v28  ;;  %v5489_v36 = vor.u32 %v6518_v32, %v5486_v33  ;;  %v5678_v37 = vld [vmem:[%s8030_s24 + $0x2b8] sm:$0xf0]  ;;  %v5460_v38 = vld [vmem:[%s8030_s24 + $0xf0] sm:$0xf]  ;;  %s7592_s27 = smov 64  }
 0x144   : > { %1074 = vadd.xlane.f32.xlu0 %v1073_v6  ;;  %v1076_v9 = vadd.f32 %v8092_v8, %v8090_v7  ;;  %v8096_v11 = vpop.eup %6890  ;;  %v6566_v34 = vld [vmem:[%s8030_s24 + $0x2a4] sm:$0xf]  ;;  %1782 = vmatpush.bf16.msra.mxu3 %v5705_v26  ;;  %v6515_v39 = vld [vmem:[%s8030_s24 + $0x104] sm:$0xf0]  ;;  %v5652_v41 = vld [vmem:[%s8030_s24 + $0x270] sm:$0xf] }
 0x145   : > { %v1080_v12 = vmul.f32 256.0, %v8096_v11  ;;  %v5681_v40 = vor.u32 %v6566_v34, %v5678_v37  ;;  %v6563_v42 = vld [vmem:[%s8030_s24 + $0x284] sm:$0xf0]  ;;  %v6512_v43 = vld [vmem:[%s8030_s24 + $0xf4] sm:$0xf]  ;;  %1741 = vmatpush.bf16.msra.mxu0 %v5485_v30  ;;  %v5461_v44 = vor.u32 %v6515_v39, %v5460_v38  ;;  %1755 = vmatpush.bf16.msra.mxu1 %v5677_v31  ;;  %vm1084_vm0 = vweird.f32 %v8096_v11  ;;  %s7593_s12 = smov 32  }
 0x146   : > { %v5462_v45 = vld [vmem:[%s8030_s24 + $0x108] sm:$0xf0]  ;;  %v6560_v46 = vld [vmem:[%s8030_s24 + $0x274] sm:$0xf]  ;;  %1769 = vmatpush.bf16.msra.mxu2 %v5489_v36  ;;  %v5653_v48 = vor.u32 %v6563_v42, %v5652_v41  ;;  %v5436_v50 = vld [vmem:[%s8030_s24 + $0xc0] sm:$0xf] }
 0x147   : > { %v1081_v13 = vsub.f32 1.0, %v1080_v12  ;;  %v5654_v47 = vld [vmem:[%s8030_s24 + $0x288] sm:$0xf0]  ;;  %v5465_v49 = vor.u32 %v6512_v43, %v5462_v45  ;;  %v6509_v51 = vld [vmem:[%s8030_s24 + $0xd4] sm:$0xf0]  ;;  %s9235_s19 = sld [smem:[#allocation43_spill]] }
 0x148   : > { %v5628_v52 = vld [vmem:[%s8030_s24 + $0x240] sm:$0xf]  ;;  %1783 = vmatpush.bf16.msra.mxu3 %v5681_v40  ;;  %v5657_v54 = vor.u32 %v6560_v46, %v5654_v47  ;;  %v6557_v55 = vld [vmem:[%s8030_s24 + $0x254] sm:$0xf0]  ;;  %v6506_v56 = vld [vmem:[%s8030_s24 + $0xc4] sm:$0xf]  ;;  %v5437_v60 = vor.u32 %v6509_v51, %v5436_v50 }
 0x149   : > { %v1082_v35 = vmul.f32 %v8096_v11, %v1081_v13  ;;  %v5438_v57 = vld [vmem:[%s8030_s24 + $0xd8] sm:$0xf0]  ;;  %v6554_v58 = vld [vmem:[%s8030_s24 + $0x244] sm:$0xf]  ;;  %1742 = vmatpush.bf16.msra.mxu0 %v5461_v44  ;;  %1756 = vmatpush.bf16.msra.mxu1 %v5653_v48  ;;  %v5629_v61 = vor.u32 %v6557_v55, %v5628_v52  ;;  %v5412_v63 = vld [vmem:[%s8030_s24 + $0x90] sm:$0xf] }
 0x14a   : > { %v5630_v59 = vld [vmem:[%s8030_s24 + $0x258] sm:$0xf0]  ;;  %1770 = vmatpush.bf16.msra.mxu2 %v5465_v49  ;;  %v5441_v62 = vor.u32 %v6506_v56, %v5438_v57  ;;  %v6503_v0 = vld [vmem:[%s8030_s24 + $0xa4] sm:$0xf0]  ;;  %v5604_v1 = vld [vmem:[%s8030_s24 + $0x210] sm:$0xf] }
 0x14b   : > { %v1083_v53 = vadd.f32 %v8096_v11, %v1082_v35  ;;  %v5633_v3 = vor.u32 %v6554_v58, %v5630_v59  ;;  %v6551_v6 = vld [vmem:[%s8030_s24 + $0x224] sm:$0xf0]  ;;  %v5414_v10 = vld [vmem:[%s8030_s24 + $0xa8] sm:$0xf0]  ;;  %v6548_v12 = vld [vmem:[%s8030_s24 + $0x214] sm:$0xf]  ;;  %v5413_v15 = vor.u32 %v6503_v0, %v5412_v63 }
 0x14c   : > { %1077 = vadd.xlane.f32.xlu0 %v1076_v9  ;;  %1784 = vmatpush.bf16.msra.mxu3 %v5657_v54  ;;  %v6500_v9 = vld [vmem:[%s8030_s24 + $0x94] sm:$0xf]  ;;  %v5606_v13 = vld [vmem:[%s8030_s24 + $0x228] sm:$0xf0]  ;;  %v5605_v17 = vor.u32 %v6551_v6, %v5604_v1  ;;  %v5388_v29 = vld [vmem:[%s8030_s24 + $0x60] sm:$0xf] }
 0x14d   : > { %v8138_v2 = vsel %vm1084_vm0, %v8096_v11, %v1083_v53  ;;  %1743 = vmatpush.bf16.msra.mxu0 %v5437_v60  ;;  %1757 = vmatpush.bf16.msra.mxu1 %v5629_v61  ;;  %v5417_v18 = vor.u32 %v6500_v9, %v5414_v10  ;;  %v5609_v19 = vor.u32 %v6548_v12, %v5606_v13  ;;  %v6497_v30 = vld [vmem:[%s8030_s24 + $0x74] sm:$0xf0]  ;;  %v5580_v31 = vld [vmem:[%s8030_s24 + $0x1e0] sm:$0xf]  ;;  %v6494_v33 = vld [vmem:[%s8030_s24 + $0x64] sm:$0xf] }
 0x14e   : > { %1771 = vmatpush.bf16.msra.mxu2 %v5441_v62  ;;  %v6545_v32 = vld [vmem:[%s8030_s24 + $0x1f4] sm:$0xf0]  ;;  %v6542_v36 = vld [vmem:[%s8030_s24 + $0x1e4] sm:$0xf]  ;;  %v5582_v37 = vld [vmem:[%s8030_s24 + $0x1f8] sm:$0xf0] }
 0x14f   : > { %v5581_v34 = vor.u32 %v6545_v32, %v5580_v31  ;;  %v5585_v38 = vor.u32 %v6542_v36, %v5582_v37  ;;  %v5364_v39 = vld [vmem:[%s8030_s24 + $0x30] sm:$0xf]  ;;  %v6491_v40 = vld [vmem:[%s8030_s24 + $0x44] sm:$0xf0]  ;;  %v6488_v44 = vld [vmem:[%s8030_s24 + $0x34] sm:$0xf] }
 0x150   : > { %1785 = vmatpush.bf16.msra.mxu3 %v5633_v3  ;;  %v5556_v41 = vld [vmem:[%s8030_s24 + $0x1b0] sm:$0xf]  ;;  %v5365_v42 = vor.u32 %v6491_v40, %v5364_v39  ;;  %v6539_v43 = vld [vmem:[%s8030_s24 + $0x1c4] sm:$0xf0]  ;;  %v5366_v45 = vld [vmem:[%s8030_s24 + $0x48] sm:$0xf0] }
 0x151   : > { %1744 = vmatpush.bf16.msra.mxu0 %v5413_v15  ;;  %1758 = vmatpush.bf16.msra.mxu1 %v5605_v17  ;;  %v5557_v46 = vor.u32 %v6539_v43, %v5556_v41  ;;  %v5369_v47 = vor.u32 %v6488_v44, %v5366_v45  ;;  %v6536_v48 = vld [vmem:[%s8030_s24 + $0x1b4] sm:$0xf]  ;;  %v5558_v49 = vld [vmem:[%s8030_s24 + $0x1c8] sm:$0xf0]  ;;  %v5340_v51 = vld [vmem:[%s8030_s24] sm:$0xf] }
 0x152   : > { %1772 = vmatpush.bf16.msra.mxu2 %v5417_v18  ;;  %v5561_v50 = vor.u32 %v6536_v48, %v5558_v49  ;;  %v6485_v52 = vld [vmem:[%s8030_s24 + $0x14] sm:$0xf0]  ;;  %v5532_v53 = vld [vmem:[%s8030_s24 + $0x180] sm:$0xf]  ;;  %v6482_v56 = vld [vmem:[%s8030_s24 + $0x4] sm:$0xf] }
 0x153   : > { %v5341_v54 = vor.u32 %v6485_v52, %v5340_v51  ;;  %v6533_v55 = vld [vmem:[%s8030_s24 + $0x194] sm:$0xf0]  ;;  %v5342_v57 = vld [vmem:[%s8030_s24 + $0x18] sm:$0xf0]  ;;  %v6530_v60 = vld [vmem:[%s8030_s24 + $0x184] sm:$0xf] }
 0x154   : > { %1786 = vmatpush.bf16.msra.mxu3 %v5609_v19  ;;  %v5533_v58 = vor.u32 %v6533_v55, %v5532_v53  ;;  %v5345_v59 = vor.u32 %v6482_v56, %v5342_v57  ;;  %v5534_v61 = vld [vmem:[%s8030_s24 + $0x198] sm:$0xf0]  ;;  %v5516_v62 = vld [vmem:[%s8030_s24 + $0x158] sm:$0xf]  ;;  %v6528_v0 = vld [vmem:[%s8030_s24 + $0x16c] sm:$0xf0] }
 0x155   : > { %1759 = vmatpush.bf16.msra.mxu1 %v5581_v34  ;;  %v5537_v63 = vor.u32 %v6530_v60, %v5534_v61  ;;  %v5708_v1 = vld [vmem:[%s8030_s24 + $0x2d8] sm:$0xf]  ;;  %v6576_v3 = vld [vmem:[%s8030_s24 + $0x2ec] sm:$0xf0]  ;;  %v5517_v6 = vor.u32 %v6528_v0, %v5516_v62  ;;  %v6525_v10 = vld [vmem:[%s8030_s24 + $0x15c] sm:$0xf] }
 0x156   : > { %v5709_v9 = vor.u32 %v6576_v3, %v5708_v1  ;;  %v5518_v12 = vld [vmem:[%s8030_s24 + $0x170] sm:$0xf0]  ;;  %v6573_v13 = vld [vmem:[%s8030_s24 + $0x2dc] sm:$0xf]  ;;  %v6522_v17 = vld [vmem:[%s8030_s24 + $0x13c] sm:$0xf0] }
 0x157   : > { %v5710_v15 = vld [vmem:[%s8030_s24 + $0x2f0] sm:$0xf0]  ;;  %v6516_v31 = vld [vmem:[%s8030_s24 + $0x10c] sm:$0xf0]  ;;  %v6561_v37 = vld [vmem:[%s8030_s24 + $0x27c] sm:$0xf] }
 0x158   : > { %1787 = vmatpush.bf16.msra.mxu3 %v5585_v38  ;;  %v5713_v18 = vor.u32 %v6573_v13, %v5710_v15  ;;  %v5470_v34 = vld [vmem:[%s8030_s24 + $0x110] sm:$0xf0]  ;;  %v5444_v40 = vld [vmem:[%s8030_s24 + $0xc8] sm:$0xf]  ;;  %v6510_v41 = vld [vmem:[%s8030_s24 + $0xdc] sm:$0xf0] }
 0x159   : > { %1760 = vmatpush.bf16.msra.mxu1 %v5557_v46  ;;  %v5662_v38 = vld [vmem:[%s8030_s24 + $0x290] sm:$0xf0]  ;;  %v5445_v43 = vor.u32 %v6510_v41, %v5444_v40  ;;  %v6558_v44 = vld [vmem:[%s8030_s24 + $0x25c] sm:$0xf0]  ;;  %v6507_v45 = vld [vmem:[%s8030_s24 + $0xcc] sm:$0xf] }
 0x15a   : > { %v5665_v39 = vor.u32 %v6561_v37, %v5662_v38  ;;  %v5446_v46 = vld [vmem:[%s8030_s24 + $0xe0] sm:$0xf0]  ;;  %v6555_v49 = vld [vmem:[%s8030_s24 + $0x24c] sm:$0xf]  ;;  %v5420_v52 = vld [vmem:[%s8030_s24 + $0x98] sm:$0xf] }
 0x15b   : > { %v5449_v48 = vor.u32 %v6507_v45, %v5446_v46  ;;  %v6504_v53 = vld [vmem:[%s8030_s24 + $0xac] sm:$0xf0]  ;;  %v6501_v57 = vld [vmem:[%s8030_s24 + $0x9c] sm:$0xf]  ;;  %v5614_v62 = vld [vmem:[%s8030_s24 + $0x230] sm:$0xf0] }
 0x15c   : > { %1788 = vmatpush.bf16.msra.mxu3 %v5561_v50  ;;  %v5638_v50 = vld [vmem:[%s8030_s24 + $0x260] sm:$0xf0]  ;;  %v5421_v55 = vor.u32 %v6504_v53, %v5420_v52  ;;  %v6552_v56 = vld [vmem:[%s8030_s24 + $0x22c] sm:$0xf0]  ;;  %v6549_v61 = vld [vmem:[%s8030_s24 + $0x21c] sm:$0xf] }
 0x15d   : > { %1761 = vmatpush.bf16.msra.mxu1 %v5533_v58  ;;  %v5641_v51 = vor.u32 %v6555_v49, %v5638_v50  ;;  %v5422_v58 = vld [vmem:[%s8030_s24 + $0xb0] sm:$0xf0]  ;;  %v5396_v0 = vld [vmem:[%s8030_s24 + $0x68] sm:$0xf]  ;;  %v6498_v1 = vld [vmem:[%s8030_s24 + $0x7c] sm:$0xf0] }
 0x15e   : > { %v5425_v60 = vor.u32 %v6501_v57, %v5422_v58  ;;  %v5588_v3 = vld [vmem:[%s8030_s24 + $0x1e8] sm:$0xf]  ;;  %v6543_v15 = vld [vmem:[%s8030_s24 + $0x1ec] sm:$0xf]  ;;  %v5350_v38 = vld [vmem:[%s8030_s24 + $0x20] sm:$0xf0] }
 0x15f   : > { %v6483_v37 = vld [vmem:[%s8030_s24 + $0xc] sm:$0xf]  ;;  %p6410_p4 = scmp.ne.s32.totalorder %s9235_s19, 2 }
 0x160   : > { %1789 = vmatpush.bf16.msra.mxu3 %v5537_v63  ;;  %v5617_v63 = vor.u32 %v6549_v61, %v5614_v62  ;;  %v5353_v40 = vor.u32 %v6483_v37, %v5350_v38  ;;  %v6531_v41 = vld [vmem:[%s8030_s24 + $0x18c] sm:$0xf] }
 0x161   : > { %1810 = vmatpush.bf16.msrb.mxu1 %v5709_v9  ;;  %v6546_v9 = vld [vmem:[%s8030_s24 + $0x1fc] sm:$0xf0]  ;;  %v5694_v37 = vld [vmem:[%s8030_s24 + $0x2c8] sm:$0xf0] }
 0x162   : > { %v5589_v13 = vor.u32 %v6546_v9, %v5588_v3 }
 0x164   : > { %1838 = vmatpush.bf16.msrb.mxu3 %v5713_v18 }
 0x1b7   : > { %v1075_v14 = vpop.xlane.xlu0 %1074 }
 0x1b8   : > { %v1086_v16 = vmul.f32 %v8138_v2, %v1075_v14  ;;  %v5521_v14 = vor.u32 %v6525_v10, %v5518_v12  ;;  %v6495_v10 = vld [vmem:[%s8030_s24 + $0x6c] sm:$0xf]  ;;  %v5398_v12 = vld [vmem:[%s8030_s24 + $0x80] sm:$0xf0] }
 0x1ba   : > { %v8147_v11 = vsub.f32 %v8084_v4, %v1086_v16  ;;  %v8150_v20 = vsub.f32 %v8086_v5, %v1086_v16  ;;  %v5492_v16 = vld [vmem:[%s8030_s24 + $0x128] sm:$0xf] }
 0x1bb   : > { %v5493_v19 = vor.u32 %v6522_v17, %v5492_v16  ;;  %v5590_v16 = vld [vmem:[%s8030_s24 + $0x200] sm:$0xf0] }
 0x1bc   : > { %v1092_v21 = vmul.f32 %v8147_v11, %v8147_v11  ;;  %v1093_v22 = vmul.f32 %v8150_v20, %v8150_v20  ;;  %v5593_v17 = vor.u32 %v6543_v15, %v5590_v16  ;;  %v6529_v16 = vld [vmem:[%s8030_s24 + $0x174] sm:$0xf0] }
 0x1be   : > { %v1096_v4 = vadd.f32 %v1093_v22, %v1092_v21  ;;  %v5684_v21 = vld [vmem:[%s8030_s24 + $0x2a8] sm:$0xf]  ;;  %v6570_v22 = vld [vmem:[%s8030_s24 + $0x2bc] sm:$0xf0] }
 0x1bf   : > { %v1078_v23 = vpop.xlane.xlu0 %1077 }
 0x1c0   : > { %v1087_v5 = vmul.f32 %v8138_v2, %v1078_v23  ;;  %1097 = vadd.xlane.f32.xlu1 %v1096_v4  ;;  %v6519_v4 = vld [vmem:[%s8030_s24 + $0x12c] sm:$0xf]  ;;  %v5685_v23 = vor.u32 %v6570_v22, %v5684_v21  ;;  %v6492_v21 = vld [vmem:[%s8030_s24 + $0x4c] sm:$0xf0]  ;;  %v5564_v22 = vld [vmem:[%s8030_s24 + $0x1b8] sm:$0xf] }
 0x1c2   : > { %v8158_v24 = vsub.f32 %v8090_v7, %v1087_v5  ;;  %v8161_v25 = vsub.f32 %v8092_v8, %v1087_v5  ;;  %v5389_v7 = vor.u32 %v6497_v30, %v5388_v29  ;;  %v5390_v8 = vld [vmem:[%s8030_s24 + $0x78] sm:$0xf0]  ;;  %v5494_v5 = vld [vmem:[%s8030_s24 + $0x140] sm:$0xf0]  ;;  %v5468_v30 = vld [vmem:[%s8030_s24 + $0xf8] sm:$0xf]  ;;  %1811 = vmatpush.bf16.msrb.mxu1 %v5685_v23 }
 0x1c3   : > { %v5393_v35 = vor.u32 %v6494_v33, %v5390_v8  ;;  %v5469_v32 = vor.u32 %v6516_v31, %v5468_v30  ;;  %v6564_v33 = vld [vmem:[%s8030_s24 + $0x28c] sm:$0xf0]  ;;  %v6513_v8 = vld [vmem:[%s8030_s24 + $0xfc] sm:$0xf]  ;;  %v5566_v31 = vld [vmem:[%s8030_s24 + $0x1d0] sm:$0xf0] }
 0x1c4   : > { %v1094_v26 = vmul.f32 %v8158_v24, %v8158_v24  ;;  %v1095_v27 = vmul.f32 %v8161_v25, %v8161_v25  ;;  %1745 = vmatpush.bf16.msra.mxu0 %v5389_v7  ;;  %v5660_v7 = vld [vmem:[%s8030_s24 + $0x278] sm:$0xf]  ;;  %v5473_v36 = vor.u32 %v6513_v8, %v5470_v34  ;;  %v6537_v30 = vld [vmem:[%s8030_s24 + $0x1bc] sm:$0xf]  ;;  %v6486_v8 = vld [vmem:[%s8030_s24 + $0x1c] sm:$0xf0] }
 0x1c5   : > { %1773 = vmatpush.bf16.msra.mxu2 %v5393_v35  ;;  %v5661_v35 = vor.u32 %v6564_v33, %v5660_v7  ;;  %v5348_v33 = vld [vmem:[%s8030_s24 + $0x8] sm:$0xf] }
 0x1c6   : > { %v1099_v28 = vadd.f32 %v1095_v27, %v1094_v26  ;;  %v6567_v26 = vld [vmem:[%s8030_s24 + $0x2ac] sm:$0xf]  ;;  %v5686_v27 = vld [vmem:[%s8030_s24 + $0x2c0] sm:$0xf0]  ;;  %v5540_v34 = vld [vmem:[%s8030_s24 + $0x188] sm:$0xf] }
 0x1c7   : > { %v5689_v29 = vor.u32 %v6567_v26, %v5686_v27  ;;  %1812 = vmatpush.bf16.msrb.mxu1 %v5661_v35  ;;  %v6489_v26 = vld [vmem:[%s8030_s24 + $0x3c] sm:$0xf]  ;;  %v5374_v27 = vld [vmem:[%s8030_s24 + $0x50] sm:$0xf0]  ;;  %v5349_v35 = vor.u32 %v6486_v8, %v5348_v33  ;;  %v5692_v33 = vld [vmem:[%s8030_s24 + $0x2b0] sm:$0xf] }
 0x1c8   : > { %1100 = vadd.xlane.f32.xlu1 %v1099_v28  ;;  %1746 = vmatpush.bf16.msra.mxu0 %v5365_v42  ;;  %v5497_v28 = vor.u32 %v6519_v4, %v5494_v5  ;;  %v5636_v42 = vld [vmem:[%s8030_s24 + $0x248] sm:$0xf]  ;;  %v6540_v5 = vld [vmem:[%s8030_s24 + $0x1cc] sm:$0xf0] }
 0x1c9   : > { %1774 = vmatpush.bf16.msra.mxu2 %v5369_v47  ;;  %1839 = vmatpush.bf16.msrb.mxu3 %v5689_v29  ;;  %v5637_v47 = vor.u32 %v6558_v44, %v5636_v42  ;;  %v5377_v29 = vor.u32 %v6489_v26, %v5374_v27  ;;  %v5542_v42 = vld [vmem:[%s8030_s24 + $0x1a0] sm:$0xf0]  ;;  %v6571_v8 = vld [vmem:[%s8030_s24 + $0x2c4] sm:$0xf0] }
 0x1ca   : > { %v5545_v44 = vor.u32 %v6531_v41, %v5542_v42  ;;  %v6517_v41 = vld [vmem:[%s8030_s24 + $0x114] sm:$0xf0] }
 0x1cb   : > { %1813 = vmatpush.bf16.msrb.mxu1 %v5637_v47 }
 0x1cc   : > { %1747 = vmatpush.bf16.msra.mxu0 %v5341_v54  ;;  %v5612_v54 = vld [vmem:[%s8030_s24 + $0x218] sm:$0xf] }
 0x1cd   : > { %1775 = vmatpush.bf16.msra.mxu2 %v5345_v59  ;;  %1840 = vmatpush.bf16.msrb.mxu3 %v5665_v39  ;;  %v5613_v59 = vor.u32 %v6552_v56, %v5612_v54  ;;  %v1071_v56 = vld [vmem:[%s822_s3] sm:$0x3] }
 0x1ce   : > { %v1131_v61 = vperm.slane %v1071_v56, 0  ;;  %v1132_v62 = vperm.slane %v1071_v56, 1  ;;  %v5644_v56 = vld [vmem:[%s8030_s24 + $0x250] sm:$0xf] }
 0x1cf   : > { %1814 = vmatpush.bf16.msrb.mxu1 %v5613_v59 }
 0x1d0   : > { %1796 = vmatpush.bf16.msrb.mxu0 %v5517_v6  ;;  %v5397_v6 = vor.u32 %v6498_v1, %v5396_v0 }
 0x1d1   : > { %1824 = vmatpush.bf16.msrb.mxu2 %v5521_v14  ;;  %1841 = vmatpush.bf16.msrb.mxu3 %v5641_v51  ;;  %v5401_v14 = vor.u32 %v6495_v10, %v5398_v12 }
 0x1d3   : > { %1815 = vmatpush.bf16.msrb.mxu1 %v5589_v13 }
 0x1d4   : > { %1797 = vmatpush.bf16.msrb.mxu0 %v5493_v19  ;;  %v5372_v19 = vld [vmem:[%s8030_s24 + $0x38] sm:$0xf] }
 0x1d5   : > { %1825 = vmatpush.bf16.msrb.mxu2 %v5497_v28  ;;  %1842 = vmatpush.bf16.msrb.mxu3 %v5617_v63  ;;  %v5373_v23 = vor.u32 %v6492_v21, %v5372_v19  ;;  %v5565_v28 = vor.u32 %v6540_v5, %v5564_v22  ;;  %v6526_v19 = vld [vmem:[%s8030_s24 + $0x164] sm:$0xf]  ;;  %v5526_v5 = vld [vmem:[%s8030_s24 + $0x178] sm:$0xf0] }
 0x1d7   : > { %1816 = vmatpush.bf16.msrb.mxu1 %v5565_v28 }
 0x1d8   : > { %1798 = vmatpush.bf16.msrb.mxu0 %v5469_v32  ;;  %v5569_v32 = vor.u32 %v6537_v30, %v5566_v31  ;;  %v5500_v30 = vld [vmem:[%s8030_s24 + $0x130] sm:$0xf]  ;;  %v6523_v31 = vld [vmem:[%s8030_s24 + $0x144] sm:$0xf0] }
 0x1d9   : > { %1826 = vmatpush.bf16.msrb.mxu2 %v5473_v36  ;;  %1843 = vmatpush.bf16.msrb.mxu3 %v5593_v17  ;;  %v6534_v36 = vld [vmem:[%s8030_s24 + $0x19c] sm:$0xf0]  ;;  %v5501_v38 = vor.u32 %v6523_v31, %v5500_v30  ;;  %v6493_v30 = vld [vmem:[%s8030_s24 + $0x54] sm:$0xf0] }
 0x1da   : > { %v5541_v39 = vor.u32 %v6534_v36, %v5540_v34  ;;  %v5716_v17 = vld [vmem:[%s8030_s24 + $0x2e0] sm:$0xf]  ;;  %v6520_v34 = vld [vmem:[%s8030_s24 + $0x134] sm:$0xf] }
 0x1db   : > { %v6568_v36 = vld [vmem:[%s8030_s24 + $0x2b4] sm:$0xf] }
 0x1dc   : > { %1799 = vmatpush.bf16.msrb.mxu0 %v5445_v43  ;;  %1817 = vmatpush.bf16.msrb.mxu1 %v5541_v39  ;;  %v5693_v39 = vor.u32 %v6571_v8, %v5692_v33  ;;  %v6541_v33 = vld [vmem:[%s8030_s24 + $0x1d4] sm:$0xf0]  ;;  %v6490_v8 = vld [vmem:[%s8030_s24 + $0x44] sm:$0xf] }
 0x1dd   : > { %1827 = vmatpush.bf16.msrb.mxu2 %v5449_v48  ;;  %1844 = vmatpush.bf16.msrb.mxu3 %v5569_v32 }
 0x1e0   : > { %1800 = vmatpush.bf16.msrb.mxu0 %v5421_v55 }
 0x1e1   : > { %1828 = vmatpush.bf16.msrb.mxu2 %v5425_v60  ;;  %1845 = vmatpush.bf16.msrb.mxu3 %v5545_v44  ;;  %v1072_v60 = vld [vmem:[%s832_s23] sm:$0x3]  ;;  %v5668_v44 = vld [vmem:[%s8030_s24 + $0x280] sm:$0xf] }
 0x1e2   : > { %v1140_v3 = vperm.slane %v1072_v60, 0 }
 0x1e4   : > { %1801 = vmatpush.bf16.msrb.mxu0 %v5397_v6  ;;  %v1141_v6 = vperm.slane %v1072_v60, 1  ;;  %v6556_v60 = vld [vmem:[%s8030_s24 + $0x254] sm:$0xf] }
 0x1e5   : > { %1829 = vmatpush.bf16.msrb.mxu2 %v5401_v14 }
 0x1e8   : > { %1802 = vmatpush.bf16.msrb.mxu0 %v5373_v23 }
 0x1e9   : > { %1830 = vmatpush.bf16.msrb.mxu2 %v5377_v29 }
 0x1ec   : > { %1803 = vmatpush.bf16.msrb.mxu0 %v5349_v35  ;;  %v5502_v35 = vld [vmem:[%s8030_s24 + $0x148] sm:$0xf0] }
 0x1ed   : > { %1831 = vmatpush.bf16.msrb.mxu2 %v5353_v40  ;;  %v5476_v40 = vld [vmem:[%s8030_s24 + $0x100] sm:$0xf]  ;;  %v5505_v42 = vor.u32 %v6520_v34, %v5502_v35  ;;  %v5382_v34 = vld [vmem:[%s8030_s24 + $0x58] sm:$0xf0]  ;;  %v6538_v35 = vld [vmem:[%s8030_s24 + $0x1c4] sm:$0xf] }
 0x233   : > { %v1098_v18 = vpop.xlane.xlu1 %1097 }
 0x234   : > { %v1102_v4 = vmul.f32 %v1098_v18, %v8138_v2  ;;  %v6577_v18 = vld [vmem:[%s8030_s24 + $0x2f4] sm:$0xf0] }
 0x235   : > { %v5717_v29 = vor.u32 %v6577_v18, %v5716_v17  ;;  %v6499_v17 = vld [vmem:[%s8030_s24 + $0x84] sm:$0xf0] }
 0x236   : > { %v1104_v7 = vadd.f32 1e-06, %v1102_v4 }
 0x238   : > { %6892 = vrsqrt.f32 %v1104_v7  ;;  %vm1112_vm2 = vweird.f32 %v1104_v7 }
 0x23b   : > { %v1101_v43 = vpop.xlane.xlu1 %1100 }
 0x23c   : > { %v1103_v45 = vmul.f32 %v1101_v43, %v8138_v2  ;;  %v5697_v43 = vor.u32 %v6568_v36, %v5694_v37  ;;  %v5574_v36 = vld [vmem:[%s8030_s24 + $0x1d8] sm:$0xf0] }
 0x23e   : > { %v6893_v46 = vpop.eup %6892  ;;  %v1105_v47 = vadd.f32 1e-06, %v1103_v45  ;;  %v6565_v45 = vld [vmem:[%s8030_s24 + $0x294] sm:$0xf0] }
 0x23f   : > { %v1107_v48 = vmul.f32 %v6893_v46, %v1104_v7  ;;  %vm1113_vm1 = vweird.f32 %v6893_v46  ;;  %v5529_v7 = vor.u32 %v6526_v19, %v5526_v5  ;;  %v6544_v5 = vld [vmem:[%s8030_s24 + $0x1f4] sm:$0xf] }
 0x240   : > { %6894 = vrsqrt.f32 %v1105_v47  ;;  %vm1114_vm3 = vmor %vm1112_vm2, %vm1113_vm1  ;;  %vm1122_vm5 = vweird.f32 %v1105_v47 }
 0x241   : > { %v1108_v49 = vmul.f32 %v6893_v46, %v1107_v48  ;;  %v6562_v48 = vld [vmem:[%s8030_s24 + $0x284] sm:$0xf] }
 0x243   : > { %v1109_v50 = vmul.f32 0.5, %v1108_v49  ;;  %v5670_v49 = vld [vmem:[%s8030_s24 + $0x298] sm:$0xf0] }
 0x245   : > { %v1110_v51 = vsub.f32 1.5, %v1109_v50  ;;  %v5477_v50 = vor.u32 %v6517_v41, %v5476_v40  ;;  %v6487_v40 = vld [vmem:[%s8030_s24 + $0x24] sm:$0xf0]  ;;  %v5385_v41 = vor.u32 %v6490_v8, %v5382_v34 }
 0x246   : > { %v6895_v52 = vpop.eup %6894 }
 0x247   : > { %v1111_v53 = vmul.f32 %v6893_v46, %v1110_v51  ;;  %v1117_v54 = vmul.f32 %v6895_v52, %v1105_v47  ;;  %vm1123_vm4 = vweird.f32 %v6895_v52  ;;  %v5478_v47 = vld [vmem:[%s8030_s24 + $0x118] sm:$0xf0]  ;;  %v5669_v51 = vor.u32 %v6565_v45, %v5668_v44  ;;  %v6535_v44 = vld [vmem:[%s8030_s24 + $0x1a4] sm:$0xf0]  ;;  %v6484_v45 = vld [vmem:[%s8030_s24 + $0x14] sm:$0xf] }
 0x248   : > { %vm1124_vm6 = vmor %vm1122_vm5, %vm1123_vm4 }
 0x249   : > { %v1118_v55 = vmul.f32 %v6895_v52, %v1117_v54  ;;  %v1115_v57 = vsel %vm1114_vm3, %v6893_v46, %v1111_v53  ;;  %v6514_v46 = vld [vmem:[%s8030_s24 + $0x104] sm:$0xf]  ;;  %v6511_v53 = vld [vmem:[%s8030_s24 + $0xe4] sm:$0xf0] }
 0x24a   : > { %v1126_v63 = vmul.f32 %v1115_v57, %v8147_v11  ;;  %v1127_v0 = vmul.f32 %v1115_v57, %v8150_v20  ;;  %v5524_v20 = vld [vmem:[%s8030_s24 + $0x160] sm:$0xf]  ;;  %v5481_v54 = vor.u32 %v6514_v46, %v5478_v47  ;;  %v6559_v57 = vld [vmem:[%s8030_s24 + $0x264] sm:$0xf0]  ;;  %v5358_v46 = vld [vmem:[%s8030_s24 + $0x28] sm:$0xf0] }
 0x24b   : > { %v1119_v58 = vmul.f32 0.5, %v1118_v55  ;;  %v5525_v28 = vor.u32 %v6529_v16, %v5524_v20  ;;  %v5673_v55 = vor.u32 %v6562_v48, %v5670_v49  ;;  %v5404_v16 = vld [vmem:[%s8030_s24 + $0x70] sm:$0xf]  ;;  %v6532_v47 = vld [vmem:[%s8030_s24 + $0x194] sm:$0xf] }
 0x24c   : > { %v1135_v10 = vmul.f32 %v1131_v61, %v1126_v63  ;;  %v1136_v12 = vmul.f32 %v1132_v62, %v1127_v0  ;;  %v5645_v63 = vor.u32 %v6559_v57, %v5644_v56  ;;  %v5428_v0 = vld [vmem:[%s8030_s24 + $0xa0] sm:$0xf]  ;;  %v5550_v48 = vld [vmem:[%s8030_s24 + $0x1a8] sm:$0xf0] }
 0x24d   : > { %v1120_v59 = vsub.f32 1.5, %v1119_v58  ;;  %v6508_v58 = vld [vmem:[%s8030_s24 + $0xd4] sm:$0xf] }
 0x24e   : > { %v1144_v21 = vadd.f32 %v1140_v3, %v1135_v10  ;;  %v1145_v22 = vadd.f32 %v1141_v6, %v1136_v12  ;;  %v6553_v10 = vld [vmem:[%s8030_s24 + $0x234] sm:$0xf0]  ;;  %v6502_v12 = vld [vmem:[%s8030_s24 + $0xa4] sm:$0xf] }
 0x24f   : > { %v1121_v1 = vmul.f32 %v6895_v52, %v1120_v59  ;;  %v5454_v59 = vld [vmem:[%s8030_s24 + $0xe8] sm:$0xf0] }
 0x251   : > { %v1125_v9 = vsel %vm1124_vm6, %v6895_v52, %v1121_v1  ;;  %v5452_v52 = vld [vmem:[%s8030_s24 + $0xd0] sm:$0xf]  ;;  %v6505_v1 = vld [vmem:[%s8030_s24 + $0xb4] sm:$0xf0] }
 0x252   : > { %v1128_v13 = vmul.f32 %v1125_v9, %v8158_v24  ;;  %v1129_v11 = vmul.f32 %v1125_v9, %v8161_v25  ;;  %v6574_v24 = vld [vmem:[%s8030_s24 + $0x2e4] sm:$0xf]  ;;  %v5718_v25 = vld [vmem:[%s8030_s24 + $0x2f8] sm:$0xf0]  ;;  %v5620_v9 = vld [vmem:[%s8030_s24 + $0x220] sm:$0xf] }
 0x253   : > { %v5721_v32 = vor.u32 %v6574_v24, %v5718_v25  ;;  %v5621_v20 = vor.u32 %v6553_v10, %v5620_v9  ;;  %v5598_v24 = vld [vmem:[%s8030_s24 + $0x208] sm:$0xf0]  ;;  %v5405_v25 = vor.u32 %v6499_v17, %v5404_v16 }
 0x254   : > { %v1137_v14 = vmul.f32 %v1131_v61, %v1128_v13  ;;  %v1138_v15 = vmul.f32 %v1132_v62, %v1129_v11  ;;  %v5646_v61 = vld [vmem:[%s8030_s24 + $0x268] sm:$0xf0]  ;;  %v5453_v62 = vor.u32 %v6511_v53, %v5452_v52  ;;  %v5430_v13 = vld [vmem:[%s8030_s24 + $0xb8] sm:$0xf0]  ;;  %v6550_v11 = vld [vmem:[%s8030_s24 + $0x224] sm:$0xf]  ;;  %v5553_v52 = vor.u32 %v6532_v47, %v5550_v48 }
 0x255   : > { %v5433_v18 = vor.u32 %v6502_v12, %v5430_v13  ;;  %v8346_v53 = vld [vmem:[%s8038_s30] sm:$0x3f] }
 0x256   : > { %v1146_v4 = vadd.f32 %v1140_v3, %v1137_v14  ;;  %v1147_v23 = vadd.f32 %v1141_v6, %v1138_v15  ;;  %v5457_v3 = vor.u32 %v6508_v58, %v5454_v59  ;;  %v5649_v6 = vor.u32 %v6556_v60, %v5646_v61  ;;  %v5622_v14 = vld [vmem:[%s8030_s24 + $0x238] sm:$0xf0] }
 0x257   : > { %v5429_v15 = vor.u32 %v6505_v1, %v5428_v0  ;;  %v5625_v19 = vor.u32 %v6550_v11, %v5622_v14  ;;  %v1248_v56 = vperm.slane %v8346_v53, 0  ;;  %v1249_v57 = vperm.slane %v8346_v53, 1 }
 0x258   : > { %v8273_v26 = vpack.c.bf16 %v1146_v4, %v1144_v21  ;;  %v8275_v27 = vpack.c.bf16 %v1147_v23, %v1145_v22  ;;  %v5596_v21 = vld [vmem:[%s8030_s24 + $0x1f0] sm:$0xf]  ;;  %v6547_v22 = vld [vmem:[%s8030_s24 + $0x204] sm:$0xf0]  ;;  %v6496_v4 = vld [vmem:[%s8030_s24 + $0x74] sm:$0xf] }
 0x259   : > { %v5406_v23 = vld [vmem:[%s8030_s24 + $0x88] sm:$0xf0]  ;;  %v1251_v17 = vperm.slane %v8346_v53, 3 }
 0x25a   : > { %1748 = vmatmul.bf16.vlgmr.msra.gmra.mxu0 %v8273_v26  ;;  %1762 = vmatmul.bf16.vlgmr.msra.gmra.mxu1 %v8275_v27  ;;  %v5409_v31 = vor.u32 %v6496_v4, %v5406_v23 }
 0x25b   : > { %1776 = vmatmul.bf16.vlgmr.msra.gmra.mxu2 %v8273_v26  ;;  %1790 = vmatmul.bf16.vlgmr.msra.gmra.mxu3 %v8275_v27 }
 0x25c   : > { %1852 = vmatpush.bf16.msra.mxu0 %v5525_v28  ;;  %1866 = vmatpush.bf16.msra.mxu1 %v5717_v29  ;;  %v5597_v28 = vor.u32 %v6547_v22, %v5596_v21  ;;  %v5380_v29 = vld [vmem:[%s8030_s24 + $0x40] sm:$0xf] }
 0x25d   : > { %1880 = vmatpush.bf16.msra.mxu2 %v5529_v7  ;;  %1894 = vmatpush.bf16.msra.mxu3 %v5721_v32  ;;  %v5601_v7 = vor.u32 %v6544_v5, %v5598_v24  ;;  %v5572_v32 = vld [vmem:[%s8030_s24 + $0x1c0] sm:$0xf]  ;;  %v5381_v37 = vor.u32 %v6493_v30, %v5380_v29 }
 0x260   : > { %1853 = vmatpush.bf16.msra.mxu0 %v5501_v38  ;;  %1867 = vmatpush.bf16.msra.mxu1 %v5693_v39  ;;  %v5573_v38 = vor.u32 %v6541_v33, %v5572_v32  ;;  %v5356_v39 = vld [vmem:[%s8030_s24 + $0x10] sm:$0xf] }
 0x261   : > { %1881 = vmatpush.bf16.msra.mxu2 %v5505_v42  ;;  %1895 = vmatpush.bf16.msra.mxu3 %v5697_v43  ;;  %v5577_v42 = vor.u32 %v6538_v35, %v5574_v36  ;;  %v5548_v43 = vld [vmem:[%s8030_s24 + $0x190] sm:$0xf]  ;;  %v5357_v49 = vor.u32 %v6487_v40, %v5356_v39  ;;  %v1253_v40 = vperm.slane %v8346_v53, 5 }
 0x264   : > { %1854 = vmatpush.bf16.msra.mxu0 %v5477_v50  ;;  %1868 = vmatpush.bf16.msra.mxu1 %v5669_v51  ;;  %v5549_v50 = vor.u32 %v6535_v44, %v5548_v43  ;;  %v5361_v51 = vor.u32 %v6484_v45, %v5358_v46 }
 0x265   : > { %1882 = vmatpush.bf16.msra.mxu2 %v5481_v54  ;;  %1896 = vmatpush.bf16.msra.mxu3 %v5673_v55 }
 0x268   : > { %1855 = vmatpush.bf16.msra.mxu0 %v5453_v62  ;;  %1869 = vmatpush.bf16.msra.mxu1 %v5645_v63 }
 0x269   : > { %1883 = vmatpush.bf16.msra.mxu2 %v5457_v3  ;;  %1897 = vmatpush.bf16.msra.mxu3 %v5649_v6 }
 0x26a   : > { %1804 = vmatmul.bf16.vlgmr.msrb.gmra.mxu0 %v8273_v26  ;;  %1818 = vmatmul.bf16.vlgmr.msrb.gmra.mxu1 %v8275_v27 }
 0x26b   : > { %1832 = vmatmul.bf16.vlgmr.msrb.gmra.mxu2 %v8273_v26  ;;  %1846 = vmatmul.bf16.vlgmr.msrb.gmra.mxu3 %v8275_v27 }
 0x26c   : > { %1856 = vmatpush.bf16.msra.mxu0 %v5429_v15  ;;  %1870 = vmatpush.bf16.msra.mxu1 %v5621_v20  ;;  %v1250_v15 = vperm.slane %v8346_v53, 2 }
 0x26d   : > { %1884 = vmatpush.bf16.msra.mxu2 %v5433_v18  ;;  %1898 = vmatpush.bf16.msra.mxu3 %v5625_v19 }
 0x270   : > { %1857 = vmatpush.bf16.msra.mxu0 %v5405_v25  ;;  %1871 = vmatpush.bf16.msra.mxu1 %v5597_v28 }
 0x271   : > { %1885 = vmatpush.bf16.msra.mxu2 %v5409_v31  ;;  %1899 = vmatpush.bf16.msra.mxu3 %v5601_v7 }
 0x274   : > { %1858 = vmatpush.bf16.msra.mxu0 %v5381_v37  ;;  %1872 = vmatpush.bf16.msra.mxu1 %v5573_v38  ;;  %v1252_v38 = vperm.slane %v8346_v53, 4 }
 0x275   : > { %1886 = vmatpush.bf16.msra.mxu2 %v5385_v41  ;;  %1900 = vmatpush.bf16.msra.mxu3 %v5577_v42 }
 0x278   : > { %1859 = vmatpush.bf16.msra.mxu0 %v5357_v49  ;;  %1873 = vmatpush.bf16.msra.mxu1 %v5549_v50 }
 0x279   : > { %1887 = vmatpush.bf16.msra.mxu2 %v5361_v51  ;;  %1901 = vmatpush.bf16.msra.mxu3 %v5553_v52 }
 0x27b   : > { %1860 = vmatmul.bf16.vlgmr.msra.gmra.mxu0 %v8273_v26  ;;  %1874 = vmatmul.bf16.vlgmr.msra.gmra.mxu1 %v8275_v27 }
 0x27c   : > { %1888 = vmatmul.bf16.vlgmr.msra.gmra.mxu2 %v8273_v26  ;;  %1902 = vmatmul.bf16.vlgmr.msra.gmra.mxu3 %v8275_v27 }
 0x2d7   : > { %v1749_v54 = vpop.f32.mrf.mxu0  ;;  %v1763_v55 = vpop.f32.mrf.mxu1 }
 0x2d8   : > { %v1750_v58 = vadd.f32 %v1749_v54, %v1248_v56 }
 0x2da   : > { %v1764_v0 = vadd.f32 %v1763_v55, %v1750_v58 }
 0x2de   : > { %v1777_v59 = vpop.f32.mrf.mxu2  ;;  %v1791_v60 = vpop.f32.mrf.mxu3 }
 0x2df   : > { %v1778_v61 = vadd.f32 %v1777_v59, %v1249_v57  ;;  %v1751_v62 = vpop.f32.mrf.mxu0  ;;  %v1765_v63 = vpop.f32.mrf.mxu1 }
 0x2e0   : > { %v1752_v26 = vadd.f32 %v1751_v62, %v1248_v56 }
 0x2e1   : > { %v1792_v1 = vadd.f32 %v1791_v60, %v1778_v61 }
 0x2e2   : > { %v1766_v11 = vadd.f32 %v1765_v63, %v1752_v26 }
 0x2e3   : > { %v8350_v3 = vpack.c.bf16 %v1792_v1, %v1764_v0 }
 0x2e5   : > { %v2079_v27 = vunpack.c.l.b16 %v8350_v3 }
 0x2e6   : > { %v1779_v6 = vpop.f32.mrf.mxu2  ;;  %v1793_v9 = vpop.f32.mrf.mxu3 }
 0x2e7   : > { %v1780_v10 = vadd.f32 %v1779_v6, %v1249_v57  ;;  %v1805_v12 = vpop.f32.mrf.mxu0  ;;  %v8353_v13 = vpack.c.b16 %v2079_v27, %v2079_v27  ;;  %v1819_v20 = vpop.f32.mrf.mxu1 }
 0x2e8   : > { %v1806_v18 = vadd.f32 %v1805_v12, %v1250_v15 }
 0x2e9   : > { %v1794_v14 = vadd.f32 %v1793_v9, %v1780_v10  ;;  %2081 = vrot.lane.b32.xlu0 %v8353_v13, %s7591_s1 }
 0x2ea   : > { %v1820_v24 = vadd.f32 %v1819_v20, %v1806_v18 }
 0x2eb   : > { %v8358_v16 = vpack.c.bf16 %v1794_v14, %v1766_v11 }
 0x2ed   : > { %v2108_v19 = vunpack.c.l.b16 %v8358_v16 }
 0x2ee   : > { %v1833_v21 = vpop.f32.mrf.mxu2  ;;  %v1847_v22 = vpop.f32.mrf.mxu3 }
 0x2ef   : > { %v1834_v4 = vadd.f32 %v1833_v21, %v1251_v17  ;;  %v1807_v23 = vpop.f32.mrf.mxu0  ;;  %v8362_v5 = vpack.c.b16 %v2108_v19, %v2108_v19  ;;  %v1821_v29 = vpop.f32.mrf.mxu1 }
 0x2f0   : > { %v1808_v30 = vadd.f32 %v1807_v23, %v1250_v15 }
 0x2f1   : > { %v1848_v25 = vadd.f32 %v1847_v22, %v1834_v4  ;;  %2110 = vrot.lane.b32.xlu1 %v8362_v5, %s7591_s1 }
 0x2f2   : > { %v1822_v35 = vadd.f32 %v1821_v29, %v1808_v30 }
 0x2f3   : > { %v8366_v28 = vpack.c.bf16 %v1848_v25, %v1820_v24 }
 0x2f5   : > { %v1951_v31 = vsel %vm1946_vm7, %v8366_v28, 0  ;;  %v2084_v7 = vunpack.c.l.b16 %v8366_v28 }
 0x2f6   : > { %v1835_v32 = vpop.f32.mrf.mxu2  ;;  %v1849_v33 = vpop.f32.mrf.mxu3  ;;  %1960 = vmatpush.bf16.xpose.msrb.mxu0 %v1951_v31 }
 0x2f7   : > { %v1836_v8 = vadd.f32 %v1835_v32, %v1251_v17  ;;  %v8371_v34 = vpack.c.b16 %v2084_v7, %v2084_v7 }
 0x2f8   : > { %v1861_v37 = vpop.f32.mrf.mxu0  ;;  %v1875_v44 = vpop.f32.mrf.mxu1 }
 0x2f9   : > { %v1850_v36 = vadd.f32 %v1849_v33, %v1836_v8  ;;  %2086 = vrot.lane.b32.xlu2 %v8371_v34, %s7591_s1  ;;  %v1862_v43 = vadd.f32 %v1861_v37, %v1252_v38 }
 0x2fb   : > { %v8376_v39 = vpack.c.bf16 %v1850_v36, %v1822_v35  ;;  %v1876_v49 = vadd.f32 %v1875_v44, %v1862_v43 }
 0x2fd   : > { %5722 = vmatmul.msk.bf16.vlgmr.msrb.gmra.mxu0 %vm1946_vm7, %v8350_v3  ;;  %v1970_v41 = vsel %vm1946_vm7, %v8376_v39, 0  ;;  %v2113_v42 = vunpack.c.l.b16 %v8376_v39 }
 0x2fe   : > { %1979 = vmatpush.bf16.xpose.msrb.mxu1 %v1970_v41 }
 0x2ff   : > { %v1889_v45 = vpop.f32.mrf.mxu2  ;;  %v1903_v46 = vpop.f32.mrf.mxu3  ;;  %v8384_v47 = vpack.c.b16 %v2113_v42, %v2113_v42 }
 0x300   : > { %v1890_v48 = vadd.f32 %v1889_v45, %v1253_v40  ;;  %v1863_v51 = vpop.f32.mrf.mxu0  ;;  %v1877_v57 = vpop.f32.mrf.mxu1 }
 0x301   : > { %2115 = vrot.lane.b32.xlu2 %v8384_v47, %s7591_s1  ;;  %v1864_v53 = vadd.f32 %v1863_v51, %v1252_v38 }
 0x302   : > { %v1904_v50 = vadd.f32 %v1903_v46, %v1890_v48 }
 0x303   : > { %v1878_v59 = vadd.f32 %v1877_v57, %v1864_v53 }
 0x304   : > { %v8388_v52 = vpack.c.bf16 %v1904_v50, %v1876_v49 }
 0x305   : > { %5723 = vmatmul.msk.bf16.vlgmr.msrb.gmra.mxu1 %vm1946_vm7, %v8358_v16 }
 0x306   : > { %v2043_v54 = vsel %vm2041_vm8, %v8388_v52, 0  ;;  %v2189_v29 = vunpack.c.l.b16 %v8388_v52 }
 0x307   : > { %v1891_v55 = vpop.f32.mrf.mxu2  ;;  %2052 = vmatpush.bf16.msrb.mxu2 %v2043_v54  ;;  %v1905_v58 = vpop.f32.mrf.mxu3 }
 0x308   : > { %v1892_v56 = vadd.f32 %v1891_v55, %v1253_v40  ;;  %v8407_v32 = vpack.c.b16 %v2189_v29, %v2189_v29  ;;  %v6585_v29 = vld [vmem:[%s8041_s18 + $0x34] sm:$0xf0] }
 0x30a   : > { %v1906_v60 = vadd.f32 %v1905_v58, %v1892_v56 }
 0x30c   : > { %v8394_v61 = vpack.c.bf16 %v1906_v60, %v1878_v59 }
 0x30e   : > { %v2062_v62 = vsel %vm2041_vm8, %v8394_v61, 0  ;;  %v2213_v55 = vunpack.c.l.b16 %v8394_v61 }
 0x30f   : > { %2071 = vmatpush.bf16.msrb.mxu3 %v2062_v62 }
 0x310   : > { %v8425_v56 = vpack.c.b16 %v2213_v55, %v2213_v55 }
 0x353   : > { %v2087_v63 = vpop.permute.xlu2 %2086 }
 0x354   : > { %v2092_v0 = vsel %vm1946_vm7, %v2087_v63, 0 }
 0x355   : > { %2101 = vmatpush.bf16.xpose.msra.mxu0 %v2092_v0 }
 0x35b   : > { %v2116_v1 = vpop.permute.xlu2 %2115  ;;  %v2082_v26 = vpop.permute.xlu0 %2081 }
 0x35c   : > { %v2121_v27 = vsel %vm1946_vm7, %v2116_v1, 0  ;;  %5726 = vmatmul.msk.bf16.vlgmr.msra.gmra.mxu0 %vm1946_vm7, %v2082_v26 }
 0x35d   : > { %2130 = vmatpush.bf16.xpose.msra.mxu1 %v2121_v27 }
 0x363   : > { %v2111_v6 = vpop.permute.xlu1 %2110 }
 0x364   : > { %5727 = vmatmul.msk.bf16.vlgmr.msra.gmra.mxu1 %vm1946_vm7, %v2111_v6 }
 0x37a   : > { %v1962_v9 = vpop.f32.mrf.mxu0 }
 0x37b   : > { %v1985_v10 = vmul.f32 0.17677669, %v1962_v9 }
 0x37d   : > { %v1988_v12 = vsel %vm1987_vm9, %v1985_v10, -inf }
 0x37e   : > { %1989 = vmax.xlane.f32.xlu2 %v1988_v12 }
 0x382   : > { %v1964_v11 = vpop.f32.mrf.mxu0  ;;  %v1981_v14 = vpop.f32.mrf.mxu1 }
 0x383   : > { %v1986_v15 = vmul.f32 0.17677669, %v1981_v14 }
 0x385   : > { %v1991_v20 = vsel %vm1987_vm9, %v1986_v15, -inf }
 0x386   : > { %1992 = vmax.xlane.f32.xlu0 %v1991_v20 }
 0x38a   : > { %v1983_v17 = vpop.f32.mrf.mxu1 }
 0x3d9   : > { %v2103_v18 = vpop.f32.mrf.mxu0 }
 0x3da   : > { %v2136_v19 = vmul.f32 0.17677669, %v2103_v18 }
 0x3dc   : > { %v2138_v21 = vsel %vm1987_vm9, %v2136_v19, -inf }
 0x3dd   : > { %2139 = vmax.xlane.f32.xlu1 %v2138_v21 }
 0x3e1   : > { %v2105_v22 = vpop.f32.mrf.mxu0  ;;  %v2132_v4 = vpop.f32.mrf.mxu1 }
 0x3e2   : > { %v2137_v23 = vmul.f32 0.17677669, %v2132_v4 }
 0x3e4   : > { %v2141_v24 = vsel %vm1987_vm9, %v2137_v23, -inf }
 0x3e5   : > { %2142 = vmax.xlane.f32.xlu2 %v2141_v24 }
 0x3e9   : > { %v2134_v25 = vpop.f32.mrf.mxu1 }
 0x3ea   : > { %v5740_v25 = vld [vmem:[%s8041_s18 + $0x30] sm:$0xf] }
 0x3f1   : > { %v1990_v30 = vpop.xlane.xlu2 %1989 }
 0x3f2   : > { %v1994_v31 = vsub.f32 %v1985_v10, %v1990_v30  ;;  %v5741_v30 = vor.u32 %v6585_v29, %v5740_v25 }
 0x3f4   : > { %v1996_v7 = vmul.f32 1.442695, %v1994_v31  ;;  %2266 = vmatpush.bf16.msrb.mxu0 %v5741_v30  ;;  %v5732_v31 = vld [vmem:[%s8041_s18 + $0x20] sm:$0xf] }
 0x3f6   : > { %6896 = vpow2.f32 %v1996_v7  ;;  %2191 = vrot.lane.b32.xlu1 %v8407_v32, %s7591_s1  ;;  %v6583_v7 = vld [vmem:[%s8041_s18 + $0x24] sm:$0xf0] }
 0x3f9   : > { %v1993_v33 = vpop.xlane.xlu0 %1992 }
 0x3fa   : > { %v1995_v8 = vsub.f32 %v1986_v15, %v1993_v33  ;;  %v5733_v33 = vor.u32 %v6583_v7, %v5732_v31 }
 0x3fc   : > { %v6897_v35 = vpop.eup %6896  ;;  %v1998_v36 = vmul.f32 1.442695, %v1995_v8  ;;  %2267 = vmatpush.bf16.msrb.mxu0 %v5733_v33  ;;  %v6584_v8 = vld [vmem:[%s8041_s18 + $0x34] sm:$0xf]  ;;  %v5750_v33 = vld [vmem:[%s8041_s18] sm:$0xf] }
 0x3fd   : > { %v2000_v37 = vsel %vm1987_vm9, %v6897_v35, 0.0 }
 0x3fe   : > { %6898 = vpow2.f32 %v1998_v36  ;;  %2001 = vadd.xlane.f32.xlu2 %v2000_v37  ;;  %2339 = vrot.lane.b32.xlu1 %v8353_v13, %s7592_s27  ;;  %v6582_v37 = vld [vmem:[%s8041_s18 + $0x24] sm:$0xf] }
 0x404   : > { %v6899_v38 = vpop.eup %6898 }
 0x405   : > { %v2003_v40 = vsel %vm1987_vm9, %v6899_v38, 0.0 }
 0x406   : > { %2004 = vadd.xlane.f32.xlu2 %v2003_v40 }
 0x450   : > { %v2140_v41 = vpop.xlane.xlu1 %2139 }
 0x451   : > { %v2144_v42 = vsub.f32 %v2136_v19, %v2140_v41 }
 0x453   : > { %v2146_v43 = vmul.f32 1.442695, %v2144_v42 }
 0x455   : > { %6900 = vpow2.f32 %v2146_v43 }
 0x458   : > { %v2143_v44 = vpop.xlane.xlu2 %2142 }
 0x459   : > { %v2145_v45 = vsub.f32 %v2137_v23, %v2143_v44 }
 0x45b   : > { %v8415_v46 = vpop.eup %6900  ;;  %v2148_v48 = vmul.f32 1.442695, %v2145_v45 }
 0x45c   : > { %v2150_v49 = vsel %vm1987_vm9, %v8415_v46, 0.0 }
 0x45d   : > { %6902 = vpow2.f32 %v2148_v48  ;;  %2151 = vadd.xlane.f32.xlu0 %v2150_v49 }
 0x463   : > { %v8419_v50 = vpop.eup %6902 }
 0x464   : > { %v2153_v51 = vsel %vm1987_vm9, %v8419_v50, 0.0 }
 0x465   : > { %2154 = vadd.xlane.f32.xlu2 %v2153_v51 }
 0x468   : > { %v2192_v53 = vpop.permute.xlu1 %2191 }
 0x469   : > { %v2197_v54 = vsel %vm2041_vm8, %v2192_v53, 0 }
 0x46a   : > { %2206 = vmatpush.bf16.msra.mxu2 %v2197_v54 }
 0x471   : > { %v2002_v57 = vpop.xlane.xlu2 %2001  ;;  %2215 = vrot.lane.b32.xlu0 %v8425_v56, %s7591_s1 }
 0x472   : > { %6904 = vrcp.f32 %v2002_v57  ;;  %v2017_v63 = vand.u32 2147483648, %v2002_v57  ;;  %v2015_v1 = vand.u32 2147483647, %v2002_v57  ;;  %vm2011_vm11 = vweird.f32 %v2002_v57 }
 0x474   : > { %v2018_v6 = vor.u32 1.1754944e-38, %v2017_v63  ;;  %vm2016_vm13 = vcmp.eq.f32.partialorder %v2015_v1, 8.507059e+37 }
 0x478   : > { %v6905_v58 = vpop.eup %6904 }
 0x479   : > { %v2007_v59 = vmul.f32 %v6905_v58, %v2002_v57  ;;  %v2005_v60 = vpop.xlane.xlu2 %2004  ;;  %2364 = vrot.lane.b32.xlu0 %v8384_v47, %s7592_s27  ;;  %vm2012_vm10 = vweird.f32 %v6905_v58  ;;  %v6580_v57 = vld [vmem:[%s8041_s18 + $0x14] sm:$0xf] }
 0x47a   : > { %6906 = vrcp.f32 %v2005_v60  ;;  %vm2013_vm12 = vmor %vm2011_vm11, %vm2012_vm10  ;;  %v2032_v15 = vand.u32 2147483648, %v2005_v60  ;;  %v2030_v17 = vand.u32 2147483647, %v2005_v60  ;;  %vm2026_vm15 = vweird.f32 %v2005_v60 }
 0x47b   : > { %v2008_v62 = vsub.f32 1.0, %v2007_v59 }
 0x47c   : > { %v2033_v21 = vor.u32 1.1754944e-38, %v2032_v15  ;;  %vm2031_vm1 = vcmp.eq.f32.partialorder %v2030_v17, 8.507059e+37 }
 0x47d   : > { %v2009_v0 = vmul.f32 %v6905_v58, %v2008_v62  ;;  %2341 = vrot.lane.b32.xlu2 %v8371_v34, %s7592_s27 }
 0x47f   : > { %v2010_v26 = vadd.f32 %v6905_v58, %v2009_v0 }
 0x480   : > { %v6907_v27 = vpop.eup %6906 }
 0x481   : > { %v2014_v9 = vsel %vm2013_vm12, %v6905_v58, %v2010_v26  ;;  %v2022_v10 = vmul.f32 %v6907_v27, %v2005_v60  ;;  %vm2027_vm14 = vweird.f32 %v6907_v27  ;;  %v5760_v58 = vld [vmem:[%s8041_s18 + $0x18] sm:$0xf0] }
 0x482   : > { %v2019_v12 = vsel %vm2016_vm13, %v2018_v6, %v2014_v9  ;;  %vm2028_vm0 = vmor %vm2026_vm15, %vm2027_vm14  ;;  %v6578_v6 = vld [vmem:[%s8041_s18 + $0x4] sm:$0xf] }
 0x483   : > { %v2020_v11 = vmul.f32 %v6897_v35, %v2019_v12  ;;  %v2023_v14 = vsub.f32 1.0, %v2022_v10  ;;  %v5742_v35 = vld [vmem:[%s8041_s18 + $0x38] sm:$0xf0] }
 0x484   : > { %v5745_v36 = vor.u32 %v6584_v8, %v5742_v35  ;;  %v6579_v8 = vld [vmem:[%s8041_s18 + $0x4] sm:$0xf0] }
 0x485   : > { %v2024_v20 = vmul.f32 %v6907_v27, %v2023_v14  ;;  %2362 = vrot.lane.b32.xlu2 %v8362_v5, %s7592_s27  ;;  %v2036_v18 = vpack.c.bf16 %v2020_v11, %v2020_v11  ;;  %v5752_v11 = vld [vmem:[%s8041_s18 + $0x8] sm:$0xf0] }
 0x486   : > { %2280 = vmatpush.bf16.msrb.mxu1 %v5745_v36  ;;  %v5751_v36 = vor.u32 %v6579_v8, %v5750_v33  ;;  %v5782_v33 = vld [vmem:[%s8041_s18 + $0x58] sm:$0xf0] }
 0x487   : > { %v2025_v19 = vadd.f32 %v6907_v27, %v2024_v20  ;;  %5724 = vmatmul.msk.bf16.vlgmr.msrb.gmra.mxu2 %vm1987_vm9, %v2036_v18 }
 0x489   : > { %v2029_v22 = vsel %vm2028_vm0, %v6907_v27, %v2025_v19  ;;  %v5763_v27 = vor.u32 %v6580_v57, %v5760_v58 }
 0x48a   : > { %v2034_v4 = vsel %vm2031_vm1, %v2033_v21, %v2029_v22 }
 0x48b   : > { %v2035_v23 = vmul.f32 %v6899_v38, %v2034_v4  ;;  %v5734_v38 = vld [vmem:[%s8041_s18 + $0x28] sm:$0xf0] }
 0x48c   : > { %v5737_v40 = vor.u32 %v6582_v37, %v5734_v38 }
 0x48d   : > { %2458 = vrot.lane.b32.xlu2 %v8425_v56, %s7592_s27  ;;  %v2037_v24 = vpack.c.bf16 %v2035_v23, %v2035_v23  ;;  %v5758_v23 = vld [vmem:[%s8041_s18 + $0x10] sm:$0xf] }
 0x48e   : > { %2281 = vmatpush.bf16.msrb.mxu1 %v5737_v40 }
 0x48f   : > { %5725 = vmatmul.msk.bf16.vlgmr.msrb.gmra.mxu3 %vm1987_vm9, %v2037_v24  ;;  %v6581_v24 = vld [vmem:[%s8041_s18 + $0x14] sm:$0xf0] }
 0x490   : > { %v5759_v29 = vor.u32 %v6581_v24, %v5758_v23 }
 0x492   : > { %2317 = vmatpush.bf16.msrb.mxu2 %v5759_v29  ;;  %v6589_v29 = vld [vmem:[%s8041_s18 + $0x54] sm:$0xf0] }
 0x496   : > { %2318 = vmatpush.bf16.msrb.mxu2 %v5751_v36 }
 0x4d0   : > { %v2152_v41 = vpop.xlane.xlu0 %2151 }
 0x4d1   : > { %6908 = vrcp.f32 %v2152_v41  ;;  %v2167_v48 = vand.u32 2147483648, %v2152_v41  ;;  %v2165_v51 = vand.u32 2147483647, %v2152_v41  ;;  %vm2161_vm3 = vweird.f32 %v2152_v41 }
 0x4d3   : > { %v2168_v55 = vor.u32 1.1754944e-38, %v2167_v48  ;;  %vm2166_vm5 = vcmp.eq.f32.partialorder %v2165_v51, 8.507059e+37 }
 0x4d7   : > { %v6909_v42 = vpop.eup %6908 }
 0x4d8   : > { %v2157_v43 = vmul.f32 %v6909_v42, %v2152_v41  ;;  %v2155_v44 = vpop.xlane.xlu2 %2154  ;;  %vm2162_vm2 = vweird.f32 %v6909_v42 }
 0x4d9   : > { %6910 = vrcp.f32 %v2155_v44  ;;  %vm2163_vm4 = vmor %vm2161_vm3, %vm2162_vm2  ;;  %v2180_v9 = vand.u32 2147483647, %v2155_v44  ;;  %v2182_v10 = vand.u32 2147483648, %v2155_v44  ;;  %vm2176_vm10 = vweird.f32 %v2155_v44 }
 0x4da   : > { %v2158_v45 = vsub.f32 1.0, %v2157_v43 }
 0x4db   : > { %v2183_v18 = vor.u32 1.1754944e-38, %v2182_v10  ;;  %vm2181_vm12 = vcmp.eq.f32.partialorder %v2180_v9, 8.507059e+37 }
 0x4dc   : > { %v2159_v49 = vmul.f32 %v6909_v42, %v2158_v45 }
 0x4de   : > { %v2160_v53 = vadd.f32 %v6909_v42, %v2159_v49  ;;  %v2340_v49 = vpop.permute.xlu1 %2339 }
 0x4df   : > { %v6911_v54 = vpop.eup %6910 }
 0x4e0   : > { %v2164_v59 = vsel %vm2163_vm4, %v6909_v42, %v2160_v53  ;;  %v2172_v60 = vmul.f32 %v6911_v54, %v2155_v44  ;;  %v2342_v62 = vpop.permute.xlu2 %2341  ;;  %vm2177_vm6 = vweird.f32 %v6911_v54 }
 0x4e1   : > { %v2169_v63 = vsel %vm2166_vm5, %v2168_v55, %v2164_v59  ;;  %v2347_v0 = vsel %vm1946_vm7, %v2342_v62, 0  ;;  %vm2178_vm11 = vmor %vm2176_vm10, %vm2177_vm6 }
 0x4e2   : > { %v2170_v1 = vmul.f32 %v8415_v46, %v2169_v63  ;;  %v2173_v26 = vsub.f32 1.0, %v2172_v60  ;;  %2356 = vmatpush.bf16.xpose.msra.mxu0 %v2347_v0  ;;  %v5755_v46 = vor.u32 %v6578_v6, %v5752_v11 }
 0x4e3   : > { %v2216_v12 = vpop.permute.xlu0 %2215 }
 0x4e4   : > { %v2174_v14 = vmul.f32 %v6911_v54, %v2173_v26  ;;  %v2221_v15 = vsel %vm2041_vm8, %v2216_v12, 0  ;;  %v2186_v20 = vpack.c.bf16 %v2170_v1, %v2170_v1 }
 0x4e5   : > { %2230 = vmatpush.bf16.msra.mxu3 %v2221_v15 }
 0x4e6   : > { %v2175_v17 = vadd.f32 %v6911_v54, %v2174_v14  ;;  %5728 = vmatmul.msk.bf16.vlgmr.msra.gmra.mxu2 %vm1987_vm9, %v2186_v20 }
 0x4e8   : > { %v2179_v19 = vsel %vm2178_vm11, %v6911_v54, %v2175_v17  ;;  %v2363_v21 = vpop.permute.xlu2 %2362 }
 0x4e9   : > { %2331 = vmatpush.bf16.msrb.mxu3 %v5763_v27  ;;  %v2184_v22 = vsel %vm2181_vm12, %v2183_v18, %v2179_v19 }
 0x4ea   : > { %v2185_v4 = vmul.f32 %v8419_v50, %v2184_v22 }
 0x4eb   : > { %v2365_v25 = vpop.permute.xlu0 %2364 }
 0x4ec   : > { %v2370_v30 = vsel %vm1946_vm7, %v2365_v25, 0  ;;  %v2187_v31 = vpack.c.bf16 %v2185_v4, %v2185_v4  ;;  %v5780_v25 = vld [vmem:[%s8041_s18 + $0x50] sm:$0xf] }
 0x4ed   : > { %2332 = vmatpush.bf16.msrb.mxu3 %v5755_v46  ;;  %2379 = vmatpush.bf16.xpose.msra.mxu1 %v2370_v30  ;;  %v6588_v30 = vld [vmem:[%s8041_s18 + $0x54] sm:$0xf] }
 0x4ee   : > { %5729 = vmatmul.msk.bf16.vlgmr.msra.gmra.mxu3 %vm1987_vm9, %v2187_v31 }
 0x4f0   : > { %v2459_v7 = vpop.permute.xlu2 %2458 }
 0x4f1   : > { %v2464_v35 = vsel %vm2041_vm8, %v2459_v7, 0  ;;  %v5781_v7 = vor.u32 %v6589_v29, %v5780_v25 }
 0x4f2   : > { %2473 = vmatpush.bf16.msra.mxu3 %v2464_v35  ;;  %v5785_v35 = vor.u32 %v6588_v30, %v5782_v33 }
 0x50a   : > { %v2054_v50 = vpop.f32.mrf.mxu2 }
 0x512   : > { %v2056_v37 = vpop.f32.mrf.mxu2  ;;  %v2073_v38 = vpop.f32.mrf.mxu3 }
 0x513   : > { %v2077_v40 = vpack.c.bf16 %v2073_v38, %v2054_v50 }
 0x515   : > { %5764 = vmatmul.msk.bf16.vlgmr.msrb.gmra.mxu2 %vm1946_vm7, %v2077_v40  ;;  %5765 = vmatmul.msk.bf16.vlgmr.msrb.gmra.mxu3 %vm1946_vm7, %v2077_v40 }
 0x51a   : > { %v2075_v41 = vpop.f32.mrf.mxu3 }
 0x569   : > { %v2208_v42 = vpop.f32.mrf.mxu2 }
 0x571   : > { %v2210_v43 = vpop.f32.mrf.mxu2  ;;  %v2232_v44 = vpop.f32.mrf.mxu3 }
 0x572   : > { %v2236_v45 = vpack.c.bf16 %v2232_v44, %v2208_v42 }
 0x574   : > { %5746 = vmatmul.msk.bf16.vlgmr.msrb.gmra.mxu0 %vm1946_vm7, %v2236_v45  ;;  %5747 = vmatmul.msk.bf16.vlgmr.msrb.gmra.mxu1 %vm1946_vm7, %v2236_v45 }
 0x575   : > { %2509 = vmatpush.bf16.msrb.mxu0 %v5781_v7  ;;  %2523 = vmatpush.bf16.msrb.mxu1 %v5785_v35 }
 0x579   : > { %v2234_v48 = vpop.f32.mrf.mxu3 }
 0x57a   : > { %v6592_v48 = vld [vmem:[%s8041_s18 + $0x74] sm:$0xf] }
 0x584   : > { %5766 = vmatmul.msk.bf16.vlgmr.msra.gmra.mxu0 %vm1946_vm7, %v2340_v49  ;;  %5767 = vmatmul.msk.bf16.vlgmr.msra.gmra.mxu1 %vm1946_vm7, %v2363_v21  ;;  %v5804_v49 = vld [vmem:[%s8041_s18 + $0x78] sm:$0xf0] }
 0x598   : > { %v2334_v25 = vpop.f32.mrf.mxu3  ;;  %v2320_v29 = vpop.f32.mrf.mxu2 }
 0x5a0   : > { %v8518_v30 = vpop.f32.mrf.mxu3 }
 0x5f1   : > { %v8469_v51 = vpop.f32.mrf.mxu0  ;;  %v8471_v53 = vpop.f32.mrf.mxu1 }
 0x5f9   : > { %v8473_v54 = vpop.f32.mrf.mxu0  ;;  %v8475_v55 = vpop.f32.mrf.mxu1 }
 0x601   : > { %v2358_v57 = vpop.f32.mrf.mxu0  ;;  %v2381_v58 = vpop.f32.mrf.mxu1 }
 0x602   : > { %v2385_v59 = vmul.f32 0.17677669, %v2358_v57  ;;  %v2386_v60 = vmul.f32 0.17677669, %v2381_v58 }
 0x604   : > { %v2390_v62 = vsel %vm1987_vm9, %v2386_v60, -inf  ;;  %v2387_v63 = vsel %vm1987_vm9, %v2385_v59, -inf }
 0x605   : > { %2391 = vmax.xlane.f32.xlu1 %v2390_v62  ;;  %2388 = vmax.xlane.f32.xlu0 %v2387_v63 }
 0x609   : > { %v2360_v0 = vpop.f32.mrf.mxu0  ;;  %v2383_v1 = vpop.f32.mrf.mxu1 }
 0x60a   : > { %v5807_v1 = vor.u32 %v6592_v48, %v5804_v49 }
 0x619   : > { %2537 = vrot.lane.b32.xlu0 %v8371_v34, %s7593_s12 }
 0x61e   : > { %2437 = vrot.lane.b32.xlu1 %v8407_v32, %s7592_s27 }
 0x626   : > { %2560 = vrot.lane.b32.xlu1 %v8384_v47, %s7593_s12 }
 0x678   : > { %v2392_v26 = vpop.xlane.xlu1 %2391  ;;  %v2389_v27 = vpop.xlane.xlu0 %2388 }
 0x679   : > { %v2394_v6 = vsub.f32 %v2386_v60, %v2392_v26  ;;  %v2393_v9 = vsub.f32 %v2385_v59, %v2389_v27  ;;  %v5802_v59 = vld [vmem:[%s8041_s18 + $0x70] sm:$0xf]  ;;  %v6593_v60 = vld [vmem:[%s8041_s18 + $0x74] sm:$0xf0] }
 0x67a   : > { %v5803_v27 = vor.u32 %v6593_v60, %v5802_v59 }
 0x67b   : > { %v2397_v10 = vmul.f32 1.442695, %v2394_v6  ;;  %v2395_v12 = vmul.f32 1.442695, %v2393_v9  ;;  %v6590_v6 = vld [vmem:[%s8041_s18 + $0x64] sm:$0xf] }
 0x67c   : > { %v5796_v9 = vld [vmem:[%s8041_s18 + $0x68] sm:$0xf0] }
 0x67d   : > { %6912 = vpow2.f32 %v2397_v10 }
 0x67e   : > { %6914 = vpow2.f32 %v2395_v12  ;;  %v5794_v12 = vld [vmem:[%s8041_s18 + $0x60] sm:$0xf] }
 0x683   : > { %v6913_v11 = vpop.eup %6912 }
 0x684   : > { %v6915_v14 = vpop.eup %6914  ;;  %v2402_v15 = vsel %vm1987_vm9, %v6913_v11, 0.0 }
 0x685   : > { %2403 = vadd.xlane.f32.xlu0 %v2402_v15  ;;  %v2399_v34 = vsel %vm1987_vm9, %v6915_v14, 0.0  ;;  %v6591_v15 = vld [vmem:[%s8041_s18 + $0x64] sm:$0xf0] }
 0x686   : > { %2400 = vadd.xlane.f32.xlu2 %v2399_v34  ;;  %v5799_v34 = vor.u32 %v6590_v6, %v5796_v9 }
 0x68b   : > { %v2538_v20 = vpop.permute.xlu0 %2537 }
 0x68c   : > { %v2543_v46 = vsel %vm1946_vm7, %v2538_v20, 0  ;;  %v2825_v20 = vrot.slane %v8388_v52, 4 }
 0x690   : > { %v2438_v17 = vpop.permute.xlu1 %2437 }
 0x691   : > { %v2443_v47 = vsel %vm2041_vm8, %v2438_v17, 0 }
 0x692   : > { %2452 = vmatpush.bf16.msra.mxu2 %v2443_v47 }
 0x696   : > { %2552 = vmatpush.bf16.xpose.msrb.mxu2 %v2543_v46 }
 0x698   : > { %v2561_v18 = vpop.permute.xlu1 %2560 }
 0x699   : > { %v2566_v19 = vsel %vm1946_vm7, %v2561_v18, 0  ;;  %2535 = vrot.lane.b32.xlu0 %v8353_v13, %s7593_s12  ;;  %v2830_v18 = vsel %vm2041_vm8, %v2825_v20, 0 }
 0x69a   : > { %2575 = vmatpush.bf16.xpose.msrb.mxu3 %v2566_v19  ;;  %v5772_v19 = vld [vmem:[%s8041_s18 + $0x40] sm:$0xf] }
 0x69e   : > { %2558 = vrot.lane.b32.xlu2 %v8362_v5, %s7593_s12 }
 0x6f8   : > { %v2404_v21 = vpop.xlane.xlu0 %2403 }
 0x6f9   : > { %v2401_v22 = vpop.xlane.xlu2 %2400  ;;  %6916 = vrcp.f32 %v2404_v21  ;;  %v2431_v36 = vand.u32 2147483648, %v2404_v21  ;;  %v2429_v37 = vand.u32 2147483647, %v2404_v21  ;;  %vm2425_vm15 = vweird.f32 %v2404_v21 }
 0x6fa   : > { %6918 = vrcp.f32 %v2401_v22  ;;  %v2416_v50 = vand.u32 2147483648, %v2401_v22  ;;  %v2414_v40 = vand.u32 2147483647, %v2401_v22  ;;  %vm2410_vm0 = vweird.f32 %v2401_v22 }
 0x6fb   : > { %v2432_v43 = vor.u32 1.1754944e-38, %v2431_v36  ;;  %vm2430_vm3 = vcmp.eq.f32.partialorder %v2429_v37, 8.507059e+37 }
 0x6fc   : > { %v2417_v44 = vor.u32 1.1754944e-38, %v2416_v50  ;;  %vm2415_vm4 = vcmp.eq.f32.partialorder %v2414_v40, 8.507059e+37 }
 0x6ff   : > { %v6917_v4 = vpop.eup %6916 }
 0x700   : > { %v6919_v23 = vpop.eup %6918  ;;  %v2421_v24 = vmul.f32 %v6917_v4, %v2404_v21  ;;  %vm2426_vm13 = vweird.f32 %v6917_v4  ;;  %v6587_v21 = vld [vmem:[%s8041_s18 + $0x44] sm:$0xf0] }
 0x701   : > { %v2406_v31 = vmul.f32 %v6919_v23, %v2401_v22  ;;  %vm2411_vm14 = vweird.f32 %v6919_v23  ;;  %vm2427_vm1 = vmor %vm2425_vm15, %vm2426_vm13  ;;  %v2559_v17 = vpop.permute.xlu2 %2558  ;;  %v6586_v22 = vld [vmem:[%s8041_s18 + $0x44] sm:$0xf] }
 0x702   : > { %v2422_v8 = vsub.f32 1.0, %v2421_v24  ;;  %vm2412_vm2 = vmor %vm2410_vm0, %vm2411_vm14 }
 0x703   : > { %v2407_v13 = vsub.f32 1.0, %v2406_v31  ;;  %v8520_v31 = vpop.f32.mrf.mxu2 }
 0x704   : > { %v2423_v5 = vmul.f32 %v6917_v4, %v2422_v8 }
 0x705   : > { %v2408_v38 = vmul.f32 %v6919_v23, %v2407_v13 }
 0x706   : > { %v2424_v41 = vadd.f32 %v6917_v4, %v2423_v5 }
 0x707   : > { %v2409_v42 = vadd.f32 %v6919_v23, %v2408_v38 }
 0x708   : > { %v2428_v45 = vsel %vm2427_vm1, %v6917_v4, %v2424_v41  ;;  %v5773_v4 = vor.u32 %v6587_v21, %v5772_v19 }
 0x709   : > { %v2413_v57 = vsel %vm2412_vm2, %v6919_v23, %v2409_v42  ;;  %v2433_v58 = vsel %vm2430_vm3, %v2432_v43, %v2428_v45  ;;  %v5774_v23 = vld [vmem:[%s8041_s18 + $0x48] sm:$0xf0]  ;;  %v2321_v43 = vadd.f32 %v2320_v29, %v8469_v51 }
 0x70a   : > { %v2418_v62 = vsel %vm2415_vm4, %v2417_v44, %v2413_v57  ;;  %v2434_v63 = vmul.f32 %v6913_v11, %v2433_v58  ;;  %v5795_v11 = vor.u32 %v6591_v15, %v5794_v12  ;;  %v5777_v24 = vor.u32 %v6586_v22, %v5774_v23  ;;  %2510 = vmatpush.bf16.msrb.mxu0 %v5773_v4 }
 0x70b   : > { %v2419_v0 = vmul.f32 %v6915_v14, %v2418_v62  ;;  %v2845_v14 = vrot.slane %v8394_v61, 4  ;;  %v2536_v47 = vpop.permute.xlu0 %2535  ;;  %v2335_v44 = vadd.f32 %v2334_v25, %v8471_v53 }
 0x70c   : > { %v2436_v26 = vpack.c.bf16 %v2434_v63, %v2434_v63  ;;  %2524 = vmatpush.bf16.msrb.mxu1 %v5777_v24 }
 0x70d   : > { %v2435_v10 = vpack.c.bf16 %v2419_v0, %v2419_v0  ;;  %v2850_v46 = vsel %vm2041_vm8, %v2845_v14, 0 }
 0x70e   : > { %5769 = vmatmul.msk.bf16.vlgmr.msra.gmra.mxu3 %vm1987_vm9, %v2436_v26  ;;  %v2732_v26 = vrot.slane %v8366_v28, 4 }
 0x70f   : > { %5768 = vmatmul.msk.bf16.vlgmr.msra.gmra.mxu2 %vm1987_vm9, %v2435_v10  ;;  %2719 = vmatpush.bf16.msra.mxu3 %v5807_v1 }
 0x710   : > { %2705 = vmatpush.bf16.msra.mxu2 %v5803_v27  ;;  %v2737_v9 = vsel %vm1946_vm7, %v2732_v26, 0 }
 0x713   : > { %2720 = vmatpush.bf16.msra.mxu3 %v5799_v34  ;;  %v2753_v34 = vrot.slane %v8376_v39, 4 }
 0x714   : > { %2706 = vmatpush.bf16.msra.mxu2 %v5795_v11 }
 0x715   : > { %v2758_v19 = vsel %vm1946_vm7, %v2753_v34, 0 }
 0x71e   : > { %5789 = vmatmul.msk.bf16.vlgmr.msrb.gmra.mxu3 %vm1946_vm7, %v2559_v17 }
 0x71f   : > { %5788 = vmatmul.msk.bf16.vlgmr.msrb.gmra.mxu2 %vm1946_vm7, %v2536_v47  ;;  %2859 = vmatpush.bf16.msrb.mxu3 %v2850_v46 }
 0x720   : > { %2839 = vmatpush.bf16.msrb.mxu2 %v2830_v18 }
 0x791   : > { %v2475_v7 = vpop.f32.mrf.mxu3 }
 0x792   : > { %v2454_v33 = vpop.f32.mrf.mxu2 }
 0x793   : > { %v2479_v8 = vpack.c.bf16 %v2475_v7, %v2454_v33 }
 0x795   : > { %5786 = vmatmul.msk.bf16.vlgmr.msrb.gmra.mxu0 %vm1946_vm7, %v2479_v8  ;;  %5787 = vmatmul.msk.bf16.vlgmr.msrb.gmra.mxu1 %vm1946_vm7, %v2479_v8 }
 0x799   : > { %v2477_v35 = vpop.f32.mrf.mxu3 }
 0x79a   : > { %v2456_v13 = vpop.f32.mrf.mxu2 }
 0x7a1   : > { %v2577_v36 = vpop.f32.mrf.mxu3 }
 0x7a2   : > { %v2554_v50 = vpop.f32.mrf.mxu2  ;;  %v2582_v5 = vmul.f32 0.17677669, %v2577_v36 }
 0x7a3   : > { %v2581_v37 = vmul.f32 0.17677669, %v2554_v50 }
 0x7a4   : > { %v2586_v38 = vsel %vm1987_vm9, %v2582_v5, -inf }
 0x7a5   : > { %2587 = vmax.xlane.f32.xlu0 %v2586_v38  ;;  %v2583_v40 = vsel %vm1987_vm9, %v2581_v37, -inf }
 0x7a6   : > { %2584 = vmax.xlane.f32.xlu1 %v2583_v40  ;;  %v2752_v40 = vrot.slane %v8358_v16, 4 }
 0x7a9   : > { %v2579_v41 = vpop.f32.mrf.mxu3 }
 0x7aa   : > { %v2556_v42 = vpop.f32.mrf.mxu2  ;;  %v2731_v41 = vrot.slane %v8350_v3, 4 }
 0x7b9   : > { %2633 = vrot.lane.b32.xlu0 %v8407_v32, %s7593_s12 }
 0x812   : > { %v2512_v45 = vpop.f32.mrf.mxu0  ;;  %v2526_v48 = vpop.f32.mrf.mxu1 }
 0x813   : > { %v8530_v49 = vadd.f32 %v2512_v45, %v2321_v43  ;;  %v8532_v57 = vadd.f32 %v2526_v48, %v2335_v44 }
 0x818   : > { %v2588_v58 = vpop.xlane.xlu0 %2587 }
 0x819   : > { %v2585_v59 = vpop.xlane.xlu1 %2584  ;;  %v2590_v60 = vsub.f32 %v2582_v5, %v2588_v58 }
 0x81a   : > { %v2589_v62 = vsub.f32 %v2581_v37, %v2585_v59  ;;  %v8556_v42 = vpop.f32.mrf.mxu1  ;;  %v8558_v43 = vpop.f32.mrf.mxu0 }
 0x81b   : > { %v2593_v63 = vmul.f32 1.442695, %v2590_v60 }
 0x81c   : > { %v2591_v0 = vmul.f32 1.442695, %v2589_v62 }
 0x81d   : > { %6920 = vpow2.f32 %v2593_v63 }
 0x81e   : > { %6922 = vpow2.f32 %v2591_v0 }
 0x823   : > { %v6921_v1 = vpop.eup %6920 }
 0x824   : > { %v6923_v32 = vpop.eup %6922  ;;  %v2598_v51 = vsel %vm1987_vm9, %v6921_v1, 0.0 }
 0x825   : > { %v2595_v53 = vsel %vm1987_vm9, %v6923_v32, 0.0  ;;  %2599 = vadd.xlane.f32.xlu1 %v2598_v51 }
 0x826   : > { %2596 = vadd.xlane.f32.xlu2 %v2595_v53 }
 0x82b   : > { %v2634_v27 = vpop.permute.xlu0 %2633 }
 0x82c   : > { %v2639_v6 = vsel %vm2041_vm8, %v2634_v27, 0 }
 0x82d   : > { %2648 = vmatpush.bf16.msra.mxu0 %v2639_v6 }
 0x831   : > { %2746 = vmatpush.bf16.xpose.msrb.mxu0 %v2737_v9 }
 0x83e   : > { %2654 = vrot.lane.b32.xlu2 %v8425_v56, %s7593_s12 }
 0x846   : > { %2924 = vrot.lane.b32.xlu2 %v8366_v28, %s7591_s1 }
 0x84e   : > { %2921 = vrot.lane.b32.xlu2 %v8350_v3, %s7591_s1 }
 0x856   : > { %2946 = vrot.lane.b32.xlu2 %v8358_v16, %s7591_s1 }
 0x898   : > { %v2600_v10 = vpop.xlane.xlu1 %2599 }
 0x899   : > { %v2597_v12 = vpop.xlane.xlu2 %2596  ;;  %6924 = vrcp.f32 %v2600_v10  ;;  %v2627_v18 = vand.u32 2147483648, %v2600_v10  ;;  %v2625_v4 = vand.u32 2147483647, %v2600_v10  ;;  %vm2621_vm10 = vweird.f32 %v2600_v10 }
 0x89a   : > { %6926 = vrcp.f32 %v2597_v12  ;;  %v2612_v21 = vand.u32 2147483648, %v2597_v12  ;;  %v2610_v24 = vand.u32 2147483647, %v2597_v12  ;;  %vm2606_vm11 = vweird.f32 %v2597_v12 }
 0x89b   : > { %v2628_v7 = vor.u32 1.1754944e-38, %v2627_v18  ;;  %vm2626_vm14 = vcmp.eq.f32.partialorder %v2625_v4, 8.507059e+37  ;;  %v5824_v18 = vld [vmem:[%s8041_s18 + $0x90] sm:$0xf]  ;;  %v6595_v4 = vld [vmem:[%s8041_s18 + $0x84] sm:$0xf0] }
 0x89c   : > { %v2613_v33 = vor.u32 1.1754944e-38, %v2612_v21  ;;  %vm2611_vm15 = vcmp.eq.f32.partialorder %v2610_v24, 8.507059e+37 }
 0x89f   : > { %v6925_v15 = vpop.eup %6924 }
 0x8a0   : > { %v6927_v11 = vpop.eup %6926  ;;  %v2617_v14 = vmul.f32 %v6925_v15, %v2600_v10  ;;  %vm2622_vm5 = vweird.f32 %v6925_v15 }
 0x8a1   : > { %v2602_v20 = vmul.f32 %v6927_v11, %v2597_v12  ;;  %v2655_v56 = vpop.permute.xlu2 %2654  ;;  %vm2607_vm6 = vweird.f32 %v6927_v11  ;;  %vm2623_vm12 = vmor %vm2621_vm10, %vm2622_vm5 }
 0x8a2   : > { %v2618_v17 = vsub.f32 1.0, %v2617_v14  ;;  %v2660_v47 = vsel %vm2041_vm8, %v2655_v56, 0  ;;  %vm2608_vm13 = vmor %vm2606_vm11, %vm2607_vm6 }
 0x8a3   : > { %v2603_v46 = vsub.f32 1.0, %v2602_v20  ;;  %2669 = vmatpush.bf16.msra.mxu1 %v2660_v47 }
 0x8a4   : > { %v2619_v22 = vmul.f32 %v6925_v15, %v2618_v17 }
 0x8a5   : > { %v2604_v23 = vmul.f32 %v6927_v11, %v2603_v46 }
 0x8a6   : > { %v2620_v25 = vadd.f32 %v6925_v15, %v2619_v22  ;;  %v5816_v22 = vld [vmem:[%s8041_s18 + $0x80] sm:$0xf] }
 0x8a7   : > { %2767 = vmatpush.bf16.xpose.msrb.mxu1 %v2758_v19  ;;  %v2605_v29 = vadd.f32 %v6927_v11, %v2604_v23  ;;  %v6597_v19 = vld [vmem:[%s8041_s18 + $0x94] sm:$0xf0]  ;;  %v5817_v23 = vor.u32 %v6595_v4, %v5816_v22 }
 0x8a8   : > { %v2624_v8 = vsel %vm2623_vm12, %v6925_v15, %v2620_v25  ;;  %v5825_v21 = vor.u32 %v6597_v19, %v5824_v18 }
 0x8a9   : > { %v2609_v35 = vsel %vm2608_vm13, %v6927_v11, %v2605_v29  ;;  %v2629_v13 = vsel %vm2626_vm14, %v2628_v7, %v2624_v8  ;;  %v2925_v44 = vpop.permute.xlu2 %2924 }
 0x8aa   : > { %v2614_v36 = vsel %vm2611_vm15, %v2613_v33, %v2609_v35  ;;  %v2630_v50 = vmul.f32 %v6921_v1, %v2629_v13  ;;  %v2926_v45 = vrot.slane %v2925_v44, 4 }
 0x8ab   : > { %v2615_v5 = vmul.f32 %v6923_v32, %v2614_v36 }
 0x8ac   : > { %v2632_v37 = vpack.c.bf16 %v2630_v50, %v2630_v50  ;;  %v2931_v60 = vsel %vm1946_vm7, %v2926_v45, 0 }
 0x8ad   : > { %v2631_v38 = vpack.c.bf16 %v2615_v5, %v2615_v5 }
 0x8ae   : > { %5791 = vmatmul.msk.bf16.vlgmr.msra.gmra.mxu1 %vm1987_vm9, %v2632_v37 }
 0x8af   : > { %5790 = vmatmul.msk.bf16.vlgmr.msra.gmra.mxu0 %vm1987_vm9, %v2631_v38 }
 0x8b0   : > { %2895 = vmatpush.bf16.msra.mxu0 %v5825_v21 }
 0x8b4   : > { %2896 = vmatpush.bf16.msra.mxu0 %v5817_v23 }
 0x8be   : > { %5811 = vmatmul.msk.bf16.vlgmr.msrb.gmra.mxu1 %vm1946_vm7, %v2752_v40 }
 0x8bf   : > { %5810 = vmatmul.msk.bf16.vlgmr.msrb.gmra.mxu0 %vm1946_vm7, %v2731_v41 }
 0x92b   : > { %v2671_v48 = vpop.f32.mrf.mxu1 }
 0x92c   : > { %v2650_v58 = vpop.f32.mrf.mxu0 }
 0x92d   : > { %v2675_v59 = vpack.c.bf16 %v2671_v48, %v2650_v58 }
 0x92f   : > { %5808 = vmatmul.msk.bf16.vlgmr.msra.gmra.mxu2 %vm1946_vm7, %v2675_v59  ;;  %5809 = vmatmul.msk.bf16.vlgmr.msra.gmra.mxu3 %vm1946_vm7, %v2675_v59 }
 0x930   : > { %2940 = vmatpush.bf16.xpose.msra.mxu2 %v2931_v60 }
 0x933   : > { %v2673_v62 = vpop.f32.mrf.mxu1 }
 0x934   : > { %v2652_v63 = vpop.f32.mrf.mxu0 }
 0x93b   : > { %v2769_v0 = vpop.f32.mrf.mxu1 }
 0x93c   : > { %v2748_v1 = vpop.f32.mrf.mxu0  ;;  %v2774_v53 = vmul.f32 0.17677669, %v2769_v0 }
 0x93d   : > { %v2773_v32 = vmul.f32 0.17677669, %v2748_v1 }
 0x93e   : > { %v2778_v6 = vsel %vm1987_vm9, %v2774_v53, -inf }
 0x93f   : > { %v2775_v51 = vsel %vm1987_vm9, %v2773_v32, -inf }
 0x940   : > { %2776 = vmax.xlane.f32.xlu1 %v2775_v51 }
 0x943   : > { %v2771_v26 = vpop.f32.mrf.mxu1 }
 0x944   : > { %v2750_v27 = vpop.f32.mrf.mxu0 }
 0x945   : > { %v2922_v27 = vpop.permute.xlu2 %2921 }
 0x948   : > { %2779 = vmax.xlane.f32.xlu1 %v2778_v6 }
 0x9b2   : > { %v2708_v9 = vpop.f32.mrf.mxu2  ;;  %v2722_v10 = vpop.f32.mrf.mxu3 }
 0x9b3   : > { %v8566_v12 = vadd.f32 %v2708_v9, %v8530_v49  ;;  %v8569_v15 = vadd.f32 %v2722_v10, %v8532_v57  ;;  %v2777_v34 = vpop.xlane.xlu1 %2776 }
 0x9b4   : > { %v2781_v11 = vsub.f32 %v2773_v32, %v2777_v34  ;;  %v2923_v34 = vrot.slane %v2922_v27, 4 }
 0x9b6   : > { %v2783_v14 = vmul.f32 1.442695, %v2781_v11  ;;  %v2947_v11 = vpop.permute.xlu2 %2946 }
 0x9b8   : > { %6928 = vpow2.f32 %v2783_v14  ;;  %v2948_v14 = vrot.slane %v2947_v11, 4 }
 0x9ba   : > { %v8597_v18 = vpop.f32.mrf.mxu3 }
 0x9bb   : > { %v2780_v20 = vpop.xlane.xlu1 %2779 }
 0x9bc   : > { %v2782_v56 = vsub.f32 %v2774_v53, %v2780_v20  ;;  %v6596_v20 = vld [vmem:[%s8041_s18 + $0x94] sm:$0xf] }
 0x9be   : > { %v6929_v17 = vpop.eup %6928  ;;  %v2785_v47 = vmul.f32 1.442695, %v2782_v56  ;;  %v5826_v56 = vld [vmem:[%s8041_s18 + $0x98] sm:$0xf0] }
 0x9bf   : > { %v2787_v46 = vsel %vm1987_vm9, %v6929_v17, 0.0 }
 0x9c0   : > { %6930 = vpow2.f32 %v2785_v47  ;;  %2788 = vadd.xlane.f32.xlu0 %v2787_v46  ;;  %v6594_v47 = vld [vmem:[%s8041_s18 + $0x84] sm:$0xf]  ;;  %v5818_v46 = vld [vmem:[%s8041_s18 + $0x88] sm:$0xf0] }
 0x9c6   : > { %v6931_v49 = vpop.eup %6930 }
 0x9c7   : > { %v2790_v57 = vsel %vm1987_vm9, %v6931_v49, 0.0 }
 0x9c8   : > { %2791 = vadd.xlane.f32.xlu1 %v2790_v57  ;;  %v8595_v57 = vpop.f32.mrf.mxu2 }
 0x9d4   : > { %3023 = vrot.lane.b32.xlu0 %v8388_v52, %s7591_s1 }
 0x9dc   : > { %3126 = vrot.lane.b32.xlu0 %v8366_v28, %s7592_s27 }
 0x9e1   : > { %2949 = vrot.lane.b32.xlu1 %v8376_v39, %s7591_s1 }
 0x9e4   : > { %3123 = vrot.lane.b32.xlu0 %v8350_v3, %s7592_s27 }
 0xa33   : > { %v2789_v24 = vpop.xlane.xlu0 %2788 }
 0xa34   : > { %6932 = vrcp.f32 %v2789_v24  ;;  %v2804_v8 = vand.u32 2147483648, %v2789_v24  ;;  %v2802_v13 = vand.u32 2147483647, %v2789_v24  ;;  %vm2798_vm1 = vweird.f32 %v2789_v24 }
 0xa36   : > { %v2805_v5 = vor.u32 1.1754944e-38, %v2804_v8  ;;  %vm2803_vm3 = vcmp.eq.f32.partialorder %v2802_v13, 8.507059e+37 }
 0xa3a   : > { %v6933_v25 = vpop.eup %6932 }
 0xa3b   : > { %v2794_v29 = vmul.f32 %v6933_v25, %v2789_v24  ;;  %v2792_v7 = vpop.xlane.xlu1 %2791  ;;  %vm2799_vm0 = vweird.f32 %v6933_v25 }
 0xa3c   : > { %6934 = vrcp.f32 %v2792_v7  ;;  %vm2800_vm2 = vmor %vm2798_vm1, %vm2799_vm0  ;;  %v2817_v45 = vand.u32 2147483647, %v2792_v7  ;;  %v2819_v48 = vand.u32 2147483648, %v2792_v7  ;;  %vm2813_vm5 = vweird.f32 %v2792_v7 }
 0xa3d   : > { %v2795_v33 = vsub.f32 1.0, %v2794_v29 }
 0xa3e   : > { %v2820_v1 = vor.u32 1.1754944e-38, %v2819_v48  ;;  %vm2818_vm10 = vcmp.eq.f32.partialorder %v2817_v45, 8.507059e+37 }
 0xa3f   : > { %v2796_v35 = vmul.f32 %v6933_v25, %v2795_v33 }
 0xa41   : > { %v2797_v36 = vadd.f32 %v6933_v25, %v2796_v35 }
 0xa42   : > { %v6935_v50 = vpop.eup %6934 }
 0xa43   : > { %v2801_v37 = vsel %vm2800_vm2, %v6933_v25, %v2797_v36  ;;  %v2809_v38 = vmul.f32 %v6935_v50, %v2792_v7  ;;  %vm2814_vm4 = vweird.f32 %v6935_v50 }
 0xa44   : > { %v2806_v40 = vsel %vm2803_vm3, %v2805_v5, %v2801_v37  ;;  %vm2815_vm6 = vmor %vm2813_vm5, %vm2814_vm4 }
 0xa45   : > { %v2807_v41 = vmul.f32 %v6929_v17, %v2806_v40  ;;  %v2810_v44 = vsub.f32 1.0, %v2809_v38  ;;  %v5829_v17 = vor.u32 %v6596_v20, %v5826_v56 }
 0xa46   : > { %v3024_v58 = vpop.permute.xlu0 %3023 }
 0xa47   : > { %v2811_v59 = vmul.f32 %v6935_v50, %v2810_v44  ;;  %v3025_v60 = vrot.slane %v3024_v58, 4  ;;  %v2823_v62 = vpack.c.bf16 %v2807_v41, %v2807_v41  ;;  %2909 = vmatpush.bf16.msra.mxu1 %v5829_v17 }
 0xa49   : > { %v2812_v63 = vadd.f32 %v6935_v50, %v2811_v59  ;;  %v3030_v0 = vsel %vm2041_vm8, %v3025_v60, 0  ;;  %5812 = vmatmul.msk.bf16.vlgmr.msrb.gmra.mxu2 %vm1987_vm9, %v2823_v62 }
 0xa4a   : > { %3039 = vmatpush.bf16.msrb.mxu0 %v3030_v0 }
 0xa4b   : > { %v2816_v32 = vsel %vm2815_vm6, %v6935_v50, %v2812_v63 }
 0xa4c   : > { %v2821_v51 = vsel %vm2818_vm10, %v2820_v1, %v2816_v32 }
 0xa4d   : > { %v2822_v53 = vmul.f32 %v6931_v49, %v2821_v51  ;;  %v5821_v49 = vor.u32 %v6594_v47, %v5818_v46 }
 0xa4e   : > { %v3127_v21 = vpop.permute.xlu0 %3126 }
 0xa4f   : > { %v2824_v26 = vpack.c.bf16 %v2822_v53, %v2822_v53  ;;  %2910 = vmatpush.bf16.msra.mxu1 %v5821_v49  ;;  %v3128_v22 = vrot.slane %v3127_v21, 4 }
 0xa51   : > { %5813 = vmatmul.msk.bf16.vlgmr.msrb.gmra.mxu3 %vm1987_vm9, %v2824_v26  ;;  %v3133_v25 = vsel %vm1946_vm7, %v3128_v22, 0 }
 0xa53   : > { %v2950_v6 = vpop.permute.xlu1 %2949 }
 0xa54   : > { %v2951_v9 = vrot.slane %v2950_v6, 4 }
 0xa56   : > { %v2956_v10 = vsel %vm1946_vm7, %v2951_v9, 0  ;;  %v3124_v26 = vpop.permute.xlu0 %3123 }
 0xa57   : > { %2965 = vmatpush.bf16.xpose.msra.mxu3 %v2956_v10 }
 0xa59   : > { %5832 = vmatmul.msk.bf16.vlgmr.msra.gmra.mxu2 %vm1946_vm7, %v2923_v34 }
 0xa61   : > { %5833 = vmatmul.msk.bf16.vlgmr.msra.gmra.mxu3 %vm1946_vm7, %v2948_v14 }
 0xacc   : > { %v2841_v19 = vpop.f32.mrf.mxu2 }
 0xad4   : > { %v2843_v4 = vpop.f32.mrf.mxu2  ;;  %v2861_v23 = vpop.f32.mrf.mxu3 }
 0xad5   : > { %v2865_v24 = vpack.c.bf16 %v2861_v23, %v2841_v19 }
 0xad7   : > { %5830 = vmatmul.msk.bf16.vlgmr.msra.gmra.mxu0 %vm1946_vm7, %v2865_v24  ;;  %5831 = vmatmul.msk.bf16.vlgmr.msra.gmra.mxu1 %vm1946_vm7, %v2865_v24 }
 0xad8   : > { %3142 = vmatpush.bf16.xpose.msra.mxu0 %v3133_v25 }
 0xadc   : > { %v2863_v29 = vpop.f32.mrf.mxu3  ;;  %v2942_v7 = vpop.f32.mrf.mxu2 }
 0xadd   : > { %v2971_v33 = vmul.f32 0.17677669, %v2942_v7 }
 0xadf   : > { %v2973_v8 = vsel %vm1987_vm9, %v2971_v33, -inf }
 0xae0   : > { %2974 = vmax.xlane.f32.xlu2 %v2973_v8 }
 0xae4   : > { %v2944_v35 = vpop.f32.mrf.mxu2  ;;  %v2967_v13 = vpop.f32.mrf.mxu3 }
 0xae5   : > { %v2972_v36 = vmul.f32 0.17677669, %v2967_v13 }
 0xae7   : > { %v2976_v50 = vsel %vm1987_vm9, %v2972_v36, -inf }
 0xae8   : > { %2977 = vmax.xlane.f32.xlu1 %v2976_v50 }
 0xaec   : > { %v2969_v5 = vpop.f32.mrf.mxu3 }
 0xaf8   : > { %3045 = vrot.lane.b32.xlu2 %v8394_v61, %s7591_s1 }
 0xb01   : > { %3151 = vrot.lane.b32.xlu1 %v8376_v39, %s7592_s27 }
 0xb09   : > { %3328 = vrot.lane.b32.xlu1 %v8366_v28, %s7593_s12 }
 0xb53   : > { %v2975_v37 = vpop.xlane.xlu2 %2974 }
 0xb54   : > { %v2979_v38 = vsub.f32 %v2971_v33, %v2975_v37  ;;  %v2898_v40 = vpop.f32.mrf.mxu0  ;;  %v2912_v41 = vpop.f32.mrf.mxu1  ;;  %v5846_v37 = vld [vmem:[%s8041_s18 + $0xb0] sm:$0xf] }
 0xb55   : > { %v8611_v44 = vadd.f32 %v2898_v40, %v8566_v12  ;;  %v8614_v45 = vadd.f32 %v2912_v41, %v8569_v15  ;;  %v6600_v40 = vld [vmem:[%s8041_s18 + $0xb4] sm:$0xf] }
 0xb56   : > { %v2981_v48 = vmul.f32 1.442695, %v2979_v38  ;;  %v6601_v38 = vld [vmem:[%s8041_s18 + $0xb4] sm:$0xf0] }
 0xb57   : > { %v5847_v41 = vor.u32 %v6601_v38, %v5846_v37 }
 0xb58   : > { %6936 = vpow2.f32 %v2981_v48  ;;  %v5848_v48 = vld [vmem:[%s8041_s18 + $0xb8] sm:$0xf0] }
 0xb59   : > { %3097 = vmatpush.bf16.msrb.mxu2 %v5847_v41 }
 0xb5b   : > { %v3046_v58 = vpop.permute.xlu2 %3045  ;;  %v2978_v59 = vpop.xlane.xlu1 %2977 }
 0xb5c   : > { %v3047_v60 = vrot.slane %v3046_v58, 4  ;;  %v2980_v62 = vsub.f32 %v2972_v36, %v2978_v59  ;;  %v3125_v36 = vrot.slane %v3124_v26, 4  ;;  %v5851_v58 = vor.u32 %v6600_v40, %v5848_v48  ;;  %v5838_v59 = vld [vmem:[%s8041_s18 + $0xa0] sm:$0xf] }
 0xb5e   : > { %v6937_v63 = vpop.eup %6936  ;;  %v3052_v0 = vsel %vm2041_vm8, %v3047_v60, 0  ;;  %v2983_v28 = vmul.f32 1.442695, %v2980_v62  ;;  %3111 = vmatpush.bf16.msrb.mxu3 %v5851_v58  ;;  %v6599_v60 = vld [vmem:[%s8041_s18 + $0xa4] sm:$0xf0] }
 0xb5f   : > { %3061 = vmatpush.bf16.msrb.mxu1 %v3052_v0  ;;  %v2985_v1 = vsel %vm1987_vm9, %v6937_v63, 0.0  ;;  %v6598_v62 = vld [vmem:[%s8041_s18 + $0xa4] sm:$0xf]  ;;  %v5840_v0 = vld [vmem:[%s8041_s18 + $0xa8] sm:$0xf0] }
 0xb60   : > { %6938 = vpow2.f32 %v2983_v28  ;;  %2986 = vadd.xlane.f32.xlu0 %v2985_v1  ;;  %v5843_v28 = vor.u32 %v6598_v62, %v5840_v0  ;;  %v8634_v1 = vpop.f32.mrf.mxu0 }
 0xb62   : > { %3112 = vmatpush.bf16.msrb.mxu3 %v5843_v28 }
 0xb66   : > { %v6939_v12 = vpop.eup %6938 }
 0xb67   : > { %v2988_v32 = vsel %vm1987_vm9, %v6939_v12, 0.0 }
 0xb68   : > { %2989 = vadd.xlane.f32.xlu0 %v2988_v32 }
 0xb73   : > { %v3152_v15 = vpop.permute.xlu1 %3151 }
 0xb74   : > { %v3153_v51 = vrot.slane %v3152_v15, 4 }
 0xb76   : > { %v3158_v53 = vsel %vm1946_vm7, %v3153_v51, 0 }
 0xb77   : > { %3167 = vmatpush.bf16.xpose.msra.mxu1 %v3158_v53 }
 0xb7c   : > { %3148 = vrot.lane.b32.xlu0 %v8358_v16, %s7592_s27 }
 0xbd3   : > { %v2987_v27 = vpop.xlane.xlu0 %2986 }
 0xbd4   : > { %6940 = vrcp.f32 %v2987_v27  ;;  %v3002_v11 = vand.u32 2147483648, %v2987_v27  ;;  %v3000_v20 = vand.u32 2147483647, %v2987_v27  ;;  %vm2996_vm12 = vweird.f32 %v2987_v27 }
 0xbd6   : > { %v3003_v47 = vor.u32 1.1754944e-38, %v3002_v11  ;;  %vm3001_vm14 = vcmp.eq.f32.partialorder %v3000_v20, 8.507059e+37 }
 0xbda   : > { %v6941_v6 = vpop.eup %6940 }
 0xbdb   : > { %v2992_v9 = vmul.f32 %v6941_v6, %v2987_v27  ;;  %v2990_v10 = vpop.xlane.xlu0 %2989  ;;  %vm2997_vm11 = vweird.f32 %v6941_v6 }
 0xbdc   : > { %6942 = vrcp.f32 %v2990_v10  ;;  %vm2998_vm13 = vmor %vm2996_vm12, %vm2997_vm11  ;;  %v3017_v4 = vand.u32 2147483648, %v2990_v10  ;;  %v3015_v24 = vand.u32 2147483647, %v2990_v10  ;;  %vm3011_vm0 = vweird.f32 %v2990_v10 }
 0xbdd   : > { %v2993_v34 = vsub.f32 1.0, %v2992_v9 }
 0xbde   : > { %v3018_v7 = vor.u32 1.1754944e-38, %v3017_v4  ;;  %vm3016_vm2 = vcmp.eq.f32.partialorder %v3015_v24, 8.507059e+37 }
 0xbdf   : > { %v2994_v14 = vmul.f32 %v6941_v6, %v2993_v34 }
 0xbe1   : > { %v2995_v56 = vadd.f32 %v6941_v6, %v2994_v14 }
 0xbe2   : > { %v6943_v17 = vpop.eup %6942 }
 0xbe3   : > { %v2999_v46 = vsel %vm2998_vm13, %v6941_v6, %v2995_v56  ;;  %v3007_v49 = vmul.f32 %v6943_v17, %v2990_v10  ;;  %vm3012_vm15 = vweird.f32 %v6943_v17 }
 0xbe4   : > { %v3004_v19 = vsel %vm3001_vm14, %v3003_v47, %v2999_v46  ;;  %vm3013_vm1 = vmor %vm3011_vm0, %vm3012_vm15  ;;  %v3329_v46 = vpop.permute.xlu1 %3328 }
 0xbe5   : > { %v3005_v21 = vmul.f32 %v6937_v63, %v3004_v19  ;;  %v3008_v22 = vsub.f32 1.0, %v3007_v49  ;;  %v5839_v63 = vor.u32 %v6599_v60, %v5838_v59 }
 0xbe7   : > { %v3009_v23 = vmul.f32 %v6943_v17, %v3008_v22  ;;  %v3021_v25 = vpack.c.bf16 %v3005_v21, %v3005_v21  ;;  %3098 = vmatpush.bf16.msrb.mxu2 %v5839_v63  ;;  %v3330_v21 = vrot.slane %v3329_v46, 4 }
 0xbe9   : > { %v3010_v29 = vadd.f32 %v6943_v17, %v3009_v23  ;;  %5834 = vmatmul.msk.bf16.vlgmr.msrb.gmra.mxu0 %vm1987_vm9, %v3021_v25 }
 0xbeb   : > { %v3014_v33 = vsel %vm3013_vm1, %v6943_v17, %v3010_v29 }
 0xbec   : > { %v3019_v8 = vsel %vm3016_vm2, %v3018_v7, %v3014_v33 }
 0xbed   : > { %v3020_v35 = vmul.f32 %v6939_v12, %v3019_v8  ;;  %v8636_v12 = vpop.f32.mrf.mxu1  ;;  %v3335_v8 = vsel %vm1946_vm7, %v3330_v21, 0  ;;  %v6605_v21 = vld [vmem:[%s8041_s18 + $0xd4] sm:$0xf0] }
 0xbee   : > { %v3149_v50 = vpop.permute.xlu0 %3148 }
 0xbef   : > { %v3022_v13 = vpack.c.bf16 %v3020_v35, %v3020_v35  ;;  %v3150_v5 = vrot.slane %v3149_v50, 4 }
 0xbf1   : > { %5835 = vmatmul.msk.bf16.vlgmr.msrb.gmra.mxu1 %vm1987_vm9, %v3022_v13 }
 0xbf9   : > { %5854 = vmatmul.msk.bf16.vlgmr.msra.gmra.mxu0 %vm1946_vm7, %v3125_v36 }
 0xc01   : > { %5855 = vmatmul.msk.bf16.vlgmr.msra.gmra.mxu1 %vm1946_vm7, %v3150_v5 }
 0xc66   : > { %v3041_v32 = vpop.f32.mrf.mxu0 }
 0xc6e   : > { %v3043_v15 = vpop.f32.mrf.mxu0  ;;  %v3063_v51 = vpop.f32.mrf.mxu1 }
 0xc6f   : > { %v3067_v53 = vpack.c.bf16 %v3063_v51, %v3041_v32 }
 0xc71   : > { %5852 = vmatmul.msk.bf16.vlgmr.msrb.gmra.mxu2 %vm1946_vm7, %v3067_v53  ;;  %5853 = vmatmul.msk.bf16.vlgmr.msrb.gmra.mxu3 %vm1946_vm7, %v3067_v53 }
 0xc76   : > { %v3065_v26 = vpop.f32.mrf.mxu1  ;;  %v3144_v27 = vpop.f32.mrf.mxu0 }
 0xc77   : > { %v3173_v6 = vmul.f32 0.17677669, %v3144_v27 }
 0xc79   : > { %v3175_v9 = vsel %vm1987_vm9, %v3173_v6, -inf }
 0xc7a   : > { %3176 = vmax.xlane.f32.xlu2 %v3175_v9 }
 0xc7e   : > { %v3146_v10 = vpop.f32.mrf.mxu0  ;;  %v3169_v34 = vpop.f32.mrf.mxu1 }
 0xc7f   : > { %v3174_v11 = vmul.f32 0.17677669, %v3169_v34 }
 0xc81   : > { %v3178_v14 = vsel %vm1987_vm9, %v3174_v11, -inf }
 0xc82   : > { %3179 = vmax.xlane.f32.xlu0 %v3178_v14 }
 0xc86   : > { %v3171_v20 = vpop.f32.mrf.mxu1 }
 0xc92   : > { %3225 = vrot.lane.b32.xlu2 %v8388_v52, %s7592_s27 }
 0xc96   : > { %3247 = vrot.lane.b32.xlu0 %v8394_v61, %s7592_s27 }
 0xc9e   : > { %3353 = vrot.lane.b32.xlu0 %v8376_v39, %s7593_s12 }
 0xced   : > { %v3177_v56 = vpop.xlane.xlu2 %3176 }
 0xcee   : > { %v3181_v17 = vsub.f32 %v3173_v6, %v3177_v56 }
 0xcf0   : > { %v3183_v47 = vmul.f32 1.442695, %v3181_v17 }
 0xcf2   : > { %6944 = vpow2.f32 %v3183_v47 }
 0xcf4   : > { %v3100_v49 = vpop.f32.mrf.mxu2  ;;  %v3114_v19 = vpop.f32.mrf.mxu3 }
 0xcf5   : > { %v8649_v22 = vadd.f32 %v3100_v49, %v8611_v44  ;;  %v8652_v4 = vadd.f32 %v3114_v19, %v8614_v45  ;;  %v3180_v23 = vpop.xlane.xlu0 %3179  ;;  %v3226_v24 = vpop.permute.xlu2 %3225  ;;  %v5868_v19 = vld [vmem:[%s8041_s18 + $0xd0] sm:$0xf] }
 0xcf6   : > { %v3182_v25 = vsub.f32 %v3174_v11, %v3180_v23  ;;  %v3227_v29 = vrot.slane %v3226_v24, 4  ;;  %v6604_v23 = vld [vmem:[%s8041_s18 + $0xd4] sm:$0xf]  ;;  %v5869_v24 = vor.u32 %v6605_v21, %v5868_v19 }
 0xcf8   : > { %v6945_v7 = vpop.eup %6944  ;;  %v3185_v39 = vmul.f32 1.442695, %v3182_v25  ;;  %v3232_v33 = vsel %vm2041_vm8, %v3227_v29, 0  ;;  %v5870_v25 = vld [vmem:[%s8041_s18 + $0xd8] sm:$0xf0]  ;;  %3299 = vmatpush.bf16.msrb.mxu0 %v5869_v24 }
 0xcf9   : > { %3241 = vmatpush.bf16.msra.mxu2 %v3232_v33  ;;  %v3187_v35 = vsel %vm1987_vm9, %v6945_v7, 0.0  ;;  %v5873_v29 = vor.u32 %v6604_v23, %v5870_v25  ;;  %v6602_v33 = vld [vmem:[%s8041_s18 + $0xc4] sm:$0xf] }
 0xcfa   : > { %6946 = vpow2.f32 %v3185_v39  ;;  %3188 = vadd.xlane.f32.xlu1 %v3187_v35  ;;  %v6603_v39 = vld [vmem:[%s8041_s18 + $0xc4] sm:$0xf0]  ;;  %v5862_v35 = vld [vmem:[%s8041_s18 + $0xc8] sm:$0xf0] }
 0xcfb   : > { %3313 = vmatpush.bf16.msrb.mxu1 %v5873_v29 }
 0xcfd   : > { %3344 = vmatpush.bf16.xpose.msrb.mxu2 %v3335_v8 }
 0xd00   : > { %v6947_v44 = vpop.eup %6946 }
 0xd01   : > { %v3190_v45 = vsel %vm1987_vm9, %v6947_v44, 0.0 }
 0xd02   : > { %3191 = vadd.xlane.f32.xlu2 %v3190_v45  ;;  %v8676_v45 = vpop.f32.mrf.mxu2 }
 0xd08   : > { %v3248_v13 = vpop.permute.xlu0 %3247 }
 0xd09   : > { %v3249_v36 = vrot.slane %v3248_v13, 4  ;;  %v8678_v13 = vpop.f32.mrf.mxu3 }
 0xd0b   : > { %v3254_v50 = vsel %vm2041_vm8, %v3249_v36, 0 }
 0xd0c   : > { %3263 = vmatpush.bf16.msra.mxu3 %v3254_v50 }
 0xd10   : > { %v3354_v5 = vpop.permute.xlu0 %3353 }
 0xd11   : > { %v3355_v37 = vrot.slane %v3354_v5, 4 }
 0xd13   : > { %v3360_v38 = vsel %vm1946_vm7, %v3355_v37, 0  ;;  %3350 = vrot.lane.b32.xlu1 %v8358_v16, %s7593_s12 }
 0xd14   : > { %3369 = vmatpush.bf16.xpose.msrb.mxu3 %v3360_v38 }
 0xd1a   : > { %3325 = vrot.lane.b32.xlu2 %v8350_v3, %s7593_s12 }
 0xd6d   : > { %v3189_v40 = vpop.xlane.xlu1 %3188 }
 0xd6e   : > { %6948 = vrcp.f32 %v3189_v40  ;;  %v3204_v60 = vand.u32 2147483648, %v3189_v40  ;;  %v3202_v63 = vand.u32 2147483647, %v3189_v40  ;;  %vm3198_vm4 = vweird.f32 %v3189_v40 }
 0xd70   : > { %v3205_v16 = vor.u32 1.1754944e-38, %v3204_v60  ;;  %vm3203_vm6 = vcmp.eq.f32.partialorder %v3202_v63, 8.507059e+37 }
 0xd74   : > { %v6949_v41 = vpop.eup %6948 }
 0xd75   : > { %v3194_v48 = vmul.f32 %v6949_v41, %v3189_v40  ;;  %v3192_v58 = vpop.xlane.xlu2 %3191  ;;  %vm3199_vm3 = vweird.f32 %v6949_v41 }
 0xd76   : > { %6950 = vrcp.f32 %v3192_v58  ;;  %vm3200_vm5 = vmor %vm3198_vm4, %vm3199_vm3  ;;  %v3219_v26 = vand.u32 2147483648, %v3192_v58  ;;  %v3217_v9 = vand.u32 2147483647, %v3192_v58  ;;  %vm3213_vm11 = vweird.f32 %v3192_v58 }
 0xd77   : > { %v3195_v59 = vsub.f32 1.0, %v3194_v48 }
 0xd78   : > { %v3220_v34 = vor.u32 1.1754944e-38, %v3219_v26  ;;  %vm3218_vm13 = vcmp.eq.f32.partialorder %v3217_v9, 8.507059e+37 }
 0xd79   : > { %v3196_v62 = vmul.f32 %v6949_v41, %v3195_v59 }
 0xd7b   : > { %v3197_v0 = vadd.f32 %v6949_v41, %v3196_v62 }
 0xd7c   : > { %v6951_v28 = vpop.eup %6950 }
 0xd7d   : > { %v3201_v32 = vsel %vm3200_vm5, %v6949_v41, %v3197_v0  ;;  %v3209_v15 = vmul.f32 %v6951_v28, %v3192_v58  ;;  %vm3214_vm10 = vweird.f32 %v6951_v28  ;;  %v3326_v17 = vpop.permute.xlu2 %3325 }
 0xd7e   : > { %v3206_v3 = vsel %vm3203_vm6, %v3205_v16, %v3201_v32  ;;  %vm3215_vm12 = vmor %vm3213_vm11, %vm3214_vm10  ;;  %v3327_v47 = vrot.slane %v3326_v17, 4 }
 0xd7f   : > { %v3207_v51 = vmul.f32 %v6945_v7, %v3206_v3  ;;  %v3210_v53 = vsub.f32 1.0, %v3209_v15  ;;  %v5860_v7 = vld [vmem:[%s8041_s18 + $0xc0] sm:$0xf] }
 0xd80   : > { %v5861_v8 = vor.u32 %v6603_v39, %v5860_v7 }
 0xd81   : > { %v3223_v27 = vpack.c.bf16 %v3207_v51, %v3207_v51  ;;  %v3211_v6 = vmul.f32 %v6951_v28, %v3210_v53 }
 0xd82   : > { %3300 = vmatpush.bf16.msrb.mxu0 %v5861_v8 }
 0xd83   : > { %v3212_v10 = vadd.f32 %v6951_v28, %v3211_v6  ;;  %5856 = vmatmul.msk.bf16.vlgmr.msra.gmra.mxu2 %vm1987_vm9, %v3223_v27 }
 0xd85   : > { %v3216_v11 = vsel %vm3215_vm12, %v6951_v28, %v3212_v10  ;;  %v3351_v46 = vpop.permute.xlu1 %3350 }
 0xd86   : > { %v3221_v14 = vsel %vm3218_vm13, %v3220_v34, %v3216_v11  ;;  %v3352_v49 = vrot.slane %v3351_v46, 4 }
 0xd87   : > { %v3222_v20 = vmul.f32 %v6947_v44, %v3221_v14  ;;  %v5865_v44 = vor.u32 %v6602_v33, %v5862_v35 }
 0xd89   : > { %v3224_v56 = vpack.c.bf16 %v3222_v20, %v3222_v20  ;;  %3314 = vmatpush.bf16.msrb.mxu1 %v5865_v44 }
 0xd8b   : > { %5857 = vmatmul.msk.bf16.vlgmr.msra.gmra.mxu3 %vm1987_vm9, %v3224_v56 }
 0xd93   : > { %5876 = vmatmul.msk.bf16.vlgmr.msrb.gmra.mxu2 %vm1946_vm7, %v3327_v47 }
 0xd9b   : > { %5877 = vmatmul.msk.bf16.vlgmr.msrb.gmra.mxu3 %vm1946_vm7, %v3352_v49 }
 0xe06   : > { %v3243_v36 = vpop.f32.mrf.mxu2 }
 0xe0e   : > { %v3245_v50 = vpop.f32.mrf.mxu2  ;;  %v3265_v5 = vpop.f32.mrf.mxu3 }
 0xe0f   : > { %v3269_v37 = vpack.c.bf16 %v3265_v5, %v3243_v36 }
 0xe11   : > { %5874 = vmatmul.msk.bf16.vlgmr.msrb.gmra.mxu0 %vm1946_vm7, %v3269_v37  ;;  %5875 = vmatmul.msk.bf16.vlgmr.msrb.gmra.mxu1 %vm1946_vm7, %v3269_v37 }
 0xe16   : > { %v3267_v38 = vpop.f32.mrf.mxu3  ;;  %v3346_v40 = vpop.f32.mrf.mxu2 }
 0xe17   : > { %v3375_v41 = vmul.f32 0.17677669, %v3346_v40 }
 0xe19   : > { %v3377_v48 = vsel %vm1987_vm9, %v3375_v41, -inf }
 0xe1a   : > { %3378 = vmax.xlane.f32.xlu0 %v3377_v48 }
 0xe1e   : > { %v3348_v58 = vpop.f32.mrf.mxu2  ;;  %v3371_v59 = vpop.f32.mrf.mxu3 }
 0xe1f   : > { %v3376_v60 = vmul.f32 0.17677669, %v3371_v59  ;;  %v5890_v58 = vld [vmem:[%s8041_s18 + $0xf0] sm:$0xf]  ;;  %v6609_v59 = vld [vmem:[%s8041_s18 + $0xf4] sm:$0xf0] }
 0xe21   : > { %v3380_v62 = vsel %vm1987_vm9, %v3376_v60, -inf }
 0xe22   : > { %3381 = vmax.xlane.f32.xlu2 %v3380_v62  ;;  %v5891_v62 = vor.u32 %v6609_v59, %v5890_v58 }
 0xe24   : > { %3501 = vmatpush.bf16.msra.mxu2 %v5891_v62  ;;  %v6142_v62 = vld [vmem:[%s8057_s21 + $0x1f0] sm:$0xf0] }
 0xe26   : > { %v3373_v63 = vpop.f32.mrf.mxu3 }
 0xe27   : > { %v5892_v63 = vld [vmem:[%s8041_s18 + $0xf8] sm:$0xf0] }
 0xe3a   : > { %3427 = vrot.lane.b32.xlu2 %v8388_v52, %s7593_s12 }
 0xe8d   : > { %v3379_v0 = vpop.xlane.xlu0 %3378 }
 0xe8e   : > { %v3383_v28 = vsub.f32 %v3375_v41, %v3379_v0  ;;  %v3302_v16 = vpop.f32.mrf.mxu0  ;;  %v3316_v32 = vpop.f32.mrf.mxu1 }
 0xe8f   : > { %v8687_v15 = vadd.f32 %v3302_v16, %v8649_v22  ;;  %v8690_v3 = vadd.f32 %v3316_v32, %v8652_v4  ;;  %v6607_v16 = vld [vmem:[%s8041_s18 + $0xe4] sm:$0xf0]  ;;  %v6606_v32 = vld [vmem:[%s8041_s18 + $0xe4] sm:$0xf] }
 0xe90   : > { %v3385_v51 = vmul.f32 1.442695, %v3383_v28  ;;  %v5882_v28 = vld [vmem:[%s8041_s18 + $0xe0] sm:$0xf] }
 0xe92   : > { %6952 = vpow2.f32 %v3385_v51  ;;  %v5883_v51 = vor.u32 %v6607_v16, %v5882_v28  ;;  %v6636_v28 = vld [vmem:[%s8057_s21 + $0xcc] sm:$0xf0]  ;;  %v6124_v16 = vld [vmem:[%s8057_s21 + $0x1c0] sm:$0xf] }
 0xe94   : > { %3502 = vmatpush.bf16.msra.mxu2 %v5883_v51 }
 0xe95   : > { %v3382_v53 = vpop.xlane.xlu2 %3381 }
 0xe96   : > { %v3384_v26 = vsub.f32 %v3376_v60, %v3382_v53  ;;  %v6608_v60 = vld [vmem:[%s8041_s18 + $0xf4] sm:$0xf]  ;;  %v5884_v53 = vld [vmem:[%s8041_s18 + $0xe8] sm:$0xf0] }
 0xe97   : > { %v5895_v0 = vor.u32 %v6608_v60, %v5892_v63  ;;  %v6670_v60 = vld [vmem:[%s8057_s21 + $0x1e4] sm:$0xf]  ;;  %v5996_v63 = vld [vmem:[%s8057_s21 + $0xc0] sm:$0xf] }
 0xe98   : > { %v6953_v27 = vpop.eup %6952  ;;  %v3387_v6 = vmul.f32 1.442695, %v3384_v26  ;;  %v5887_v26 = vor.u32 %v6606_v32, %v5884_v53  ;;  %v6668_v32 = vld [vmem:[%s8057_s21 + $0x1cc] sm:$0xf0]  ;;  %v5997_v51 = vor.u32 %v6636_v28, %v5996_v63  ;;  %v6078_v28 = vld [vmem:[%s8057_s21 + $0x170] sm:$0xf0] }
 0xe99   : > { %v3389_v9 = vsel %vm1987_vm9, %v6953_v27, 0.0  ;;  %3515 = vmatpush.bf16.msra.mxu3 %v5895_v0  ;;  %v6145_v0 = vor.u32 %v6670_v60, %v6142_v62  ;;  %v6125_v53 = vor.u32 %v6668_v32, %v6124_v16  ;;  %v5950_v60 = vld [vmem:[%s8057_s21 + $0x70] sm:$0xf0]  ;;  %v5932_v32 = vld [vmem:[%s8057_s21 + $0x40] sm:$0xf] }
 0xe9a   : > { %6954 = vpow2.f32 %v3387_v6  ;;  %3390 = vadd.xlane.f32.xlu1 %v3389_v9  ;;  %v3318_v9 = vpop.f32.mrf.mxu1 }
 0xe9d   : > { %v3428_v52 = vpop.permute.xlu2 %3427  ;;  %3516 = vmatpush.bf16.msra.mxu3 %v5887_v26  ;;  %v6634_v26 = vld [vmem:[%s8057_s21 + $0xc4] sm:$0xf] }
 0xe9e   : > { %v3429_v10 = vrot.slane %v3428_v52, 4 }
 0xea0   : > { %v6955_v34 = vpop.eup %6954  ;;  %v3434_v11 = vsel %vm2041_vm8, %v3429_v10, 0 }
 0xea1   : > { %3443 = vmatpush.bf16.msra.mxu0 %v3434_v11  ;;  %v3392_v22 = vsel %vm1987_vm9, %v6955_v34, 0.0  ;;  %4049 = vmatpush.bf16.msrb.mxu3 %v6145_v0  ;;  %v6654_v0 = vld [vmem:[%s8057_s21 + $0x164] sm:$0xf] }
 0xea2   : > { %3393 = vadd.xlane.f32.xlu0 %v3392_v22  ;;  %v2323_v22 = vadd.f32 %v8520_v31, %v8473_v54  ;;  %v6081_v16 = vor.u32 %v6654_v0, %v6078_v28  ;;  %v6669_v0 = vld [vmem:[%s8057_s21 + $0x1d4] sm:$0xf0]  ;;  %v6635_v28 = vld [vmem:[%s8057_s21 + $0xcc] sm:$0xf] }
 0xeb3   : > { %3449 = vrot.lane.b32.xlu1 %v8394_v61, %s7593_s12 }
 0xf0d   : > { %v3391_v4 = vpop.xlane.xlu1 %3390 }
 0xf0e   : > { %6956 = vrcp.f32 %v3391_v4  ;;  %v3406_v47 = vand.u32 2147483648, %v3391_v4  ;;  %v3404_v49 = vand.u32 2147483647, %v3391_v4  ;;  %vm3400_vm15 = vweird.f32 %v3391_v4 }
 0xf10   : > { %v3407_v23 = vor.u32 1.1754944e-38, %v3406_v47  ;;  %vm3405_vm1 = vcmp.eq.f32.partialorder %v3404_v49, 8.507059e+37 }
 0xf14   : > { %v6957_v14 = vpop.eup %6956 }
 0xf15   : > { %v3396_v20 = vmul.f32 %v6957_v14, %v3391_v4  ;;  %v3394_v56 = vpop.xlane.xlu0 %3393  ;;  %vm3401_vm14 = vweird.f32 %v6957_v14  ;;  %v2337_v4 = vadd.f32 %v8518_v30, %v8475_v55 }
 0xf16   : > { %6958 = vrcp.f32 %v3394_v56  ;;  %vm3402_vm0 = vmor %vm3400_vm15, %vm3401_vm14  ;;  %v3421_v39 = vand.u32 2147483648, %v3394_v56  ;;  %v3419_v35 = vand.u32 2147483647, %v3394_v56  ;;  %vm3415_vm3 = vweird.f32 %v3394_v56 }
 0xf17   : > { %v3397_v17 = vsub.f32 1.0, %v3396_v20  ;;  %v2534_v20 = vadd.f32 %v8556_v42, %v2337_v4 }
 0xf18   : > { %v3422_v36 = vor.u32 1.1754944e-38, %v3421_v39  ;;  %vm3420_vm5 = vcmp.eq.f32.partialorder %v3419_v35, 8.507059e+37 }
 0xf19   : > { %v3398_v46 = vmul.f32 %v6957_v14, %v3397_v17  ;;  %v2730_v47 = vadd.f32 %v8597_v18, %v2534_v20 }
 0xf1b   : > { %v3399_v19 = vadd.f32 %v6957_v14, %v3398_v46  ;;  %v2920_v30 = vadd.f32 %v8636_v12, %v2730_v47 }
 0xf1c   : > { %v6959_v21 = vpop.eup %6958 }
 0xf1d   : > { %v3403_v24 = vsel %vm3402_vm0, %v6957_v14, %v3399_v19  ;;  %v3411_v25 = vmul.f32 %v6959_v21, %v3394_v56  ;;  %vm3416_vm2 = vweird.f32 %v6959_v21  ;;  %v2533_v14 = vadd.f32 %v8558_v43, %v2323_v22  ;;  %v3531_v56 = vld [vmem:[%s872_s20] sm:$0x3] }
 0xf1e   : > { %v3408_v61 = vsel %vm3405_vm1, %v3407_v23, %v3403_v24  ;;  %vm3417_vm4 = vmor %vm3415_vm3, %vm3416_vm2  ;;  %v3534_v31 = vperm.slane %v3531_v56, 1  ;;  %v6980_v43 = vld [vmem:[#allocation2 + $0x10] sm:$0xff]  ;;  %v6981_v23 = vld [vmem:[#allocation2] sm:$0xff]  ;;  %v3122_v18 = vadd.f32 %v8678_v13, %v2920_v30 }
 0xf1f   : > { %v3409_v29 = vmul.f32 %v6953_v27, %v3408_v61  ;;  %v3412_v7 = vsub.f32 1.0, %v3411_v25  ;;  %v3304_v27 = vpop.f32.mrf.mxu0  ;;  %v2729_v17 = vadd.f32 %v8595_v57, %v2533_v14  ;;  %v6982_v13 = vld [vmem:[#allocation2 + $0x18] sm:$0xff]  ;;  %v6108_v30 = vld [vmem:[%s8057_s21 + $0x1a0] sm:$0xf] }
 0xf21   : > { %v3425_v33 = vpack.c.bf16 %v3409_v29, %v3409_v29  ;;  %v3413_v8 = vmul.f32 %v6959_v21, %v3412_v7  ;;  %v2919_v55 = vadd.f32 %v8634_v1, %v2729_v17 }
 0xf23   : > { %v3414_v44 = vadd.f32 %v6959_v21, %v3413_v8  ;;  %5878 = vmatmul.msk.bf16.vlgmr.msra.gmra.mxu0 %vm1987_vm9, %v3425_v33  ;;  %v3121_v57 = vadd.f32 %v8676_v45, %v2919_v55  ;;  %v6983_v33 = vld [vmem:[#allocation2 + $0x8] sm:$0xff]  ;;  %v6632_v55 = vld [vmem:[%s8057_s21 + $0xac] sm:$0xf0] }
 0xf25   : > { %v3418_v50 = vsel %vm3417_vm4, %v6959_v21, %v3414_v44  ;;  %v3450_v5 = vpop.permute.xlu1 %3449  ;;  %v3533_v21 = vperm.slane %v3531_v56, 0 }
 0xf26   : > { %v3423_v37 = vsel %vm3420_vm5, %v3422_v36, %v3418_v50  ;;  %v3451_v38 = vrot.slane %v3450_v5, 4  ;;  %v6012_v50 = vld [vmem:[%s8057_s21 + $0xe0] sm:$0xf]  ;;  %v6640_v5 = vld [vmem:[%s8057_s21 + $0xec] sm:$0xf0] }
 0xf27   : > { %v3424_v40 = vmul.f32 %v6955_v34, %v3423_v37  ;;  %v6140_v37 = vld [vmem:[%s8057_s21 + $0x1e0] sm:$0xf] }
 0xf28   : > { %v3456_v41 = vsel %vm2041_vm8, %v3451_v38, 0  ;;  %v6013_v38 = vor.u32 %v6640_v5, %v6012_v50  ;;  %v6658_v50 = vld [vmem:[%s8057_s21 + $0x184] sm:$0xf]  ;;  %v6094_v5 = vld [vmem:[%s8057_s21 + $0x190] sm:$0xf0] }
 0xf29   : > { %v3426_v48 = vpack.c.bf16 %v3424_v40, %v3424_v40  ;;  %3465 = vmatpush.bf16.msra.mxu1 %v3456_v41  ;;  %v6672_v40 = vld [vmem:[%s8057_s21 + $0x1ec] sm:$0xf0]  ;;  %v6638_v41 = vld [vmem:[%s8057_s21 + $0xe4] sm:$0xf] }
 0xf2a   : > { %v6141_v58 = vor.u32 %v6672_v40, %v6140_v37  ;;  %4007 = vmatpush.bf16.msrb.mxu0 %v6013_v38  ;;  %v6097_v37 = vor.u32 %v6658_v50, %v6094_v5  ;;  %v5948_v38 = vld [vmem:[%s8057_s21 + $0x60] sm:$0xf]  ;;  %v6624_v40 = vld [vmem:[%s8057_s21 + $0x6c] sm:$0xf0] }
 0xf2c   : > { %5879 = vmatmul.msk.bf16.vlgmr.msra.gmra.mxu1 %vm1987_vm9, %v3426_v48  ;;  %v6014_v48 = vld [vmem:[%s8057_s21 + $0xf0] sm:$0xf0] }
 0xf2d   : > { %v6017_v59 = vor.u32 %v6638_v41, %v6014_v48  ;;  %4021 = vmatpush.bf16.msrb.mxu1 %v6141_v58  ;;  %v6076_v41 = vld [vmem:[%s8057_s21 + $0x160] sm:$0xf]  ;;  %v5949_v48 = vor.u32 %v6624_v40, %v5948_v38  ;;  %v6656_v58 = vld [vmem:[%s8057_s21 + $0x16c] sm:$0xf0]  ;;  %v6022_v38 = vld [vmem:[%s8057_s21 + $0xf8] sm:$0xf0] }
 0xf2e   : > { %4008 = vmatpush.bf16.msrb.mxu0 %v5997_v51  ;;  %v6077_v62 = vor.u32 %v6656_v58, %v6076_v41  ;;  %v6620_v51 = vld [vmem:[%s8057_s21 + $0x4c] sm:$0xf0]  ;;  %v6671_v40 = vld [vmem:[%s8057_s21 + $0x1ec] sm:$0xf]  ;;  %v6004_v58 = vld [vmem:[%s8057_s21 + $0xc8] sm:$0xf] }
 0xf2f   : > { %4035 = vmatpush.bf16.msrb.mxu2 %v6017_v59  ;;  %v6622_v59 = vld [vmem:[%s8057_s21 + $0x64] sm:$0xf] }
 0xf30   : > { %v5953_v63 = vor.u32 %v6622_v59, %v5950_v60  ;;  %v6637_v59 = vld [vmem:[%s8057_s21 + $0xd4] sm:$0xf0] }
 0xf31   : > { %4022 = vmatpush.bf16.msrb.mxu1 %v6125_v53  ;;  %v6060_v53 = vld [vmem:[%s8057_s21 + $0x140] sm:$0xf] }
 0xfa0   : > { %v3445_v6 = vpop.f32.mrf.mxu0 }
 0xfa8   : > { %v3447_v52 = vpop.f32.mrf.mxu0 }
 0xfa9   : > { %v3467_v10 = vpop.f32.mrf.mxu1  ;;  %v6126_v52 = vld [vmem:[%s8057_s21 + $0x1d0] sm:$0xf0] }
 0xfaa   : > { %v3471_v34 = vpack.c.bf16 %v3467_v10, %v3445_v6  ;;  %v6666_v6 = vld [vmem:[%s8057_s21 + $0x1c4] sm:$0xf] }
 0xfab   : > { %v6129_v10 = vor.u32 %v6666_v6, %v6126_v52  ;;  %v6618_v6 = vld [vmem:[%s8057_s21 + $0x44] sm:$0xf] }
 0xfac   : > { %5896 = vmatmul.msk.bf16.vlgmr.msra.gmra.mxu2 %vm1946_vm7, %v3471_v34  ;;  %5897 = vmatmul.msk.bf16.vlgmr.msra.gmra.mxu3 %vm1946_vm7, %v3471_v34 }
 0xfad   : > { %4050 = vmatpush.bf16.msrb.mxu3 %v6129_v10 }
 0xfb1   : > { %v3469_v11 = vpop.f32.mrf.mxu1 }
0x102f   : > { %v3504_v46 = vpop.f32.mrf.mxu2  ;;  %v3518_v49 = vpop.f32.mrf.mxu3 }
0x1030   : > { %v3523_v19 = vadd.f32 %v3504_v46, %v8687_v15  ;;  %v3524_v54 = vadd.f32 %v3518_v49, %v8690_v3  ;;  %v3323_v15 = vadd.f32 %v3304_v27, %v3121_v57  ;;  %v3324_v3 = vadd.f32 %v3318_v9, %v3122_v18  ;;  %v5998_v27 = vld [vmem:[%s8057_s21 + $0xd0] sm:$0xf0] }
0x1031   : > { %v6001_v9 = vor.u32 %v6634_v26, %v5998_v27  ;;  %v5933_v26 = vor.u32 %v6620_v51, %v5932_v32  ;;  %v6652_v27 = vld [vmem:[%s8057_s21 + $0x14c] sm:$0xf0]  ;;  %v6006_v32 = vld [vmem:[%s8057_s21 + $0xd8] sm:$0xf0]  ;;  %v6667_v51 = vld [vmem:[%s8057_s21 + $0x1cc] sm:$0xf] }
0x1032   : > { %v3527_v42 = vadd.f32 %v6980_v43, %v3523_v19  ;;  %v3528_v24 = vadd.f32 %v6981_v23, %v3524_v54  ;;  %v6630_v23 = vld [vmem:[%s8057_s21 + $0xa4] sm:$0xf]  ;;  %v6061_v52 = vor.u32 %v6652_v27, %v6060_v53  ;;  %v6134_v53 = vld [vmem:[%s8057_s21 + $0x1d8] sm:$0xf0] }
0x1033   : > { %4036 = vmatpush.bf16.msrb.mxu2 %v6001_v9  ;;  %v5934_v9 = vld [vmem:[%s8057_s21 + $0x50] sm:$0xf0]  ;;  %v6137_v27 = vor.u32 %v6667_v51, %v6134_v53  ;;  %v6070_v53 = vld [vmem:[%s8057_s21 + $0x158] sm:$0xf0] }
0x1034   : > { %v8726_v25 = vadd.f32 %v3533_v21, %v3527_v42  ;;  %v8728_v61 = vadd.f32 %v3534_v31, %v3528_v24  ;;  %v6664_v42 = vld [vmem:[%s8057_s21 + $0x1ac] sm:$0xf0]  ;;  %v5982_v24 = vld [vmem:[%s8057_s21 + $0xb0] sm:$0xf0]  ;;  %v5937_v10 = vor.u32 %v6618_v6, %v5934_v9  ;;  %v5988_v6 = vld [vmem:[%s8057_s21 + $0xa8] sm:$0xf] }
0x1035   : > { %v6109_v57 = vor.u32 %v6664_v42, %v6108_v30  ;;  %v5985_v18 = vor.u32 %v6630_v23, %v5982_v24  ;;  %v6646_v30 = vld [vmem:[%s8057_s21 + $0x124] sm:$0xf]  ;;  %v5900_v23 = vld [vmem:[%s8057_s21] sm:$0xf]  ;;  %v6612_v24 = vld [vmem:[%s8057_s21 + $0xc] sm:$0xf0] }
0x1036   : > { %v3543_v1 = vadd.f32 %v8728_v61, %v8726_v25  ;;  %v6633_v9 = vld [vmem:[%s8057_s21 + $0xb4] sm:$0xf0] }
0x1037   : > { %v3506_v12 = vpop.f32.mrf.mxu2  ;;  %v3520_v29 = vpop.f32.mrf.mxu3  ;;  %4023 = vmatpush.bf16.msrb.mxu1 %v6109_v57  ;;  %4037 = vmatpush.bf16.msrb.mxu2 %v5985_v18  ;;  %v6028_v57 = vld [vmem:[%s8057_s21 + $0x100] sm:$0xf]  ;;  %v5901_v18 = vor.u32 %v6612_v24, %v5900_v23  ;;  %v6661_v23 = vld [vmem:[%s8057_s21 + $0x194] sm:$0xf0]  ;;  %v6627_v24 = vld [vmem:[%s8057_s21 + $0x8c] sm:$0xf] }
0x1038   : > { %v3525_v7 = vadd.f32 %v3506_v12, %v3323_v15  ;;  %v3526_v45 = vadd.f32 %v3520_v29, %v3324_v3  ;;  %3544 = vadd.xlane.f32.xlu0 %v3543_v1  ;;  %v6662_v15 = vld [vmem:[%s8057_s21 + $0x1a4] sm:$0xf]  ;;  %v6110_v3 = vld [vmem:[%s8057_s21 + $0x1b0] sm:$0xf0]  ;;  %v5964_v12 = vld [vmem:[%s8057_s21 + $0x80] sm:$0xf] }
0x1039   : > { %v6113_v1 = vor.u32 %v6662_v15, %v6110_v3  ;;  %v6628_v29 = vld [vmem:[%s8057_s21 + $0x8c] sm:$0xf0]  ;;  %v6610_v3 = vld [vmem:[%s8057_s21 + $0x4] sm:$0xf] }
0x103a   : > { %v3529_v39 = vadd.f32 %v6982_v13, %v3525_v7  ;;  %v3530_v8 = vadd.f32 %v6983_v33, %v3526_v45  ;;  %v6092_v7 = vld [vmem:[%s8057_s21 + $0x180] sm:$0xf]  ;;  %v5965_v45 = vor.u32 %v6628_v29, %v5964_v12  ;;  %v6660_v13 = vld [vmem:[%s8057_s21 + $0x18c] sm:$0xf0]  ;;  %v5966_v33 = vld [vmem:[%s8057_s21 + $0x90] sm:$0xf0] }
0x103b   : > { %4051 = vmatpush.bf16.msrb.mxu3 %v6113_v1  ;;  %v6644_v15 = vld [vmem:[%s8057_s21 + $0x10c] sm:$0xf0]  ;;  %v5902_v1 = vld [vmem:[%s8057_s21 + $0x10] sm:$0xf0] }
0x103c   : > { %v8732_v35 = vadd.f32 %v3533_v21, %v3529_v39  ;;  %v8734_v44 = vadd.f32 %v3534_v31, %v3530_v8  ;;  %v5980_v31 = vld [vmem:[%s8057_s21 + $0xa0] sm:$0xf]  ;;  %v6626_v39 = vld [vmem:[%s8057_s21 + $0x84] sm:$0xf]  ;;  %v6093_v8 = vor.u32 %v6660_v13, %v6092_v7  ;;  %v6029_v12 = vor.u32 %v6644_v15, %v6028_v57  ;;  %v6020_v13 = vld [vmem:[%s8057_s21 + $0xe8] sm:$0xf] }
0x103d   : > { %v5981_v43 = vor.u32 %v6632_v55, %v5980_v31  ;;  %v5905_v29 = vor.u32 %v6610_v3, %v5902_v1  ;;  %v6642_v7 = vld [vmem:[%s8057_s21 + $0x104] sm:$0xf]  ;;  %v6659_v15 = vld [vmem:[%s8057_s21 + $0x18c] sm:$0xf]  ;;  %v6102_v3 = vld [vmem:[%s8057_s21 + $0x198] sm:$0xf0] }
0x103e   : > { %v3546_v36 = vadd.f32 %v8734_v44, %v8732_v35  ;;  %4024 = vmatpush.bf16.msrb.mxu1 %v6093_v8  ;;  %v6148_v8 = vld [vmem:[%s8057_s21 + $0x1e8] sm:$0xf] }
0x103f   : > { %4009 = vmatpush.bf16.msrb.mxu0 %v5981_v43  ;;  %4052 = vmatpush.bf16.msrb.mxu3 %v6097_v37  ;;  %v6046_v43 = vld [vmem:[%s8057_s21 + $0x130] sm:$0xf0]  ;;  %v6639_v37 = vld [vmem:[%s8057_s21 + $0xec] sm:$0xf] }
0x1040   : > { %3547 = vadd.xlane.f32.xlu0 %v3546_v36  ;;  %v5969_v36 = vor.u32 %v6626_v39, %v5966_v33  ;;  %v6049_v42 = vor.u32 %v6646_v30, %v6046_v43  ;;  %v6641_v33 = vld [vmem:[%s8057_s21 + $0xf4] sm:$0xf0]  ;;  %v6025_v41 = vor.u32 %v6639_v37, %v6022_v38  ;;  %v6100_v30 = vld [vmem:[%s8057_s21 + $0x188] sm:$0xf]  ;;  %v6655_v37 = vld [vmem:[%s8057_s21 + $0x16c] sm:$0xf] }
0x1041   : > { %v6021_v50 = vor.u32 %v6641_v33, %v6020_v13  ;;  %v6101_v57 = vor.u32 %v6661_v23, %v6100_v30  ;;  %v6623_v33 = vld [vmem:[%s8057_s21 + $0x6c] sm:$0xf]  ;;  %v6086_v38 = vld [vmem:[%s8057_s21 + $0x178] sm:$0xf0]  ;;  %v6036_v30 = vld [vmem:[%s8057_s21 + $0x108] sm:$0xf] }
0x1042   : > { %4038 = vmatpush.bf16.msrb.mxu2 %v5969_v36  ;;  %4025 = vmatpush.bf16.msrb.mxu1 %v6077_v62  ;;  %v6673_v36 = vld [vmem:[%s8057_s21 + $0x1f4] sm:$0xf0]  ;;  %v6005_v62 = vor.u32 %v6637_v59, %v6004_v58  ;;  %v6068_v59 = vld [vmem:[%s8057_s21 + $0x148] sm:$0xf] }
0x1043   : > { %4010 = vmatpush.bf16.msrb.mxu0 %v5965_v45  ;;  %4053 = vmatpush.bf16.msrb.mxu3 %v6081_v16  ;;  %v6030_v45 = vld [vmem:[%s8057_s21 + $0x110] sm:$0xf0]  ;;  %v6149_v5 = vor.u32 %v6673_v36, %v6148_v8  ;;  %v5958_v8 = vld [vmem:[%s8057_s21 + $0x78] sm:$0xf0]  ;;  %v6621_v58 = vld [vmem:[%s8057_s21 + $0x54] sm:$0xf0] }
0x1044   : > { %v6033_v39 = vor.u32 %v6642_v7, %v6030_v45  ;;  %v6625_v7 = vld [vmem:[%s8057_s21 + $0x74] sm:$0xf0]  ;;  %v6084_v45 = vld [vmem:[%s8057_s21 + $0x168] sm:$0xf] }
0x1046   : > { %4039 = vmatpush.bf16.msrb.mxu2 %v5953_v63  ;;  %4026 = vmatpush.bf16.msrb.mxu1 %v6061_v52  ;;  %v6132_v63 = vld [vmem:[%s8057_s21 + $0x1c8] sm:$0xf] }
0x1047   : > { %4011 = vmatpush.bf16.msrb.mxu0 %v5949_v48  ;;  %v6150_v48 = vld [vmem:[%s8057_s21 + $0x1f8] sm:$0xf0]  ;;  %v6133_v16 = vor.u32 %v6669_v0, %v6132_v63  ;;  %v6116_v52 = vld [vmem:[%s8057_s21 + $0x1a8] sm:$0xf]  ;;  %v6651_v0 = vld [vmem:[%s8057_s21 + $0x14c] sm:$0xf] }
0x1048   : > { %v6153_v60 = vor.u32 %v6671_v40, %v6150_v48  ;;  %v5940_v40 = vld [vmem:[%s8057_s21 + $0x48] sm:$0xf]  ;;  %v6089_v48 = vor.u32 %v6655_v37, %v6086_v38  ;;  %v5942_v63 = vld [vmem:[%s8057_s21 + $0x58] sm:$0xf0] }
0x1049   : > { %v3542_v37 = vld [vmem:[%s892_s28] sm:$0x3] }
0x104a   : > { %4040 = vmatpush.bf16.msrb.mxu2 %v5937_v10  ;;  %v5989_v10 = vor.u32 %v6633_v9, %v5988_v6  ;;  %v6617_v9 = vld [vmem:[%s8057_s21 + $0x34] sm:$0xf0] }
0x104b   : > { %4012 = vmatpush.bf16.msrb.mxu0 %v5933_v26  ;;  %v6009_v26 = vor.u32 %v6635_v28, %v6006_v32  ;;  %v5941_v32 = vor.u32 %v6621_v58, %v5940_v40  ;;  %v3603_v58 = vperm.slane %v3542_v37, 0 }
0x10ab   : > { %v3545_v34 = vpop.xlane.xlu0 %3544 }
0x10ac   : > { %v3549_v11 = vmul.f32 %v3545_v34, %v8138_v2  ;;  %v6650_v34 = vld [vmem:[%s8057_s21 + $0x144] sm:$0xf] }
0x10ae   : > { %v8756_v22 = vsub.f32 %v8726_v25, %v3549_v11  ;;  %v8759_v4 = vsub.f32 %v8728_v61, %v3549_v11  ;;  %v6062_v11 = vld [vmem:[%s8057_s21 + $0x150] sm:$0xf0] }
0x10b0   : > { %v3555_v14 = vmul.f32 %v8756_v22, %v8756_v22  ;;  %v3556_v20 = vmul.f32 %v8759_v4, %v8759_v4 }
0x10b2   : > { %v3559_v56 = vadd.f32 %v3556_v20, %v3555_v14  ;;  %v6065_v14 = vor.u32 %v6650_v34, %v6062_v11  ;;  %v5916_v20 = vld [vmem:[%s8057_s21 + $0x20] sm:$0xf]  ;;  %v6665_v34 = vld [vmem:[%s8057_s21 + $0x1b4] sm:$0xf0]  ;;  %v6631_v11 = vld [vmem:[%s8057_s21 + $0xac] sm:$0xf] }
0x10b3   : > { %v3548_v17 = vpop.xlane.xlu0 %3547 }
0x10b4   : > { %v3550_v47 = vmul.f32 %v3548_v17, %v8138_v2  ;;  %3560 = vadd.xlane.f32.xlu0 %v3559_v56  ;;  %v6616_v56 = vld [vmem:[%s8057_s21 + $0x2c] sm:$0xf0]  ;;  %v6044_v17 = vld [vmem:[%s8057_s21 + $0x120] sm:$0xf]  ;;  %4054 = vmatpush.bf16.msrb.mxu3 %v6065_v14  ;;  %v5990_v14 = vld [vmem:[%s8057_s21 + $0xb8] sm:$0xf0] }
0x10b6   : > { %v8767_v46 = vsub.f32 %v8732_v35, %v3550_v47  ;;  %v8770_v49 = vsub.f32 %v8734_v44, %v3550_v47  ;;  %v5917_v47 = vor.u32 %v6616_v56, %v5916_v20  ;;  %v6117_v56 = vor.u32 %v6665_v34, %v6116_v52  ;;  %v6052_v52 = vld [vmem:[%s8057_s21 + $0x128] sm:$0xf] }
0x10b7   : > { %v6073_v34 = vor.u32 %v6651_v0, %v6070_v53  ;;  %v6689_v53 = vld [vmem:[%s8067_s29 + $0x74] sm:$0xf0] }
0x10b8   : > { %v3557_v19 = vmul.f32 %v8767_v46, %v8767_v46  ;;  %v3558_v21 = vmul.f32 %v8770_v49, %v8770_v49  ;;  %4013 = vmatpush.bf16.msrb.mxu0 %v5917_v47  ;;  %4055 = vmatpush.bf16.msrb.mxu3 %v6049_v42  ;;  %v6663_v47 = vld [vmem:[%s8057_s21 + $0x1ac] sm:$0xf] }
0x10ba   : > { %v3562_v54 = vadd.f32 %v3558_v21, %v3557_v19  ;;  %v6648_v19 = vld [vmem:[%s8057_s21 + $0x12c] sm:$0xf0]  ;;  %v6614_v21 = vld [vmem:[%s8057_s21 + $0x24] sm:$0xf] }
0x10bb   : > { %v6045_v31 = vor.u32 %v6648_v19, %v6044_v17  ;;  %v5993_v17 = vor.u32 %v6631_v11, %v5990_v14  ;;  %v6118_v19 = vld [vmem:[%s8057_s21 + $0x1b8] sm:$0xf0]  ;;  %v6615_v11 = vld [vmem:[%s8057_s21 + $0x2c] sm:$0xf] }
0x10bc   : > { %3563 = vadd.xlane.f32.xlu2 %v3562_v54  ;;  %v5918_v54 = vld [vmem:[%s8057_s21 + $0x30] sm:$0xf0]  ;;  %4014 = vmatpush.bf16.msrb.mxu0 %v5901_v18  ;;  %v5974_v18 = vld [vmem:[%s8057_s21 + $0x98] sm:$0xf0] }
0x10bd   : > { %v5921_v55 = vor.u32 %v6614_v21, %v5918_v54  ;;  %4027 = vmatpush.bf16.msrb.mxu1 %v6045_v31  ;;  %4056 = vmatpush.bf16.msrb.mxu3 %v6033_v39  ;;  %v6121_v54 = vor.u32 %v6663_v47, %v6118_v19  ;;  %v5972_v31 = vld [vmem:[%s8057_s21 + $0x88] sm:$0xf]  ;;  %v5977_v1 = vor.u32 %v6627_v24, %v5974_v18  ;;  %v6657_v39 = vld [vmem:[%s8057_s21 + $0x174] sm:$0xf0]  ;;  %v5926_v14 = vld [vmem:[%s8057_s21 + $0x38] sm:$0xf0] }
0x10be   : > { %v6611_v24 = vld [vmem:[%s8057_s21 + $0xc] sm:$0xf] }
0x10bf   : > { %4041 = vmatpush.bf16.msrb.mxu2 %v5921_v55  ;;  %v6629_v55 = vld [vmem:[%s8057_s21 + $0x94] sm:$0xf0] }
0x10c0   : > { %4063 = vmatpush.bf16.msra.mxu0 %v6021_v50  ;;  %v5973_v42 = vor.u32 %v6629_v55, %v5972_v31  ;;  %v6085_v50 = vor.u32 %v6657_v39, %v6084_v45  ;;  %v5929_v55 = vor.u32 %v6615_v11, %v5926_v14  ;;  %v6705_v11 = vld [vmem:[%s8067_s29 + $0xf4] sm:$0xf0] }
0x10c1   : > { %4028 = vmatpush.bf16.msrb.mxu1 %v6029_v12  ;;  %4105 = vmatpush.bf16.msra.mxu3 %v6153_v60  ;;  %v6105_v12 = vor.u32 %v6659_v15, %v6102_v3  ;;  %v6653_v60 = vld [vmem:[%s8057_s21 + $0x154] sm:$0xf0]  ;;  %v6643_v15 = vld [vmem:[%s8057_s21 + $0x10c] sm:$0xf]  ;;  %v6038_v3 = vld [vmem:[%s8057_s21 + $0x118] sm:$0xf0] }
0x10c2   : > { %v6069_v51 = vor.u32 %v6653_v60, %v6068_v59  ;;  %v6041_v39 = vor.u32 %v6643_v15, %v6038_v3  ;;  %v3604_v59 = vperm.slane %v3542_v37, 1  ;;  %v6721_v3 = vld [vmem:[%s8067_s29 + $0x174] sm:$0xf0]  ;;  %v6404_v37 = vld [vmem:[%s8067_s29 + $0x1f0] sm:$0xf] }
0x10c3   : > { %4042 = vmatpush.bf16.msrb.mxu2 %v5905_v29  ;;  %v5956_v29 = vld [vmem:[%s8057_s21 + $0x68] sm:$0xf] }
0x10c4   : > { %4064 = vmatpush.bf16.msra.mxu0 %v6005_v62  ;;  %v5957_v13 = vor.u32 %v6625_v7, %v5956_v29  ;;  %v6619_v62 = vld [vmem:[%s8057_s21 + $0x4c] sm:$0xf] }
0x10c5   : > { %4077 = vmatpush.bf16.msra.mxu1 %v6149_v5  ;;  %4106 = vmatpush.bf16.msra.mxu3 %v6137_v27  ;;  %v5961_v5 = vor.u32 %v6623_v33, %v5958_v8  ;;  %v5945_v6 = vor.u32 %v6619_v62, %v5942_v63  ;;  %v3541_v8 = vld [vmem:[%s882_s22] sm:$0x3] }
0x10c6   : > { %v3594_v38 = vperm.slane %v3541_v8, 0  ;;  %v3595_v40 = vperm.slane %v3541_v8, 1  ;;  %v6719_v8 = vld [vmem:[%s8067_s29 + $0x164] sm:$0xf0] }
0x10c7   : > { %4091 = vmatpush.bf16.msra.mxu2 %v6025_v41 }
0x10c8   : > { %4065 = vmatpush.bf16.msra.mxu0 %v5989_v10  ;;  %v6649_v10 = vld [vmem:[%s8057_s21 + $0x134] sm:$0xf0] }
0x10c9   : > { %4078 = vmatpush.bf16.msra.mxu1 %v6133_v16  ;;  %4107 = vmatpush.bf16.msra.mxu3 %v6121_v54  ;;  %v6053_v19 = vor.u32 %v6649_v10, %v6052_v52  ;;  %v6613_v54 = vld [vmem:[%s8057_s21 + $0x14] sm:$0xf0]  ;;  %v6204_v10 = vld [vmem:[%s8067_s29 + $0x60] sm:$0xf] }
0x10cb   : > { %4092 = vmatpush.bf16.msra.mxu2 %v6009_v26  ;;  %v5924_v26 = vld [vmem:[%s8057_s21 + $0x28] sm:$0xf] }
0x10cc   : > { %4066 = vmatpush.bf16.msra.mxu0 %v5973_v42  ;;  %v5925_v47 = vor.u32 %v6617_v9, %v5924_v26  ;;  %v6645_v42 = vld [vmem:[%s8057_s21 + $0x114] sm:$0xf0] }
0x10cd   : > { %4079 = vmatpush.bf16.msra.mxu1 %v6117_v56  ;;  %4108 = vmatpush.bf16.msra.mxu3 %v6105_v12  ;;  %v6647_v56 = vld [vmem:[%s8057_s21 + $0x12c] sm:$0xf]  ;;  %v6037_v29 = vor.u32 %v6645_v42, %v6036_v30  ;;  %v6260_v30 = vld [vmem:[%s8067_s29 + $0xd0] sm:$0xf]  ;;  %v6701_v42 = vld [vmem:[%s8067_s29 + $0xd4] sm:$0xf0] }
0x10cf   : > { %4093 = vmatpush.bf16.msra.mxu2 %v5993_v17  ;;  %v6054_v17 = vld [vmem:[%s8057_s21 + $0x138] sm:$0xf0] }
0x10d0   : > { %4067 = vmatpush.bf16.msra.mxu0 %v5957_v13  ;;  %v6057_v23 = vor.u32 %v6647_v56, %v6054_v17  ;;  %v6685_v56 = vld [vmem:[%s8067_s29 + $0x54] sm:$0xf0] }
0x10d1   : > { %4080 = vmatpush.bf16.msra.mxu1 %v6101_v57  ;;  %4109 = vmatpush.bf16.msra.mxu3 %v6089_v48  ;;  %v5910_v57 = vld [vmem:[%s8057_s21 + $0x18] sm:$0xf0] }
0x10d2   : > { %v5913_v13 = vor.u32 %v6611_v24, %v5910_v57  ;;  %v6180_v24 = vld [vmem:[%s8067_s29 + $0x30] sm:$0xf]  ;;  %v6681_v57 = vld [vmem:[%s8067_s29 + $0x34] sm:$0xf0] }
0x10d3   : > { %4094 = vmatpush.bf16.msra.mxu2 %v5977_v1  ;;  %v6181_v15 = vor.u32 %v6681_v57, %v6180_v24  ;;  %v6731_v24 = vld [vmem:[%s8067_s29 + $0x1c4] sm:$0xf0]  ;;  %v6704_v57 = vld [vmem:[%s8067_s29 + $0xf4] sm:$0xf] }
0x10d4   : > { %4068 = vmatpush.bf16.msra.mxu0 %v5941_v32 }
0x10d5   : > { %4081 = vmatpush.bf16.msra.mxu1 %v6085_v50  ;;  %4110 = vmatpush.bf16.msra.mxu3 %v6073_v34  ;;  %v6687_v34 = vld [vmem:[%s8067_s29 + $0x64] sm:$0xf0] }
0x10d7   : > { %4095 = vmatpush.bf16.msra.mxu2 %v5961_v5 }
0x10d8   : > { %4069 = vmatpush.bf16.msra.mxu0 %v5925_v47  ;;  %v6268_v47 = vld [vmem:[%s8067_s29 + $0xe0] sm:$0xf] }
0x10d9   : > { %4082 = vmatpush.bf16.msra.mxu1 %v6069_v51  ;;  %4111 = vmatpush.bf16.msra.mxu3 %v6057_v23  ;;  %v6261_v23 = vor.u32 %v6701_v42, %v6260_v30  ;;  %v6691_v30 = vld [vmem:[%s8067_s29 + $0x84] sm:$0xf0]  ;;  %v6380_v42 = vld [vmem:[%s8067_s29 + $0x1c0] sm:$0xf] }
0x10db   : > { %4096 = vmatpush.bf16.msra.mxu2 %v5945_v6 }
0x10dd   : > { %4083 = vmatpush.bf16.msra.mxu1 %v6053_v19  ;;  %4112 = vmatpush.bf16.msra.mxu3 %v6041_v39  ;;  %v6703_v19 = vld [vmem:[%s8067_s29 + $0xe4] sm:$0xf0]  ;;  %v6332_v39 = vld [vmem:[%s8067_s29 + $0x160] sm:$0xf] }
0x10df   : > { %4097 = vmatpush.bf16.msra.mxu2 %v5929_v55 }
0x10e1   : > { %4084 = vmatpush.bf16.msra.mxu1 %v6037_v29  ;;  %v6699_v29 = vld [vmem:[%s8067_s29 + $0xc4] sm:$0xf0] }
0x10e3   : > { %4098 = vmatpush.bf16.msra.mxu2 %v5913_v13  ;;  %v6679_v13 = vld [vmem:[%s8067_s29 + $0x24] sm:$0xf0] }
0x1127   : > { %v3561_v20 = vpop.xlane.xlu0 %3560 }
0x1128   : > { %v3565_v21 = vmul.f32 %v3561_v20, %v8138_v2 }
0x112a   : > { %v8852_v43 = vadd.f32 1e-06, %v3565_v21  ;;  %v5908_v21 = vld [vmem:[%s8057_s21 + $0x8] sm:$0xf] }
0x112b   : > { %v5909_v12 = vor.u32 %v6613_v54, %v5908_v21  ;;  %v6269_v21 = vor.u32 %v6703_v19, %v6268_v47  ;;  %v6188_v54 = vld [vmem:[%s8067_s29 + $0x40] sm:$0xf]  ;;  %v8957_v47 = vld [vmem:[%s8064_s25] sm:$0xf] }
0x112c   : > { %6960 = vrsqrt.f32 %v8852_v43  ;;  %vm3575_vm8 = vweird.f32 %v8852_v43 }
0x112d   : > { %4070 = vmatpush.bf16.msra.mxu0 %v5909_v12  ;;  %v6252_v12 = vld [vmem:[%s8067_s29 + $0xc0] sm:$0xf] }
0x112f   : > { %v3564_v36 = vpop.xlane.xlu2 %3563 }
0x1130   : > { %v3566_v41 = vmul.f32 %v3564_v36, %v8138_v2 }
0x1132   : > { %v6961_v28 = vpop.eup %6960  ;;  %v8876_v16 = vadd.f32 1e-06, %v3566_v41 }
0x1133   : > { %v3570_v27 = vmul.f32 %v6961_v28, %v8852_v43  ;;  %vm3576_vm7 = vweird.f32 %v6961_v28 }
0x1134   : > { %6962 = vrsqrt.f32 %v8876_v16  ;;  %vm3577_vm9 = vmor %vm3575_vm8, %vm3576_vm7  ;;  %vm3585_vm10 = vweird.f32 %v8876_v16 }
0x1135   : > { %v3571_v20 = vmul.f32 %v6961_v28, %v3570_v27 }
0x1137   : > { %v3572_v31 = vmul.f32 0.5, %v3571_v20  ;;  %v6196_v20 = vld [vmem:[%s8067_s29 + $0x50] sm:$0xf] }
0x1138   : > { %v6197_v17 = vor.u32 %v6685_v56, %v6196_v20  ;;  %v6308_v56 = vld [vmem:[%s8067_s29 + $0x130] sm:$0xf] }
0x1139   : > { %v3573_v18 = vsub.f32 1.5, %v3572_v31  ;;  %v6683_v31 = vld [vmem:[%s8067_s29 + $0x44] sm:$0xf0] }
0x113a   : > { %v6963_v1 = vpop.eup %6962  ;;  %v6189_v55 = vor.u32 %v6683_v31, %v6188_v54  ;;  %v6206_v54 = vld [vmem:[%s8067_s29 + $0x68] sm:$0xf0] }
0x113b   : > { %v3574_v7 = vmul.f32 %v6961_v28, %v3573_v18  ;;  %v3580_v45 = vmul.f32 %v6963_v1, %v8876_v16  ;;  %vm3586_vm6 = vweird.f32 %v6963_v1  ;;  %v6340_v18 = vld [vmem:[%s8067_s29 + $0x170] sm:$0xf] }
0x113c   : > { %vm3587_vm11 = vmor %vm3585_vm10, %vm3586_vm6 }
0x113d   : > { %v3581_v33 = vmul.f32 %v6963_v1, %v3580_v45  ;;  %v3578_v36 = vsel %vm3577_vm9, %v6961_v28, %v3574_v7  ;;  %v6253_v7 = vor.u32 %v6699_v29, %v6252_v12  ;;  %v6172_v45 = vld [vmem:[%s8067_s29 + $0x20] sm:$0xf]  ;;  %v6711_v12 = vld [vmem:[%s8067_s29 + $0x124] sm:$0xf0]  ;;  %v3679_v29 = vperm.slane %v8957_v47, 0 }
0x113e   : > { %v3589_v43 = vmul.f32 %v3578_v36, %v8756_v22  ;;  %v3590_v41 = vmul.f32 %v3578_v36, %v8759_v4  ;;  %v6212_v22 = vld [vmem:[%s8067_s29 + $0x70] sm:$0xf]  ;;  %v6333_v36 = vor.u32 %v6719_v8, %v6332_v39  ;;  %v6729_v8 = vld [vmem:[%s8067_s29 + $0x1b4] sm:$0xf0] }
0x113f   : > { %v3582_v50 = vmul.f32 0.5, %v3581_v33  ;;  %v6213_v52 = vor.u32 %v6689_v53, %v6212_v22  ;;  %v6173_v33 = vor.u32 %v6679_v13, %v6172_v45  ;;  %v6156_v53 = vld [vmem:[%s8067_s29] sm:$0xf]  ;;  %v6684_v45 = vld [vmem:[%s8067_s29 + $0x54] sm:$0xf] }
0x1140   : > { %v3598_v62 = vmul.f32 %v3594_v38, %v3589_v43  ;;  %v3599_v63 = vmul.f32 %v3595_v40, %v3590_v41  ;;  %v6164_v41 = vld [vmem:[%s8067_s29 + $0x10] sm:$0xf]  ;;  %v6198_v13 = vld [vmem:[%s8067_s29 + $0x58] sm:$0xf0] }
0x1141   : > { %v3583_v5 = vsub.f32 1.5, %v3582_v50  ;;  %v6244_v50 = vld [vmem:[%s8067_s29 + $0xb0] sm:$0xf]  ;;  %v6201_v39 = vor.u32 %v6684_v45, %v6198_v13 }
0x1142   : > { %v3607_v4 = vadd.f32 %v3603_v58, %v3598_v62  ;;  %v3608_v26 = vadd.f32 %v3604_v59, %v3599_v63  ;;  %v6236_v63 = vld [vmem:[%s8067_s29 + $0xa0] sm:$0xf] }
0x1143   : > { %v3584_v48 = vmul.f32 %v6963_v1, %v3583_v5  ;;  %v6697_v5 = vld [vmem:[%s8067_s29 + $0xb4] sm:$0xf0] }
0x1145   : > { %v3588_v60 = vsel %vm3587_vm11, %v6963_v1, %v3584_v48  ;;  %v6341_v1 = vor.u32 %v6721_v3, %v6340_v18  ;;  %v6677_v48 = vld [vmem:[%s8067_s29 + $0x14] sm:$0xf0]  ;;  %v6278_v18 = vld [vmem:[%s8067_s29 + $0xf8] sm:$0xf0] }
0x1146   : > { %v3591_v0 = vmul.f32 %v3588_v60, %v8767_v46  ;;  %v3592_v28 = vmul.f32 %v3588_v60, %v8770_v49  ;;  %v6205_v46 = vor.u32 %v6687_v34, %v6204_v10  ;;  %v6276_v49 = vld [vmem:[%s8067_s29 + $0xf0] sm:$0xf]  ;;  %v6717_v60 = vld [vmem:[%s8067_s29 + $0x154] sm:$0xf0]  ;;  %v6281_v3 = vor.u32 %v6704_v57, %v6278_v18  ;;  %v6678_v57 = vld [vmem:[%s8067_s29 + $0x24] sm:$0xf] }
0x1147   : > { %v6277_v14 = vor.u32 %v6705_v11, %v6276_v49  ;;  %v6228_v34 = vld [vmem:[%s8067_s29 + $0x90] sm:$0xf]  ;;  %v6174_v18 = vld [vmem:[%s8067_s29 + $0x28] sm:$0xf0] }
0x1148   : > { %v3600_v32 = vmul.f32 %v3594_v38, %v3591_v0  ;;  %v3601_v51 = vmul.f32 %v3595_v40, %v3592_v28  ;;  %v6245_v38 = vor.u32 %v6697_v5, %v6244_v50  ;;  %v6737_v40 = vld [vmem:[%s8067_s29 + $0x1f4] sm:$0xf0]  ;;  %v6695_v0 = vld [vmem:[%s8067_s29 + $0xa4] sm:$0xf0]  ;;  %v6396_v28 = vld [vmem:[%s8067_s29 + $0x1e0] sm:$0xf] }
0x1149   : > { %v6405_v43 = vor.u32 %v6737_v40, %v6404_v37  ;;  %v6388_v11 = vld [vmem:[%s8067_s29 + $0x1d0] sm:$0xf]  ;;  %v6702_v50 = vld [vmem:[%s8067_s29 + $0xe4] sm:$0xf]  ;;  %v6270_v5 = vld [vmem:[%s8067_s29 + $0xe8] sm:$0xf0] }
0x114a   : > { %v3609_v27 = vadd.f32 %v3603_v58, %v3600_v32  ;;  %v3610_v16 = vadd.f32 %v3604_v59, %v3601_v51  ;;  %v6165_v58 = vor.u32 %v6677_v48, %v6164_v41  ;;  %v6324_v59 = vld [vmem:[%s8067_s29 + $0x150] sm:$0xf]  ;;  %v6237_v32 = vor.u32 %v6695_v0, %v6236_v63  ;;  %v6735_v51 = vld [vmem:[%s8067_s29 + $0x1e4] sm:$0xf0]  ;;  %v6709_v41 = vld [vmem:[%s8067_s29 + $0x114] sm:$0xf0] }
0x114b   : > { %v6325_v62 = vor.u32 %v6717_v60, %v6324_v59  ;;  %v6397_v22 = vor.u32 %v6735_v51, %v6396_v28  ;;  %v6273_v40 = vor.u32 %v6702_v50, %v6270_v5  ;;  %v6682_v59 = vld [vmem:[%s8067_s29 + $0x44] sm:$0xf]  ;;  %v6190_v60 = vld [vmem:[%s8067_s29 + $0x48] sm:$0xf0]  ;;  %v6364_v63 = vld [vmem:[%s8067_s29 + $0x1a0] sm:$0xf] }
0x114c   : > { %v3611_v6 = vpack.c.bf16 %v3609_v27, %v3607_v4  ;;  %v3612_v9 = vpack.c.bf16 %v3610_v16, %v3608_v26  ;;  %v6675_v4 = vld [vmem:[%s8067_s29 + $0x4] sm:$0xf0]  ;;  %v6316_v26 = vld [vmem:[%s8067_s29 + $0x140] sm:$0xf]  ;;  %v6700_v51 = vld [vmem:[%s8067_s29 + $0xd4] sm:$0xf] }
0x114d   : > { %v6157_v27 = vor.u32 %v6675_v4, %v6156_v53  ;;  %v6715_v16 = vld [vmem:[%s8067_s29 + $0x144] sm:$0xf0]  ;;  %v3680_v53 = vperm.slane %v8957_v47, 1  ;;  %v3681_v50 = vperm.slane %v8957_v47, 2 }
0x114e   : > { %4015 = vmatmul.bf16.vlgmr.msrb.gmra.mxu0 %v3611_v6  ;;  %4029 = vmatmul.bf16.vlgmr.msrb.gmra.mxu1 %v3612_v9  ;;  %v6727_v0 = vld [vmem:[%s8067_s29 + $0x1a4] sm:$0xf0] }
0x114f   : > { %4043 = vmatmul.bf16.vlgmr.msrb.gmra.mxu2 %v3611_v6  ;;  %4057 = vmatmul.bf16.vlgmr.msrb.gmra.mxu3 %v3612_v9 }
0x1150   : > { %4585 = vmatpush.bf16.msrb.mxu0 %v6213_v52  ;;  %4599 = vmatpush.bf16.msrb.mxu1 %v6277_v14  ;;  %v6317_v52 = vor.u32 %v6715_v16, %v6316_v26  ;;  %v6733_v14 = vld [vmem:[%s8067_s29 + $0x1d4] sm:$0xf0]  ;;  %v6284_v26 = vld [vmem:[%s8067_s29 + $0x100] sm:$0xf] }
0x1151   : > { %4613 = vmatpush.bf16.msrb.mxu2 %v6341_v1  ;;  %4627 = vmatpush.bf16.msrb.mxu3 %v6405_v43  ;;  %v6389_v20 = vor.u32 %v6733_v14, %v6388_v11  ;;  %v6300_v1 = vld [vmem:[%s8067_s29 + $0x120] sm:$0xf]  ;;  %v6292_v43 = vld [vmem:[%s8067_s29 + $0x110] sm:$0xf]  ;;  %v6725_v11 = vld [vmem:[%s8067_s29 + $0x194] sm:$0xf0] }
0x1154   : > { %4586 = vmatpush.bf16.msrb.mxu0 %v6205_v46  ;;  %4600 = vmatpush.bf16.msrb.mxu1 %v6269_v21  ;;  %v6693_v46 = vld [vmem:[%s8067_s29 + $0x94] sm:$0xf0]  ;;  %v6686_v21 = vld [vmem:[%s8067_s29 + $0x64] sm:$0xf] }
0x1155   : > { %4614 = vmatpush.bf16.msrb.mxu2 %v6333_v36  ;;  %4628 = vmatpush.bf16.msrb.mxu3 %v6397_v22  ;;  %v6229_v49 = vor.u32 %v6693_v46, %v6228_v34  ;;  %v6209_v31 = vor.u32 %v6686_v21, %v6206_v54  ;;  %v6262_v22 = vld [vmem:[%s8067_s29 + $0xd8] sm:$0xf0]  ;;  %v6698_v21 = vld [vmem:[%s8067_s29 + $0xc4] sm:$0xf]  ;;  %v6254_v54 = vld [vmem:[%s8067_s29 + $0xc8] sm:$0xf0] }
0x1156   : > { %v6265_v4 = vor.u32 %v6700_v51, %v6262_v22  ;;  %v6342_v46 = vld [vmem:[%s8067_s29 + $0x178] sm:$0xf0] }
0x1158   : > { %4587 = vmatpush.bf16.msrb.mxu0 %v6197_v17  ;;  %4601 = vmatpush.bf16.msrb.mxu1 %v6261_v23  ;;  %v6713_v17 = vld [vmem:[%s8067_s29 + $0x134] sm:$0xf0] }
0x1159   : > { %4615 = vmatpush.bf16.msrb.mxu2 %v6325_v62  ;;  %v6309_v19 = vor.u32 %v6713_v17, %v6308_v56  ;;  %4629 = vmatpush.bf16.msrb.mxu3 %v6389_v20  ;;  %v6193_v62 = vor.u32 %v6682_v59, %v6190_v60  ;;  %v6166_v59 = vld [vmem:[%s8067_s29 + $0x18] sm:$0xf0] }
0x115c   : > { %4588 = vmatpush.bf16.msrb.mxu0 %v6189_v55  ;;  %4602 = vmatpush.bf16.msrb.mxu1 %v6253_v7  ;;  %v6220_v55 = vld [vmem:[%s8067_s29 + $0x80] sm:$0xf]  ;;  %v6301_v7 = vor.u32 %v6711_v12, %v6300_v1  ;;  %v6718_v1 = vld [vmem:[%s8067_s29 + $0x164] sm:$0xf]  ;;  %v6334_v12 = vld [vmem:[%s8067_s29 + $0x168] sm:$0xf0] }
0x115d   : > { %4616 = vmatpush.bf16.msrb.mxu2 %v6317_v52  ;;  %v6221_v23 = vor.u32 %v6691_v30, %v6220_v55  ;;  %v6182_v52 = vld [vmem:[%s8067_s29 + $0x38] sm:$0xf0] }
0x115e   : > { %4071 = vmatmul.bf16.vlgmr.msra.gmra.mxu0 %v3611_v6  ;;  %4085 = vmatmul.bf16.vlgmr.msra.gmra.mxu1 %v3612_v9 }
0x115f   : > { %4099 = vmatmul.bf16.vlgmr.msra.gmra.mxu2 %v3611_v6  ;;  %4113 = vmatmul.bf16.vlgmr.msra.gmra.mxu3 %v3612_v9  ;;  %v6688_v6 = vld [vmem:[%s8067_s29 + $0x74] sm:$0xf]  ;;  %v6214_v9 = vld [vmem:[%s8067_s29 + $0x78] sm:$0xf0] }
0x1160   : > { %4589 = vmatpush.bf16.msrb.mxu0 %v6181_v15  ;;  %4603 = vmatpush.bf16.msrb.mxu1 %v6245_v38  ;;  %v6217_v10 = vor.u32 %v6688_v6, %v6214_v9  ;;  %v6381_v15 = vor.u32 %v6731_v24, %v6380_v42  ;;  %v6680_v9 = vld [vmem:[%s8067_s29 + $0x34] sm:$0xf]  ;;  %v6257_v42 = vor.u32 %v6698_v21, %v6254_v54  ;;  %v6714_v21 = vld [vmem:[%s8067_s29 + $0x144] sm:$0xf]  ;;  %v6318_v54 = vld [vmem:[%s8067_s29 + $0x148] sm:$0xf0] }
0x1161   : > { %4617 = vmatpush.bf16.msrb.mxu2 %v6309_v19  ;;  %v6185_v34 = vor.u32 %v6680_v9, %v6182_v52 }
0x1162   : > { %4630 = vmatpush.bf16.msrb.mxu3 %v6381_v15 }
0x1164   : > { %4590 = vmatpush.bf16.msrb.mxu0 %v6173_v33  ;;  %4604 = vmatpush.bf16.msrb.mxu1 %v6237_v32  ;;  %v6372_v33 = vld [vmem:[%s8067_s29 + $0x1b0] sm:$0xf]  ;;  %v6365_v32 = vor.u32 %v6727_v0, %v6364_v63  ;;  %v6716_v63 = vld [vmem:[%s8067_s29 + $0x154] sm:$0xf]  ;;  %v6326_v0 = vld [vmem:[%s8067_s29 + $0x158] sm:$0xf0] }
0x1165   : > { %v6373_v36 = vor.u32 %v6729_v8, %v6372_v33  ;;  %4618 = vmatpush.bf16.msrb.mxu2 %v6301_v7  ;;  %v6348_v7 = vld [vmem:[%s8067_s29 + $0x180] sm:$0xf]  ;;  %v6696_v33 = vld [vmem:[%s8067_s29 + $0xb4] sm:$0xf]  ;;  %v6246_v8 = vld [vmem:[%s8067_s29 + $0xb8] sm:$0xf0] }
0x1167   : > { %4631 = vmatpush.bf16.msrb.mxu3 %v6373_v36 }
0x1168   : > { %4591 = vmatpush.bf16.msrb.mxu0 %v6165_v58  ;;  %4605 = vmatpush.bf16.msrb.mxu1 %v6229_v49  ;;  %v6293_v58 = vor.u32 %v6709_v41, %v6292_v43  ;;  %v6356_v49 = vld [vmem:[%s8067_s29 + $0x190] sm:$0xf] }
0x1169   : > { %v6357_v19 = vor.u32 %v6725_v11, %v6356_v49 }
0x116a   : > { %4619 = vmatpush.bf16.msrb.mxu2 %v6293_v58  ;;  %v6676_v58 = vld [vmem:[%s8067_s29 + $0x14] sm:$0xf] }
0x116b   : > { %4632 = vmatpush.bf16.msrb.mxu3 %v6365_v32 }
0x116c   : > { %4592 = vmatpush.bf16.msrb.mxu0 %v6157_v27  ;;  %4606 = vmatpush.bf16.msrb.mxu1 %v6221_v23  ;;  %v6707_v27 = vld [vmem:[%s8067_s29 + $0x104] sm:$0xf0] }
0x116d   : > { %v6285_v6 = vor.u32 %v6707_v27, %v6284_v26  ;;  %v6694_v26 = vld [vmem:[%s8067_s29 + $0xa4] sm:$0xf]  ;;  %v6238_v27 = vld [vmem:[%s8067_s29 + $0xa8] sm:$0xf0] }
0x116f   : > { %4620 = vmatpush.bf16.msrb.mxu2 %v6285_v6  ;;  %4633 = vmatpush.bf16.msrb.mxu3 %v6357_v19 }
0x1170   : > { %4641 = vmatpush.bf16.msra.mxu0 %v6217_v10  ;;  %4655 = vmatpush.bf16.msra.mxu1 %v6281_v3  ;;  %v6720_v10 = vld [vmem:[%s8067_s29 + $0x174] sm:$0xf]  ;;  %v6177_v3 = vor.u32 %v6678_v57, %v6174_v18 }
0x1171   : > { %v6345_v17 = vor.u32 %v6720_v10, %v6342_v46  ;;  %v6398_v46 = vld [vmem:[%s8067_s29 + $0x1e8] sm:$0xf0] }
0x1173   : > { %4669 = vmatpush.bf16.msra.mxu2 %v6345_v17 }
0x1174   : > { %4642 = vmatpush.bf16.msra.mxu0 %v6209_v31  ;;  %4656 = vmatpush.bf16.msra.mxu1 %v6273_v40  ;;  %v6406_v40 = vld [vmem:[%s8067_s29 + $0x1f8] sm:$0xf0] }
0x1178   : > { %4643 = vmatpush.bf16.msra.mxu0 %v6201_v39  ;;  %4657 = vmatpush.bf16.msra.mxu1 %v6265_v4  ;;  %v6723_v39 = vld [vmem:[%s8067_s29 + $0x184] sm:$0xf0]  ;;  %v6329_v4 = vor.u32 %v6716_v63, %v6326_v0  ;;  %v6382_v63 = vld [vmem:[%s8067_s29 + $0x1c8] sm:$0xf0] }
0x1179   : > { %v6349_v5 = vor.u32 %v6723_v39, %v6348_v7  ;;  %v6712_v39 = vld [vmem:[%s8067_s29 + $0x134] sm:$0xf] }
0x117b   : > { %4634 = vmatpush.bf16.msrb.mxu3 %v6349_v5 }
0x117c   : > { %4644 = vmatpush.bf16.msra.mxu0 %v6193_v62  ;;  %4658 = vmatpush.bf16.msra.mxu1 %v6257_v42  ;;  %v6169_v62 = vor.u32 %v6676_v58, %v6166_v59  ;;  %v6692_v42 = vld [vmem:[%s8067_s29 + $0x94] sm:$0xf] }
0x1180   : > { %4645 = vmatpush.bf16.msra.mxu0 %v6185_v34  ;;  %v6241_v34 = vor.u32 %v6694_v26, %v6238_v27 }
0x1184   : > { %4646 = vmatpush.bf16.msra.mxu0 %v6177_v3  ;;  %v3682_v3 = vperm.slane %v8957_v47, 3 }
0x1188   : > { %4647 = vmatpush.bf16.msra.mxu0 %v6169_v62 }
0x11cb   : > { %v4016_v37 = vpop.f32.mrf.mxu0  ;;  %v4030_v38 = vpop.f32.mrf.mxu1 }
0x11cc   : > { %v4017_v48 = vadd.f32 %v4016_v37, %v3679_v29  ;;  %v6249_v37 = vor.u32 %v6696_v33, %v6246_v8  ;;  %v6310_v33 = vld [vmem:[%s8067_s29 + $0x138] sm:$0xf0] }
0x11ce   : > { %v8984_v28 = vadd.f32 %v4030_v38, %v4017_v48  ;;  %v6736_v38 = vld [vmem:[%s8067_s29 + $0x1f4] sm:$0xf]  ;;  %4659 = vmatpush.bf16.msra.mxu1 %v6249_v37 }
0x11cf   : > { %v6409_v48 = vor.u32 %v6736_v38, %v6406_v40 }
0x11d0   : > { %v4119_v16 = vmul.f32 %v8984_v28, %v8984_v28 }
0x11d1   : > { %4683 = vmatpush.bf16.msra.mxu3 %v6409_v48  ;;  %v6730_v48 = vld [vmem:[%s8067_s29 + $0x1c4] sm:$0xf] }
0x11d2   : > { %v4127_v14 = vmul.f32 %v4119_v16, %v8984_v28  ;;  %v4044_v20 = vpop.f32.mrf.mxu2  ;;  %v4058_v56 = vpop.f32.mrf.mxu3  ;;  %v6734_v16 = vld [vmem:[%s8067_s29 + $0x1e4] sm:$0xf]  ;;  %4660 = vmatpush.bf16.msra.mxu1 %v6241_v34  ;;  %v6374_v34 = vld [vmem:[%s8067_s29 + $0x1b8] sm:$0xf0] }
0x11d3   : > { %v4045_v31 = vadd.f32 %v4044_v20, %v3680_v53  ;;  %v4018_v55 = vpop.f32.mrf.mxu0  ;;  %v4032_v30 = vpop.f32.mrf.mxu1  ;;  %v6674_v20 = vld [vmem:[%s8067_s29 + $0x4] sm:$0xf] }
0x11d4   : > { %v4135_v23 = vmul.f32 0.044715, %v4127_v14  ;;  %v4019_v24 = vadd.f32 %v4018_v55, %v3679_v29  ;;  %v6337_v29 = vor.u32 %v6718_v1, %v6334_v12  ;;  %v6401_v14 = vor.u32 %v6734_v16, %v6398_v46  ;;  %v6390_v12 = vld [vmem:[%s8067_s29 + $0x1d8] sm:$0xf0] }
0x11d5   : > { %v9008_v15 = vadd.f32 %v4058_v56, %v4045_v31  ;;  %v6158_v56 = vld [vmem:[%s8067_s29 + $0x8] sm:$0xf0] }
0x11d6   : > { %v4143_v45 = vadd.f32 %v4135_v23, %v8984_v28  ;;  %v9014_v13 = vadd.f32 %v4032_v30, %v4019_v24  ;;  %4670 = vmatpush.bf16.msra.mxu2 %v6337_v29  ;;  %v6161_v19 = vor.u32 %v6674_v20, %v6158_v56  ;;  %4684 = vmatpush.bf16.msra.mxu3 %v6401_v14  ;;  %v6230_v23 = vld [vmem:[%s8067_s29 + $0x98] sm:$0xf0]  ;;  %v6732_v24 = vld [vmem:[%s8067_s29 + $0x1d4] sm:$0xf] }
0x11d7   : > { %v4120_v36 = vmul.f32 %v9008_v15, %v9008_v15  ;;  %v6321_v30 = vor.u32 %v6714_v21, %v6318_v54  ;;  %v6233_v1 = vor.u32 %v6692_v42, %v6230_v23  ;;  %v6393_v29 = vor.u32 %v6732_v24, %v6390_v12  ;;  %v6726_v42 = vld [vmem:[%s8067_s29 + $0x1a4] sm:$0xf] }
0x11d8   : > { %v4151_v43 = vmul.f32 0.7978846, %v4143_v45  ;;  %v4123_v41 = vmul.f32 %v9014_v13, %v9014_v13  ;;  %4648 = vmatpush.bf16.msra.mxu0 %v6161_v19  ;;  %v6708_v19 = vld [vmem:[%s8067_s29 + $0x114] sm:$0xf]  ;;  %v6706_v12 = vld [vmem:[%s8067_s29 + $0x104] sm:$0xf] }
0x11d9   : > { %v4128_v60 = vmul.f32 %v4120_v36, %v9008_v15  ;;  %4661 = vmatpush.bf16.msra.mxu1 %v6233_v1  ;;  %v6313_v36 = vor.u32 %v6712_v39, %v6310_v33  ;;  %v6366_v1 = vld [vmem:[%s8067_s29 + $0x1a8] sm:$0xf0] }
0x11da   : > { %v4131_v32 = vmul.f32 %v4123_v41, %v9014_v13  ;;  %v4046_v51 = vpop.f32.mrf.mxu2  ;;  %v4060_v22 = vpop.f32.mrf.mxu3  ;;  %6964 = vtanh.f32 %v4151_v43  ;;  %4671 = vmatpush.bf16.msra.mxu2 %v6329_v4  ;;  %4685 = vmatpush.bf16.msra.mxu3 %v6393_v29  ;;  %v6690_v43 = vld [vmem:[%s8067_s29 + $0x84] sm:$0xf]  ;;  %v6222_v41 = vld [vmem:[%s8067_s29 + $0x88] sm:$0xf0]  ;;  %v6369_v39 = vor.u32 %v6726_v42, %v6366_v1 }
0x11db   : > { %v4136_v6 = vmul.f32 0.044715, %v4128_v60  ;;  %v4047_v9 = vadd.f32 %v4046_v51, %v3680_v53  ;;  %v4072_v52 = vpop.f32.mrf.mxu0  ;;  %v4086_v10 = vpop.f32.mrf.mxu1  ;;  %v6225_v62 = vor.u32 %v6690_v43, %v6222_v41  ;;  %v6385_v51 = vor.u32 %v6730_v48, %v6382_v63  ;;  %v6302_v4 = vld [vmem:[%s8067_s29 + $0x128] sm:$0xf0] }
0x11dc   : > { %v4139_v49 = vmul.f32 0.044715, %v4131_v32  ;;  %v4073_v11 = vadd.f32 %v4072_v52, %v3681_v50  ;;  %v6286_v33 = vld [vmem:[%s8067_s29 + $0x108] sm:$0xf0] }
0x11dd   : > { %v4144_v53 = vadd.f32 %v4136_v6, %v9008_v15  ;;  %v9043_v17 = vadd.f32 %v4060_v22, %v4047_v9  ;;  %v6710_v22 = vld [vmem:[%s8067_s29 + $0x124] sm:$0xf]  ;;  %4662 = vmatpush.bf16.msra.mxu1 %v6225_v62 }
0x11de   : > { %v4147_v31 = vadd.f32 %v4139_v49, %v9014_v13  ;;  %v9048_v55 = vadd.f32 %v4086_v10, %v4073_v11  ;;  %4672 = vmatpush.bf16.msra.mxu2 %v6321_v30  ;;  %v6305_v9 = vor.u32 %v6710_v22, %v6302_v4  ;;  %4686 = vmatpush.bf16.msra.mxu3 %v6385_v51  ;;  %v6294_v30 = vld [vmem:[%s8067_s29 + $0x118] sm:$0xf0]  ;;  %v6350_v51 = vld [vmem:[%s8067_s29 + $0x188] sm:$0xf0] }
0x11df   : > { %v4152_v57 = vmul.f32 0.7978846, %v4144_v53  ;;  %v4124_v18 = vmul.f32 %v9043_v17, %v9043_v17 }
0x11e0   : > { %v4155_v7 = vmul.f32 0.7978846, %v4147_v31  ;;  %v4121_v45 = vmul.f32 %v9048_v55, %v9048_v55  ;;  %v6965_v5 = vpop.eup %6964 }
0x11e1   : > { %6966 = vtanh.f32 %v4152_v57  ;;  %v4132_v8 = vmul.f32 %v4124_v18, %v9043_v17  ;;  %v4167_v26 = vadd.f32 1.0, %v6965_v5  ;;  %v6297_v18 = vor.u32 %v6708_v19, %v6294_v30 }
0x11e2   : > { %6968 = vtanh.f32 %v4155_v7  ;;  %v4129_v37 = vmul.f32 %v4121_v45, %v9048_v55  ;;  %v4100_v38 = vpop.f32.mrf.mxu2  ;;  %v4114_v40 = vpop.f32.mrf.mxu3  ;;  %4673 = vmatpush.bf16.msra.mxu2 %v6313_v36  ;;  %v6289_v5 = vor.u32 %v6706_v12, %v6286_v33 }
0x11e3   : > { %v4140_v58 = vmul.f32 0.044715, %v4132_v8  ;;  %v4101_v59 = vadd.f32 %v4100_v38, %v3682_v3  ;;  %v4074_v60 = vpop.f32.mrf.mxu0  ;;  %v4088_v6 = vpop.f32.mrf.mxu1  ;;  %v4175_v21 = vmul.f32 0.5, %v4167_v26  ;;  %v6358_v38 = vld [vmem:[%s8067_s29 + $0x198] sm:$0xf0] }
0x11e4   : > { %v4137_v0 = vmul.f32 0.044715, %v4129_v37  ;;  %v4075_v32 = vadd.f32 %v4074_v60, %v3681_v50  ;;  %v6728_v50 = vld [vmem:[%s8067_s29 + $0x1b4] sm:$0xf] }
0x11e5   : > { %v4148_v27 = vadd.f32 %v4140_v58, %v9043_v17  ;;  %v9074_v16 = vadd.f32 %v4114_v40, %v4101_v59  ;;  %v6377_v14 = vor.u32 %v6728_v50, %v6374_v34  ;;  %v6724_v37 = vld [vmem:[%s8067_s29 + $0x194] sm:$0xf]  ;;  %v4183_v40 = vmul.f32 %v4175_v21, %v8984_v28 }
0x11e6   : > { %v4145_v52 = vadd.f32 %v4137_v0, %v9048_v55  ;;  %v9077_v10 = vadd.f32 %v4088_v6, %v4075_v32  ;;  %4674 = vmatpush.bf16.msra.mxu2 %v6305_v9 }
0x11e7   : > { %v6967_v46 = vpop.eup %6966  ;;  %v4156_v49 = vmul.f32 0.7978846, %v4148_v27  ;;  %v4122_v11 = vmul.f32 %v9074_v16, %v9074_v16  ;;  %4687 = vmatpush.bf16.msra.mxu3 %v6377_v14 }
0x11e8   : > { %v6969_v20 = vpop.eup %6968  ;;  %v4153_v56 = vmul.f32 0.7978846, %v4145_v52  ;;  %v4125_v53 = vmul.f32 %v9077_v10, %v9077_v10  ;;  %v4168_v23 = vadd.f32 1.0, %v6967_v46 }
0x11e9   : > { %v4171_v54 = vadd.f32 1.0, %v6969_v20  ;;  %6970 = vtanh.f32 %v4156_v49  ;;  %v4130_v31 = vmul.f32 %v4122_v11, %v9074_v16 }
0x11ea   : > { %v4133_v24 = vmul.f32 %v4125_v53, %v9077_v10  ;;  %v4102_v57 = vpop.f32.mrf.mxu2  ;;  %6972 = vtanh.f32 %v4153_v56  ;;  %v4116_v36 = vpop.f32.mrf.mxu3  ;;  %4675 = vmatpush.bf16.msra.mxu2 %v6297_v18  ;;  %v4176_v63 = vmul.f32 0.5, %v4168_v23 }
0x11eb   : > { %v4179_v7 = vmul.f32 0.5, %v4171_v54  ;;  %v4138_v45 = vmul.f32 0.044715, %v4130_v31  ;;  %v4103_v29 = vadd.f32 %v4102_v57, %v3682_v3  ;;  %4688 = vmatpush.bf16.msra.mxu3 %v6369_v39  ;;  %v6361_v3 = vor.u32 %v6724_v37, %v6358_v38 }
0x11ec   : > { %v4141_v8 = vmul.f32 0.044715, %v4133_v24  ;;  %v4184_v6 = vmul.f32 %v4176_v63, %v9008_v15 }
0x11ed   : > { %v4187_v43 = vmul.f32 %v4179_v7, %v9014_v13  ;;  %v4146_v41 = vadd.f32 %v4138_v45, %v9074_v16  ;;  %v4117_v48 = vadd.f32 %v4116_v36, %v4103_v29  ;;  %v6722_v13 = vld [vmem:[%s8067_s29 + $0x184] sm:$0xf] }
0x11ee   : > { %v4149_v47 = vadd.f32 %v4141_v8, %v9077_v10  ;;  %4676 = vmatpush.bf16.msra.mxu2 %v6289_v5  ;;  %v6353_v26 = vor.u32 %v6722_v13, %v6350_v51 }
0x11ef   : > { %v6971_v58 = vpop.eup %6970  ;;  %v4191_v59 = vpack.c.bf16 %v4187_v43, %v4183_v40  ;;  %v4154_v60 = vmul.f32 0.7978846, %v4146_v41  ;;  %v4126_v62 = vmul.f32 %v4117_v48, %v4117_v48  ;;  %4689 = vmatpush.bf16.msra.mxu3 %v6361_v3 }
0x11f0   : > { %v4172_v0 = vadd.f32 1.0, %v6971_v58  ;;  %v4157_v32 = vmul.f32 0.7978846, %v4149_v47  ;;  %v6973_v22 = vpop.eup %6972 }
0x11f1   : > { %v4134_v28 = vmul.f32 %v4126_v62, %v4117_v48  ;;  %4593 = vmatmul.bf16.vlgmr.msrb.gmra.mxu0 %v4191_v59  ;;  %v4169_v52 = vadd.f32 1.0, %v6973_v22 }
0x11f2   : > { %v4180_v4 = vmul.f32 0.5, %v4172_v0  ;;  %6974 = vtanh.f32 %v4157_v32 }
0x11f3   : > { %6976 = vtanh.f32 %v4154_v60  ;;  %v4142_v27 = vmul.f32 0.044715, %v4134_v28  ;;  %4690 = vmatpush.bf16.msra.mxu3 %v6353_v26  ;;  %v4177_v14 = vmul.f32 0.5, %v4169_v52 }
0x11f4   : > { %v4188_v9 = vmul.f32 %v4180_v4, %v9043_v17 }
0x11f5   : > { %v4150_v50 = vadd.f32 %v4142_v27, %v4117_v48  ;;  %v4185_v19 = vmul.f32 %v4177_v14, %v9048_v55  ;;  %v4259_v55 = vld [vmem:[%s932_s16] sm:$0x3] }
0x11f6   : > { %v4192_v34 = vpack.c.bf16 %v4188_v9, %v4184_v6  ;;  %v4261_v18 = vperm.slane %v4259_v55, 0  ;;  %v4262_v40 = vperm.slane %v4259_v55, 1 }
0x11f7   : > { %v4158_v46 = vmul.f32 0.7978846, %v4150_v50 }
0x11f8   : > { %v6975_v49 = vpop.eup %6974  ;;  %4607 = vmatmul.bf16.vlgmr.msrb.gmra.mxu1 %v4192_v34 }
0x11f9   : > { %v6977_v11 = vpop.eup %6976  ;;  %v4173_v20 = vadd.f32 1.0, %v6975_v49  ;;  %6978 = vtanh.f32 %v4158_v46 }
0x11fa   : > { %v4170_v53 = vadd.f32 1.0, %v6977_v11 }
0x11fb   : > { %v4181_v56 = vmul.f32 0.5, %v4173_v20 }
0x11fc   : > { %v4178_v54 = vmul.f32 0.5, %v4170_v53 }
0x11fd   : > { %v4189_v21 = vmul.f32 %v4181_v56, %v9077_v10 }
0x11fe   : > { %v4186_v42 = vmul.f32 %v4178_v54, %v9074_v16 }
0x11ff   : > { %v6979_v15 = vpop.eup %6978  ;;  %v4193_v17 = vpack.c.bf16 %v4189_v21, %v4185_v19 }
0x1200   : > { %v4174_v31 = vadd.f32 1.0, %v6979_v15 }
0x1201   : > { %4621 = vmatmul.bf16.vlgmr.msrb.gmra.mxu2 %v4193_v17  ;;  %4649 = vmatmul.bf16.vlgmr.msra.gmra.mxu0 %v4191_v59 }
0x1202   : > { %v4182_v30 = vmul.f32 0.5, %v4174_v31 }
0x1204   : > { %v4190_v23 = vmul.f32 %v4182_v30, %v4117_v48 }
0x1206   : > { %v4194_v24 = vpack.c.bf16 %v4190_v23, %v4186_v42 }
0x1208   : > { %4635 = vmatmul.bf16.vlgmr.msrb.gmra.mxu3 %v4194_v24  ;;  %4663 = vmatmul.bf16.vlgmr.msra.gmra.mxu1 %v4192_v34 }
0x1211   : > { %4677 = vmatmul.bf16.vlgmr.msra.gmra.mxu2 %v4193_v17 }
0x1218   : > { %4691 = vmatmul.bf16.vlgmr.msra.gmra.mxu3 %v4194_v24 }
0x126e   : > { %v4594_v57 = vpop.f32.mrf.mxu0 }
0x126f   : > { %v4595_v12 = vadd.f32 %v4594_v57, %v4261_v18 }
0x1275   : > { %v4608_v10 = vpop.f32.mrf.mxu1 }
0x1276   : > { %v4596_v7 = vpop.f32.mrf.mxu0  ;;  %v4609_v45 = vadd.f32 %v4608_v10, %v4595_v12 }
0x1277   : > { %v4597_v36 = vadd.f32 %v4596_v7, %v4261_v18 }
0x127d   : > { %v4610_v29 = vpop.f32.mrf.mxu1 }
0x127e   : > { %v4611_v37 = vadd.f32 %v4610_v29, %v4597_v36  ;;  %v4650_v38 = vpop.f32.mrf.mxu0 }
0x127f   : > { %v4651_v58 = vadd.f32 %v4650_v38, %v4262_v40 }
0x1284   : > { %v4622_v1 = vpop.f32.mrf.mxu2 }
0x1285   : > { %v4623_v39 = vadd.f32 %v4622_v1, %v4609_v45  ;;  %v4664_v41 = vpop.f32.mrf.mxu1 }
0x1286   : > { %v4665_v60 = vadd.f32 %v4664_v41, %v4651_v58  ;;  %v4652_v63 = vpop.f32.mrf.mxu0 }
0x128b   : > { %v4636_v33 = vpop.f32.mrf.mxu3 }
0x128c   : > { %v4637_v8 = vadd.f32 %v4636_v33, %v4623_v39  ;;  %v4624_v16 = vpop.f32.mrf.mxu2 }
0x128d   : > { %v4625_v43 = vadd.f32 %v4624_v16, %v4611_v37  ;;  %v4666_v28 = vpop.f32.mrf.mxu1 }
0x128e   : > { %v4697_v5 = vadd.f32 %v4637_v8, %v8726_v25  ;;  %v4653_v25 = vadd.f32 %v4652_v63, %v4262_v40 }
0x1290   : > { %4701 = vst [vmem:[#allocation2 + $0x10] sm:$0xff] %v4697_v5  ;;  %v4667_v22 = vadd.f32 %v4666_v28, %v4653_v25 }
0x1293   : > { %v4638_v48 = vpop.f32.mrf.mxu3 }
0x1294   : > { %v4639_v47 = vadd.f32 %v4638_v48, %v4625_v43  ;;  %v4678_v3 = vpop.f32.mrf.mxu2 }
0x1295   : > { %v4679_v62 = vadd.f32 %v4678_v3, %v4665_v60 }
0x1296   : > { %v4699_v59 = vadd.f32 %v4639_v47, %v8732_v35 }
0x1298   : > { %4703 = vst [vmem:[#allocation2 + $0x18] sm:$0xff] %v4699_v59 }
0x129b   : > { %v4692_v0 = vpop.f32.mrf.mxu3 }
0x129c   : > { %v4693_v32 = vadd.f32 %v4692_v0, %v4679_v62  ;;  %v4680_v51 = vpop.f32.mrf.mxu2 }
0x129d   : > { %v4681_v4 = vadd.f32 %v4680_v51, %v4667_v22 }
0x129e   : > { %v4698_v13 = vadd.f32 %v4693_v32, %v8728_v61 }
0x12a0   : > { %4702 = vst [vmem:[#allocation2] sm:$0xff] %v4698_v13 }
0x12a3   : > { %v4694_v26 = vpop.f32.mrf.mxu3 }
0x12a4   : > { %v4695_v27 = vadd.f32 %v4694_v26, %v4681_v4  ;;  %4708 = sbr.rel (%p6410_p4) target bundleno = 5196 (0x144c), region = 164 }
0x12a6   : > { %v4700_v6 = vadd.f32 %v4695_v27, %v8734_v44 }
0x12a8   : > { %4704 = vst [vmem:[#allocation2 + $0x8] sm:$0xff] %v4700_v6 }
0x12a9   : > { %v4711_v35 = vadd.f32 %v4698_v13, %v4697_v5  ;;  %v4714_v9 = vadd.f32 %v4700_v6, %v4699_v59  ;;  %v6745_v15 = vld [vmem:[#allocation27 + $0x38] sm:$0xff]  ;;  %v6744_v54 = vld [vmem:[#allocation27 + $0x30] sm:$0xff]  ;;  %v6743_v30 = vld [vmem:[#allocation27 + $0x28] sm:$0xff] }
0x12aa   : > { %v6753_v17 = vld [vmem:[#allocation27 + $0x78] sm:$0xff]  ;;  %4913 = vmatpush.bf16.msra.mxu0 %v6745_v15  ;;  %v6752_v31 = vld [vmem:[#allocation27 + $0x70] sm:$0xff]  ;;  %v6751_v42 = vld [vmem:[#allocation27 + $0x68] sm:$0xff] }
0x12ab   : > { %4712 = vadd.xlane.f32.xlu0 %v4711_v35  ;;  %4927 = vmatpush.bf16.msra.mxu1 %v6753_v17  ;;  %v6742_v23 = vld [vmem:[#allocation27 + $0x20] sm:$0xff]  ;;  %v6741_v57 = vld [vmem:[#allocation27 + $0x18] sm:$0xff]  ;;  %v6740_v10 = vld [vmem:[#allocation27 + $0x10] sm:$0xff] }
0x12ac   : > { %v6750_v24 = vld [vmem:[#allocation27 + $0x60] sm:$0xff]  ;;  %v6749_v55 = vld [vmem:[#allocation27 + $0x58] sm:$0xff]  ;;  %v6748_v18 = vld [vmem:[#allocation27 + $0x50] sm:$0xff] }
0x12ad   : > { %v6739_v1 = vld [vmem:[#allocation27 + $0x8] sm:$0xff]  ;;  %v6738_v45 = vld [vmem:[#allocation27] sm:$0xff] }
0x12ae   : > { %4914 = vmatpush.bf16.msra.mxu0 %v6744_v54  ;;  %v6747_v12 = vld [vmem:[#allocation27 + $0x48] sm:$0xff]  ;;  %v6746_v29 = vld [vmem:[#allocation27 + $0x40] sm:$0xff] }
0x12af   : > { %4928 = vmatpush.bf16.msra.mxu1 %v6752_v31 }
0x12b2   : > { %4915 = vmatpush.bf16.msra.mxu0 %v6743_v30 }
0x12b3   : > { %4715 = vadd.xlane.f32.xlu0 %v4714_v9  ;;  %4929 = vmatpush.bf16.msra.mxu1 %v6751_v42 }
0x12b6   : > { %4916 = vmatpush.bf16.msra.mxu0 %v6742_v23 }
0x12b7   : > { %4930 = vmatpush.bf16.msra.mxu1 %v6750_v24 }
0x12ba   : > { %4917 = vmatpush.bf16.msra.mxu0 %v6741_v57 }
0x12bb   : > { %4931 = vmatpush.bf16.msra.mxu1 %v6749_v55 }
0x12be   : > { %4918 = vmatpush.bf16.msra.mxu0 %v6740_v10 }
0x12bf   : > { %4932 = vmatpush.bf16.msra.mxu1 %v6748_v18 }
0x12c2   : > { %4919 = vmatpush.bf16.msra.mxu0 %v6739_v1 }
0x12c3   : > { %4933 = vmatpush.bf16.msra.mxu1 %v6747_v12 }
0x12c6   : > { %4920 = vmatpush.bf16.msra.mxu0 %v6738_v45 }
0x12c7   : > { %4934 = vmatpush.bf16.msra.mxu1 %v6746_v29 }
0x131e   : > { %v4713_v52 = vpop.xlane.xlu0 %4712 }
0x131f   : > { %v4717_v50 = vmul.f32 %v4713_v52, %v8138_v2 }
0x1321   : > { %v9116_v61 = vsub.f32 %v4697_v5, %v4717_v50  ;;  %v9118_v34 = vsub.f32 %v4698_v13, %v4717_v50 }
0x1323   : > { %v4723_v46 = vmul.f32 %v9116_v61, %v9116_v61  ;;  %v4724_v44 = vmul.f32 %v9118_v34, %v9118_v34 }
0x1325   : > { %v4727_v49 = vadd.f32 %v4724_v44, %v4723_v46 }
0x1326   : > { %v4716_v11 = vpop.xlane.xlu0 %4715 }
0x1327   : > { %v4718_v14 = vmul.f32 %v4716_v11, %v8138_v2  ;;  %4728 = vadd.xlane.f32.xlu1 %v4727_v49  ;;  %v6984_v49 = vld [vmem:[#allocation29] ss:$0 sm:$0xff] }
0x1329   : > { %v9125_v20 = vsub.f32 %v4699_v59, %v4718_v14  ;;  %v9127_v56 = vsub.f32 %v4700_v6, %v4718_v14  ;;  %v4709_v59 = vld [vmem:[#allocation24] sm:$0x3] }
0x132a   : > { %v4762_v0 = vperm.slane %v4709_v59, 0  ;;  %v4763_v28 = vperm.slane %v4709_v59, 1 }
0x132b   : > { %v4725_v53 = vmul.f32 %v9125_v20, %v9125_v20  ;;  %v4726_v19 = vmul.f32 %v9127_v56, %v9127_v56 }
0x132d   : > { %v4730_v21 = vadd.f32 %v4726_v19, %v4725_v53 }
0x132f   : > { %4731 = vadd.xlane.f32.xlu1 %v4730_v21 }
0x139a   : > { %v4729_v7 = vpop.xlane.xlu1 %4728 }
0x139b   : > { %v4733_v39 = vmul.f32 %v4729_v7, %v8138_v2 }
0x139d   : > { %v4735_v33 = vadd.f32 1e-06, %v4733_v39 }
0x139f   : > { %6985 = vrsqrt.f32 %v4735_v33  ;;  %vm4743_vm13 = vweird.f32 %v4735_v33 }
0x13a2   : > { %v4732_v8 = vpop.xlane.xlu1 %4731 }
0x13a3   : > { %v4734_v16 = vmul.f32 %v4732_v8, %v8138_v2  ;;  %v4710_v2 = vld [vmem:[#allocation26] sm:$0x3] }
0x13a4   : > { %v4771_v51 = vperm.slane %v4710_v2, 0  ;;  %v4772_v22 = vperm.slane %v4710_v2, 1 }
0x13a5   : > { %v6986_v36 = vpop.eup %6985  ;;  %v4736_v5 = vadd.f32 1e-06, %v4734_v16 }
0x13a6   : > { %v4738_v37 = vmul.f32 %v6986_v36, %v4735_v33  ;;  %vm4744_vm12 = vweird.f32 %v6986_v36 }
0x13a7   : > { %6987 = vrsqrt.f32 %v4736_v5  ;;  %vm4745_vm14 = vmor %vm4743_vm13, %vm4744_vm12  ;;  %vm4753_vm0 = vweird.f32 %v4736_v5 }
0x13a8   : > { %v4739_v38 = vmul.f32 %v6986_v36, %v4738_v37 }
0x13aa   : > { %v4740_v40 = vmul.f32 0.5, %v4739_v38 }
0x13ac   : > { %v4741_v43 = vsub.f32 1.5, %v4740_v40 }
0x13ad   : > { %v6988_v41 = vpop.eup %6987 }
0x13ae   : > { %v4742_v48 = vmul.f32 %v6986_v36, %v4741_v43  ;;  %v4748_v47 = vmul.f32 %v6988_v41, %v4736_v5  ;;  %vm4754_vm15 = vweird.f32 %v6988_v41 }
0x13af   : > { %vm4755_vm1 = vmor %vm4753_vm0, %vm4754_vm15 }
0x13b0   : > { %v4749_v3 = vmul.f32 %v6988_v41, %v4748_v47  ;;  %v4746_v60 = vsel %vm4745_vm14, %v6986_v36, %v4742_v48 }
0x13b1   : > { %v4757_v63 = vmul.f32 %v4746_v60, %v9116_v61  ;;  %v4758_v32 = vmul.f32 %v4746_v60, %v9118_v34 }
0x13b2   : > { %v4750_v58 = vmul.f32 0.5, %v4749_v3 }
0x13b3   : > { %v4766_v26 = vmul.f32 %v4762_v0, %v4757_v63  ;;  %v4767_v6 = vmul.f32 %v4763_v28, %v4758_v32 }
0x13b4   : > { %v4751_v62 = vsub.f32 1.5, %v4750_v58 }
0x13b5   : > { %v4775_v52 = vadd.f32 %v4771_v51, %v4766_v26  ;;  %v4776_v61 = vadd.f32 %v4772_v22, %v4767_v6 }
0x13b6   : > { %v4752_v25 = vmul.f32 %v6988_v41, %v4751_v62 }
0x13b8   : > { %v4756_v13 = vsel %vm4755_vm1, %v6988_v41, %v4752_v25 }
0x13b9   : > { %v4759_v4 = vmul.f32 %v4756_v13, %v9125_v20  ;;  %v4760_v27 = vmul.f32 %v4756_v13, %v9127_v56 }
0x13bb   : > { %v4768_v35 = vmul.f32 %v4762_v0, %v4759_v4  ;;  %v4769_v9 = vmul.f32 %v4763_v28, %v4760_v27 }
0x13bd   : > { %v4777_v50 = vadd.f32 %v4771_v51, %v4768_v35  ;;  %v4778_v46 = vadd.f32 %v4772_v22, %v4769_v9 }
0x13bf   : > { %v4779_v34 = vpack.c.bf16 %v4777_v50, %v4775_v52  ;;  %v4780_v44 = vpack.c.bf16 %v4778_v46, %v4776_v61 }
0x13c1   : > { %4921 = vmatmul.bf16.vlgmr.msra.gmra.mxu0 %v4779_v34  ;;  %4935 = vmatmul.bf16.vlgmr.msra.gmra.mxu1 %v4780_v44 }
0x143e   : > { %v4922_v11 = vpop.f32.mrf.mxu0  ;;  %v4936_v14 = vpop.f32.mrf.mxu1 }
0x143f   : > { %v4923_v53 = vadd.f32 %v6984_v49, %v4922_v11 }
0x1441   : > { %v4937_v19 = vadd.f32 %v4936_v14, %v4923_v53 }
0x1443   : > { %4941 = vst [vmem:[#allocation30] sm:$0xff] %v4937_v19 }
0x1446   : > { %v4924_v20 = vpop.f32.mrf.mxu0  ;;  %v4938_v56 = vpop.f32.mrf.mxu1 }
0x1447   : > { %v4925_v21 = vadd.f32 %v6984_v49, %v4924_v20 }
0x1449   : > { %v4939_v15 = vadd.f32 %v4938_v56, %v4925_v21 }
0x144b   : > { %4942 = vst [vmem:[#allocation30 + $0x8] sm:$0xff] %v4939_v15 }
0x144c PF: > { %s9236_s10 = sld [smem:[#allocation43_spill]]  ;;  %s7594_s3 = smov [#allocation30]  }
0x144d   : > { %s4948_s23 = sshll.u32 %s7594_s3, 4  ;;  %s9237_s18 = sld [smem:[#allocation58_spill]]  ;;  %s4949_s23 = int_to_ptr.vmem [resolvable:$true] %s4948_s23 }
0x144e   : > { %s7595_s13 = smov 128   ;;  %s7596_s22 = smov 8  }
0x1452   : > { %p6834_p5 = scmp.eq.s32.totalorder %s9236_s10, 2 }
0x1453   : > { %s4950_s20 = sshll.u32 %s9237_s18, 4  ;;  %s4951_s20 = int_to_ptr.hbm [resolvable:$true] %s4950_s20 }
0x1454   : > { %6805 = dma.vmem_to_hbm [thread:$0]  (%p6834_p5), %s4949_s23, 256, %s4951_s20, [#allocation5], %s7595_s13, %s7595_s13, %s7596_s22  }
0x1455   : > { %7556 = dma.done.wait (%p6834_p5), [#allocation5], 256  }
0x1456   : > { %7558 = vsyncadd (%p6834_p5), [#allocation5], 4294967040 }
0x1457 PF: > { %s9238_s27 = sld [smem:[#allocation44_spill]] }
0x1458   : > { %s9239_s24 = sld [smem:[#allocation41_spill]] }
0x1459   : > { %s9240_s25 = sld [smem:[#allocation42_spill]] }
0x145a   : > { %s9241_s26 = sld [smem:[#allocation45_spill]] }
0x145d   : > { %p46_p8 = scmp.ge.s32.totalorder %s9238_s27, 5  }
0x145f   :  { %48 = sbr.rel (!%p46_p8) target bundleno = 29 (0x1d), region = 285 }
0x1464   :  { %4967 = vsyncpa [#allocation4], 1 }
0x1465   :  { %4969 = vsyncpa [#allocation4 + $0x1], 1 }
0x1466   :  { %4970 = vsyncpa [#allocation7], 1 }
0x1467   :  { %4972 = vsyncpa [#allocation7 + $0x1], 1 }
0x1468   :  { %4973 = vsyncpa [#allocation10], 1 }
0x1469   :  { %4975 = vsyncpa [#allocation10 + $0x1], 1 }
0x146a   :  { %4976 = vsyncpa [#allocation13], 1 }
0x146b   :  { %4978 = vsyncpa [#allocation13 + $0x1], 1 }
0x146c   :  { %4979 = vsyncpa [#allocation16], 1 }
0x146d   :  { %4981 = vsyncpa [#allocation16 + $0x1], 1 }
0x146e   :  { %4982 = vsyncpa [#allocation19], 1 }
0x146f   :  { %4984 = vsyncpa [#allocation19 + $0x1], 1 }
0x1470   :  { %4985 = vsyncpa [#allocation22], 1 }
0x1471   :  { %4987 = vsyncpa [#allocation22 + $0x1], 1 }
0x1472   :  { %4988 = vsyncpa [#allocation25], 1 }
0x1473   :  { %4989 = vsyncpa [#allocation28], 1 }
0x1474   :  { %4990 = vsyncpa [#allocation5], 1 }
0x1475   :  { %4992 = vsyncpa [#allocation5 + $0x1], 1 }

</bundles_post_ra>
